<compile_context>
chip_gen: v7x
topology: tpu7x:2x2x1
jax: 0.10.0
libtpu: 0.0.40
codegen_flags: <defaults>
</compile_context>

<pallas_src>
import jax
import jax.numpy as jnp
from jax import lax
from jax.experimental import pallas as pl
from jax.experimental.pallas import tpu as pltpu


# ----------------------------------------------------------------------------
# Fused forward kernel
# ----------------------------------------------------------------------------
def _fused_kernel(x_ref, rev_ref, gmask_ref, hmask_ref,
                  wih0_ref, whh0_ref, b0_ref, wih1_ref, whh1_ref, b1_ref,
                  shift1_ref, wtap1_ref, aff1_ref,
                  shift2_ref, wtap2_ref, aff2_ref,
                  pmat_ref, fcw_rec_ref, fcw_pool_ref, fcb_ref,
                  out_ref, xg_ref, hstep_ref):
    f32 = jnp.float32
    L = x_ref.shape[0]
    H2 = whh0_ref.shape[0]            # 2H  (== model hidden_size)
    K = wtap1_ref.shape[0]            # conv kernel size

    rev = rev_ref[...]                # (L, L) anti-identity: time reversal on the MXU
    gmask = gmask_ref[...]            # (1, 8H) 1.0 on backward-direction gate columns
    hmask = hmask_ref[...]            # (1, 2H) 1.0 on backward-direction hidden columns

    # -------------------- bidirectional LSTM layer --------------------
    def bilstm_layer(inp, wih_ref_, whh_ref_, b_ref_):
        # Input contribution to all gates / all steps: one MXU matmul.
        xg_raw = jnp.dot(inp, wih_ref_[...], preferred_element_type=f32) + b_ref_[...]
        # Backward direction consumes the sequence reversed -> reverse its gate columns.
        xg_rev = jnp.dot(rev, xg_raw, preferred_element_type=f32)
        xg_ref[...] = xg_raw + (xg_rev - xg_raw) * gmask

        whh = whh_ref_[...]           # (2H, 8H) block-diagonal recurrent weights
        # TODO(synk): explicit pltpu.matmul_push_rhs/acc_lhs/pop resident-RHS recurrence
        # not used (see header comment).

        def step(s, carry):
            h, c = carry              # (1, 2H) each, packed [fwd | bwd]
            g = xg_ref[pl.ds(s, 1), :] + jnp.dot(h, whh, preferred_element_type=f32)
            z = jax.nn.sigmoid(g)     # one full-vreg (1, 8H=128) transcendental pass
            i = z[:, 0:H2]
            f = z[:, H2:2 * H2]
            gg = 2.0 * z[:, 2 * H2:3 * H2] - 1.0   # == tanh(raw g): g cols pre-scaled x2
            o = z[:, 3 * H2:4 * H2]
            c_new = f * c + i * gg
            h_new = o * jnp.tanh(c_new)
            hstep_ref[pl.ds(s, 1), :] = h_new
            return h_new, c_new

        carry0 = (jnp.zeros((1, H2), f32), jnp.zeros((1, H2), f32))
        lax.fori_loop(0, L, step, carry0, unroll=True)

        hs = hstep_ref[...]           # backward half is in step order (time-reversed)
        hs_rev = jnp.dot(rev, hs, preferred_element_type=f32)
        return hs + (hs_rev - hs) * hmask      # time-aligned (L, 2H) PyTorch layout

    x = x_ref[...]

    # -------------------- recurrent module --------------------
    h1 = bilstm_layer(x, wih0_ref, whh0_ref, b0_ref)
    # TODO(synk): inter-layer LSTM dropout is identity in eval mode.
    h2 = bilstm_layer(h1, wih1_ref, whh1_ref, b1_ref)

    # -------------------- convolutional module --------------------
    def conv_relu_bn(inp, shift_ref_, wtap_ref_, aff_ref_):
        # Conv1d as K (shift-matrix @ inp) @ tap matmuls: all MXU, no misaligned
        # sublane slices / lane concats.
        y = None
        for k in range(K):
            xk = jnp.dot(shift_ref_[k], inp, preferred_element_type=f32)
            yk = jnp.dot(xk, wtap_ref_[k], preferred_element_type=f32)
            y = yk if y is None else y + yk
        y = jnp.maximum(y + aff_ref_[0:1, :], 0.0)       # conv bias + ReLU
        # TODO(synk): conv-branch dropout is identity in eval mode.
        return y * aff_ref_[1:2, :] + aff_ref_[2:3, :]   # BatchNorm (running stats, folded)

    y1 = conv_relu_bn(x, shift1_ref, wtap1_ref, aff1_ref)    # (l1, hidden)
    y2 = conv_relu_bn(y1, shift2_ref, wtap2_ref, aff2_ref)   # (l2, hidden)
    pooled = jnp.dot(pmat_ref[...], y2, preferred_element_type=f32)  # (n_pool, hidden)

    # -------------------- fc + sigmoid --------------------
    # flatten(cat([rec, pooled])) @ fc_w^T  ==  sum(h2 * fcw_rec) + sum(pooled * fcw_pool)
    # (fcw_rec is zero-padded offline so only the last num_states rows contribute).
    def sum_all(a):
        return jnp.sum(jnp.sum(a, axis=1, keepdims=True), axis=0, keepdims=True)

    total = (sum_all(h2 * fcw_rec_ref[...])
             + sum_all(pooled * fcw_pool_ref[...])
             + fcb_ref[...])
    out_ref[...] = jax.nn.sigmoid(total)


# ----------------------------------------------------------------------------
# Forward wrapper (single pallas_call)
# ----------------------------------------------------------------------------
def base_model_forward(x, packed):
    batch, L, Din = x.shape
    if batch != 1:
        raise ValueError("Base_Model forward assumes batch=1 (reshape(1, -1) in the spec).")
    xs = x[0].astype(jnp.float32)                 # (L, Din)

    H2 = packed["whh0"].shape[0]                  # model hidden_size
    H8 = packed["whh0"].shape[1]
    K = packed["wtap1"].shape[0]
    l1 = packed["shift1"].shape[1]
    l2 = packed["shift2"].shape[1]
    n_pool = packed["pmat"].shape[0]

    # Advisory cost estimate (lets XLA overlap surrounding ops with this us-scale kernel).
    mm = 0
    for din in (Din, H2):                         # two bidirectional LSTM layers
        mm += 2 * L * din * H8                    # input-gate matmul
        mm += 2 * L * L * H8                      # gate time reversal
        mm += 2 * L * H2 * H8                     # recurrence (L serial steps)
        mm += 2 * L * L * H2                      # hidden time reversal
    mm += K * (2 * l1 * L * Din + 2 * l1 * Din * H2)     # conv1 taps
    mm += K * (2 * l2 * l1 * H2 + 2 * l2 * H2 * H2)      # conv2 taps
    mm += 2 * n_pool * l2 * H2                    # avg-pool matmul
    flops = mm + 32 * L * H8                      # rough elementwise work
    trans = 2 * L * (H8 + H2) + 1                 # per-step sigmoid + tanh, final sigmoid

    args = (xs, packed["rev"], packed["gmask"], packed["hmask"],
            packed["wih0"], packed["whh0"], packed["b0"],
            packed["wih1"], packed["whh1"], packed["b1"],
            packed["shift1"], packed["wtap1"], packed["aff1"],
            packed["shift2"], packed["wtap2"], packed["aff2"],
            packed["pmat"], packed["fcw_rec"], packed["fcw_pool"], packed["fcb"])
    bytes_accessed = 4 + sum(int(a.size) * a.dtype.itemsize for a in args)

    return pl.pallas_call(
        _fused_kernel,
        out_shape=jax.ShapeDtypeStruct((1, 1), jnp.float32),
        scratch_shapes=[
            pltpu.VMEM((L, H8), jnp.float32),     # packed gate pre-activations (reused)
            pltpu.VMEM((L, H2), jnp.float32),     # per-step packed hidden states (reused)
        ],
        cost_estimate=pl.CostEstimate(flops=int(flops), transcendentals=int(trans),
                                      bytes_accessed=int(bytes_accessed)),
    )(*args)


# ----------------------------------------------------------------------------
# One-time parameter / constant packing (outside the jitted forward)
# ----------------------------------------------------------------------------
def pack_params(params, *, input_size, hidden_size, kernel_size, num_states,
                resolution, seq_len, eps=1e-5):
    del input_size  # implied by array shapes
    f32 = jnp.float32
    H = hidden_size // 2
    L = seq_len
    K = kernel_size
    l1 = L - K + 1
    l2 = l1 - K + 1
    pool_k = l2 // resolution
    n_pool = l2 // pool_k            # PyTorch avg_pool1d emits floor(l2/pool_k) windows
    if n_pool != resolution:
        raise ValueError(f"avg_pool1d would emit {n_pool} windows but fc expects "
                         f"{resolution}; adjust seq_len/resolution.")
    if num_states > L:
        raise ValueError("num_states must be <= seq_len")

    def pack_bilstm(p):
        # Packed gate-column layout (8H cols): [i_f, i_b, f_f, f_b, g_f, g_b, o_f, o_b],
        # each block H wide.  'g' gate columns pre-scaled by 2 so tanh(z) = 2*sigmoid(2z)-1.
        wih_cols, whh_cols, b_cols = [], [], []
        zeros = jnp.zeros((H, H), f32)
        for g in range(4):                       # PyTorch gate order: i, f, g, o
            scale = 2.0 if g == 2 else 1.0
            for d in ("f", "b"):
                wih = p[f"w_ih_{d}"][g * H:(g + 1) * H]          # (H, Din)
                whh = p[f"w_hh_{d}"][g * H:(g + 1) * H]          # (H, H)
                bias = (p[f"b_ih_{d}"][g * H:(g + 1) * H]
                        + p[f"b_hh_{d}"][g * H:(g + 1) * H])
                wih_cols.append(scale * wih.T)
                blk = scale * whh.T
                # Block-diagonal: fwd h rows drive fwd gate cols, bwd h rows drive bwd cols.
                whh_cols.append(jnp.concatenate([blk, zeros], axis=0) if d == "f"
                                else jnp.concatenate([zeros, blk], axis=0))
                b_cols.append(scale * bias)
        return (jnp.concatenate(wih_cols, axis=1).astype(f32),          # (Din, 8H)
                jnp.concatenate(whh_cols, axis=1).astype(f32),          # (2H, 8H)
                jnp.concatenate(b_cols).reshape(1, 8 * H).astype(f32))  # (1, 8H)

    def pack_conv(p):
        w = p["w"]                               # (Cout, Cin, K)
        wtap = jnp.transpose(w, (2, 1, 0)).astype(f32)        # (K, Cin, Cout)
        scale = p["gamma"] * lax.rsqrt(p["var"] + eps)
        shift = p["beta"] - p["mean"] * scale
        aff = jnp.stack([p["b"], scale, shift], axis=0)        # (3, Cout)
        return wtap, aff.astype(f32)

    def shift_matrices(lout, lin):
        r = jnp.arange(lout)[:, None]
        c = jnp.arange(lin)[None, :]
        return jnp.stack([(c == r + k).astype(f32) for k in range(K)], axis=0)

    wih0, whh0, b0 = pack_bilstm(params["lstm0"])
    wih1, whh1, b1 = pack_bilstm(params["lstm1"])
    wtap1, aff1 = pack_conv(params["conv1"])
    wtap2, aff2 = pack_conv(params["conv2"])
    shift1 = shift_matrices(l1, L)               # (K, l1, L)
    shift2 = shift_matrices(l2, l1)              # (K, l2, l1)

    idx = jnp.arange(L)
    rev = (idx[:, None] + idx[None, :] == L - 1).astype(f32)         # (L, L)
    gcol = jnp.arange(8 * H)
    gmask = (((gcol // H) % 2) == 1).astype(f32).reshape(1, 8 * H)   # bwd gate cols
    hmask = (jnp.arange(2 * H) >= H).astype(f32).reshape(1, 2 * H)   # bwd hidden cols

    pr = jnp.arange(n_pool)[:, None]
    pc = jnp.arange(l2)[None, :]
    pmat = jnp.where(pc // pool_k == pr, 1.0 / pool_k, 0.0).astype(f32)  # (n_pool, l2)

    fcw = params["fc_w"].reshape(num_states + resolution, hidden_size).astype(f32)
    fcw_rec = jnp.zeros((L, hidden_size), f32).at[L - num_states:, :].set(fcw[:num_states])
    fcw_pool = fcw[num_states:]                                      # (resolution, hidden)
    fcb = params["fc_b"].reshape(1, 1).astype(f32)

    return dict(rev=rev, gmask=gmask, hmask=hmask,
                wih0=wih0, whh0=whh0, b0=b0, wih1=wih1, whh1=whh1, b1=b1,
                shift1=shift1, wtap1=wtap1, aff1=aff1,
                shift2=shift2, wtap2=wtap2, aff2=aff2,
                pmat=pmat, fcw_rec=fcw_rec, fcw_pool=fcw_pool, fcb=fcb)


# ----------------------------------------------------------------------------
# Deterministic raw-parameter construction (PyTorch-style layouts)
# ----------------------------------------------------------------------------
def make_params(key, input_size, hidden_size, kernel_size, feat_dim):
    H = hidden_size // 2            # per-direction LSTM hidden size (bidirectional=True)
    keys = iter(jax.random.split(key, 64))

    def nrm(shape, scale=0.1):
        return scale * jax.random.normal(next(keys), shape, jnp.float32)

    def lstm_layer_params(din):
        out = {}
        for d in ("f", "b"):
            out[f"w_ih_{d}"] = nrm((4 * H, din))
            out[f"w_hh_{d}"] = nrm((4 * H, H))
            out[f"b_ih_{d}"] = nrm((4 * H,))
            out[f"b_hh_{d}"] = nrm((4 * H,))
        return out

    def conv_params(cin, cout):
        return dict(w=nrm((cout, cin, kernel_size)), b=nrm((cout,)),
                    gamma=jnp.ones((cout,), jnp.float32),
                    beta=jnp.zeros((cout,), jnp.float32),
                    mean=jnp.zeros((cout,), jnp.float32),
                    var=jnp.ones((cout,), jnp.float32))

    return dict(
        lstm0=lstm_layer_params(input_size),
        lstm1=lstm_layer_params(2 * H),
        conv1=conv_params(input_size, hidden_size),
        conv2=conv_params(hidden_size, hidden_size),
        fc_w=nrm((1, feat_dim)),
        fc_b=nrm((1,)),
    )


if __name__ == "__main__":
    # Small shapes consistent with the module's forward pass.
    input_size = 8
    hidden_size = 32
    kernel_size = 3
    num_states = 10
    resolution = 2
    seq_len = 16            # (seq_len - 4) divisible by resolution -> clean avg_pool1d
    batch = 1               # forced by reshape(1, -1) in the PyTorch model

    key = jax.random.PRNGKey(0)
    k_x, k_p = jax.random.split(key, 2)

    feat_dim = resolution * hidden_size + num_states * hidden_size
    params = make_params(k_p, input_size, hidden_size, kernel_size, feat_dim)
    packed = pack_params(params, input_size=input_size, hidden_size=hidden_size,
                         kernel_size=kernel_size, num_states=num_states,
                         resolution=resolution, seq_len=seq_len)

    x = jax.random.normal(k_x, (batch, seq_len, input_size), jnp.float32)

    fwd = jax.jit(base_model_forward)
    out = fwd(x, packed)
    out = jax.block_until_ready(out)
    assert out.shape == (1, 1), out.shape
    assert bool(jnp.all(jnp.isfinite(out)))
    print("KERNEL_OK")
</pallas_src>

<mosaic_0001>
module attributes {stable_mosaic.version = 11 : i64} {
  func.func @_fused_kernel(%arg0: memref<16x8xf32, #tpu.memory_space<vmem>>, %arg1: memref<16x16xf32, #tpu.memory_space<vmem>>, %arg2: memref<1x128xf32, #tpu.memory_space<vmem>>, %arg3: memref<1x32xf32, #tpu.memory_space<vmem>>, %arg4: memref<8x128xf32, #tpu.memory_space<vmem>>, %arg5: memref<32x128xf32, #tpu.memory_space<vmem>>, %arg6: memref<1x128xf32, #tpu.memory_space<vmem>>, %arg7: memref<32x128xf32, #tpu.memory_space<vmem>>, %arg8: memref<32x128xf32, #tpu.memory_space<vmem>>, %arg9: memref<1x128xf32, #tpu.memory_space<vmem>>, %arg10: memref<3x14x16xf32, #tpu.memory_space<vmem>>, %arg11: memref<3x8x32xf32, #tpu.memory_space<vmem>>, %arg12: memref<3x32xf32, #tpu.memory_space<vmem>>, %arg13: memref<3x12x14xf32, #tpu.memory_space<vmem>>, %arg14: memref<3x32x32xf32, #tpu.memory_space<vmem>>, %arg15: memref<3x32xf32, #tpu.memory_space<vmem>>, %arg16: memref<2x12xf32, #tpu.memory_space<vmem>>, %arg17: memref<16x32xf32, #tpu.memory_space<vmem>>, %arg18: memref<2x32xf32, #tpu.memory_space<vmem>>, %arg19: memref<1x1xf32, #tpu.memory_space<vmem>>, %arg20: memref<1x1xf32, #tpu.memory_space<vmem>>, %arg21: memref<16x128xf32, #tpu.memory_space<vmem>>, %arg22: memref<16x32xf32, #tpu.memory_space<vmem>>) attributes {dimension_semantics = [], scalar_prefetch = 0 : i64, scratch_operands = 2 : i64, tpu.core_type = #tpu.core_type<tc>} {
    %c0 = arith.constant 0 : index
    %c0_0 = arith.constant 0 : index
    %0 = vector.load %arg1[%c0, %c0_0] : memref<16x16xf32, #tpu.memory_space<vmem>>, vector<16x16xf32>
    %c0_1 = arith.constant 0 : index
    %c0_2 = arith.constant 0 : index
    %1 = vector.load %arg2[%c0_1, %c0_2] : memref<1x128xf32, #tpu.memory_space<vmem>>, vector<1x128xf32>
    %c0_3 = arith.constant 0 : index
    %c0_4 = arith.constant 0 : index
    %2 = vector.load %arg3[%c0_3, %c0_4] : memref<1x32xf32, #tpu.memory_space<vmem>>, vector<1x32xf32>
    %c0_5 = arith.constant 0 : index
    %c0_6 = arith.constant 0 : index
    %3 = vector.load %arg0[%c0_5, %c0_6] : memref<16x8xf32, #tpu.memory_space<vmem>>, vector<16x8xf32>
    %c0_7 = arith.constant 0 : index
    %c0_8 = arith.constant 0 : index
    %4 = vector.load %arg4[%c0_7, %c0_8] : memref<8x128xf32, #tpu.memory_space<vmem>>, vector<8x128xf32>
    %cst = arith.constant dense<0.000000e+00> : vector<16x128xf32>
    %5 = tpu.matmul %3, %4, %cst {dimension_numbers = #tpu.dot_dimension_numbers<[1], [0], [0], [1], [0, 0, 1, 1], [], []>} : vector<16x8xf32>, vector<8x128xf32>, vector<16x128xf32> -> vector<16x128xf32>
    %c0_9 = arith.constant 0 : index
    %c0_10 = arith.constant 0 : index
    %6 = vector.load %arg6[%c0_9, %c0_10] : memref<1x128xf32, #tpu.memory_space<vmem>>, vector<1x128xf32>
    %7 = vector.broadcast %6 : vector<1x128xf32> to vector<16x128xf32>
    %8 = arith.addf %5, %7 : vector<16x128xf32>
    %cst_11 = arith.constant dense<0.000000e+00> : vector<16x128xf32>
    %9 = tpu.matmul %0, %8, %cst_11 {dimension_numbers = #tpu.dot_dimension_numbers<[1], [0], [0], [1], [0, 0, 1, 1], [], []>} : vector<16x16xf32>, vector<16x128xf32>, vector<16x128xf32> -> vector<16x128xf32>
    %10 = arith.subf %9, %8 : vector<16x128xf32>
    %11 = vector.broadcast %1 : vector<1x128xf32> to vector<16x128xf32>
    %12 = arith.mulf %10, %11 : vector<16x128xf32>
    %13 = arith.addf %8, %12 : vector<16x128xf32>
    %c0_12 = arith.constant 0 : index
    %c0_13 = arith.constant 0 : index
    %14 = vector.load %arg21[%c0_12, %c0_13] : memref<16x128xf32, #tpu.memory_space<vmem>>, vector<16x128xf32>
    tpu.vector_store %arg21[%c0_12, %c0_13], %13 {strides = array<i32>} : memref<16x128xf32, #tpu.memory_space<vmem>>, vector<16x128xf32>,
    %c0_14 = arith.constant 0 : index
    %c0_15 = arith.constant 0 : index
    %15 = vector.load %arg5[%c0_14, %c0_15] : memref<32x128xf32, #tpu.memory_space<vmem>>, vector<32x128xf32>
    %cst_16 = arith.constant 0.000000e+00 : f32
    %16 = vector.broadcast %cst_16 : f32 to vector<1x32xf32>
    %cst_17 = arith.constant 0.000000e+00 : f32
    %17 = vector.broadcast %cst_17 : f32 to vector<1x32xf32>
    %c0_i32 = arith.constant 0 : i32
    %18 = arith.index_cast %c0_i32 : i32 to index
    %c0_18 = arith.constant 0 : index
    %19 = vector.load %arg21[%18, %c0_18] : memref<16x128xf32, #tpu.memory_space<vmem>>, vector<1x128xf32>
    %cst_19 = arith.constant dense<0.000000e+00> : vector<1x128xf32>
    %20 = tpu.matmul %16, %15, %cst_19 {dimension_numbers = #tpu.dot_dimension_numbers<[1], [0], [0], [1], [0, 0, 1, 1], [], []>} : vector<1x32xf32>, vector<32x128xf32>, vector<1x128xf32> -> vector<1x128xf32>
    %21 = arith.addf %19, %20 : vector<1x128xf32>
    %22 = arith.negf %21 : vector<1x128xf32>
    %23 = math.exp %22 : vector<1x128xf32>
    %cst_20 = arith.constant 1.000000e+00 : f32
    %24 = vector.broadcast %cst_20 : f32 to vector<1x128xf32>
    %25 = arith.addf %24, %23 : vector<1x128xf32>
    %26 = arith.divf %24, %25 : vector<1x128xf32>
    %27 = vector.extract_strided_slice %26 {offsets = [0, 0], sizes = [1, 32], strides = [1, 1]} : vector<1x128xf32> to vector<1x32xf32>
    %28 = vector.extract_strided_slice %26 {offsets = [0, 32], sizes = [1, 32], strides = [1, 1]} : vector<1x128xf32> to vector<1x32xf32>
    %29 = vector.extract_strided_slice %26 {offsets = [0, 64], sizes = [1, 32], strides = [1, 1]} : vector<1x128xf32> to vector<1x32xf32>
    %cst_21 = arith.constant 2.000000e+00 : f32
    %30 = vector.broadcast %cst_21 : f32 to vector<1x32xf32>
    %31 = arith.mulf %30, %29 : vector<1x32xf32>
    %cst_22 = arith.constant 1.000000e+00 : f32
    %32 = vector.broadcast %cst_22 : f32 to vector<1x32xf32>
    %33 = arith.subf %31, %32 : vector<1x32xf32>
    %34 = vector.extract_strided_slice %26 {offsets = [0, 96], sizes = [1, 32], strides = [1, 1]} : vector<1x128xf32> to vector<1x32xf32>
    %35 = arith.mulf %28, %17 : vector<1x32xf32>
    %36 = arith.mulf %27, %33 : vector<1x32xf32>
    %37 = arith.addf %35, %36 : vector<1x32xf32>
    %38 = math.tanh %37 : vector<1x32xf32>
    %39 = arith.mulf %34, %38 : vector<1x32xf32>
    %40 = arith.index_cast %c0_i32 : i32 to index
    %c0_23 = arith.constant 0 : index
    %41 = vector.load %arg22[%40, %c0_23] : memref<16x32xf32, #tpu.memory_space<vmem>>, vector<1x32xf32>
    tpu.vector_store %arg22[%40, %c0_23], %39 {strides = array<i32>} : memref<16x32xf32, #tpu.memory_space<vmem>>, vector<1x32xf32>,
    %c1_i32 = arith.constant 1 : i32
    %42 = arith.index_cast %c1_i32 : i32 to index
    %c0_24 = arith.constant 0 : index
    %43 = vector.load %arg21[%42, %c0_24] : memref<16x128xf32, #tpu.memory_space<vmem>>, vector<1x128xf32>
    %cst_25 = arith.constant dense<0.000000e+00> : vector<1x128xf32>
    %44 = tpu.matmul %39, %15, %cst_25 {dimension_numbers = #tpu.dot_dimension_numbers<[1], [0], [0], [1], [0, 0, 1, 1], [], []>} : vector<1x32xf32>, vector<32x128xf32>, vector<1x128xf32> -> vector<1x128xf32>
    %45 = arith.addf %43, %44 : vector<1x128xf32>
    %46 = arith.negf %45 : vector<1x128xf32>
    %47 = math.exp %46 : vector<1x128xf32>
    %cst_26 = arith.constant 1.000000e+00 : f32
    %48 = vector.broadcast %cst_26 : f32 to vector<1x128xf32>
    %49 = arith.addf %48, %47 : vector<1x128xf32>
    %50 = arith.divf %48, %49 : vector<1x128xf32>
    %51 = vector.extract_strided_slice %50 {offsets = [0, 0], sizes = [1, 32], strides = [1, 1]} : vector<1x128xf32> to vector<1x32xf32>
    %52 = vector.extract_strided_slice %50 {offsets = [0, 32], sizes = [1, 32], strides = [1, 1]} : vector<1x128xf32> to vector<1x32xf32>
    %53 = vector.extract_strided_slice %50 {offsets = [0, 64], sizes = [1, 32], strides = [1, 1]} : vector<1x128xf32> to vector<1x32xf32>
    %cst_27 = arith.constant 2.000000e+00 : f32
    %54 = vector.broadcast %cst_27 : f32 to vector<1x32xf32>
    %55 = arith.mulf %54, %53 : vector<1x32xf32>
    %cst_28 = arith.constant 1.000000e+00 : f32
    %56 = vector.broadcast %cst_28 : f32 to vector<1x32xf32>
    %57 = arith.subf %55, %56 : vector<1x32xf32>
    %58 = vector.extract_strided_slice %50 {offsets = [0, 96], sizes = [1, 32], strides = [1, 1]} : vector<1x128xf32> to vector<1x32xf32>
    %59 = arith.mulf %52, %37 : vector<1x32xf32>
    %60 = arith.mulf %51, %57 : vector<1x32xf32>
    %61 = arith.addf %59, %60 : vector<1x32xf32>
    %62 = math.tanh %61 : vector<1x32xf32>
    %63 = arith.mulf %58, %62 : vector<1x32xf32>
    %64 = arith.index_cast %c1_i32 : i32 to index
    %c0_29 = arith.constant 0 : index
    %65 = vector.load %arg22[%64, %c0_29] : memref<16x32xf32, #tpu.memory_space<vmem>>, vector<1x32xf32>
    tpu.vector_store %arg22[%64, %c0_29], %63 {strides = array<i32>} : memref<16x32xf32, #tpu.memory_space<vmem>>, vector<1x32xf32>,
    %c2_i32 = arith.constant 2 : i32
    %66 = arith.index_cast %c2_i32 : i32 to index
    %c0_30 = arith.constant 0 : index
    %67 = vector.load %arg21[%66, %c0_30] : memref<16x128xf32, #tpu.memory_space<vmem>>, vector<1x128xf32>
    %cst_31 = arith.constant dense<0.000000e+00> : vector<1x128xf32>
    %68 = tpu.matmul %63, %15, %cst_31 {dimension_numbers = #tpu.dot_dimension_numbers<[1], [0], [0], [1], [0, 0, 1, 1], [], []>} : vector<1x32xf32>, vector<32x128xf32>, vector<1x128xf32> -> vector<1x128xf32>
    %69 = arith.addf %67, %68 : vector<1x128xf32>
    %70 = arith.negf %69 : vector<1x128xf32>
    %71 = math.exp %70 : vector<1x128xf32>
    %cst_32 = arith.constant 1.000000e+00 : f32
    %72 = vector.broadcast %cst_32 : f32 to vector<1x128xf32>
    %73 = arith.addf %72, %71 : vector<1x128xf32>
    %74 = arith.divf %72, %73 : vector<1x128xf32>
    %75 = vector.extract_strided_slice %74 {offsets = [0, 0], sizes = [1, 32], strides = [1, 1]} : vector<1x128xf32> to vector<1x32xf32>
    %76 = vector.extract_strided_slice %74 {offsets = [0, 32], sizes = [1, 32], strides = [1, 1]} : vector<1x128xf32> to vector<1x32xf32>
    %77 = vector.extract_strided_slice %74 {offsets = [0, 64], sizes = [1, 32], strides = [1, 1]} : vector<1x128xf32> to vector<1x32xf32>
    %cst_33 = arith.constant 2.000000e+00 : f32
    %78 = vector.broadcast %cst_33 : f32 to vector<1x32xf32>
    %79 = arith.mulf %78, %77 : vector<1x32xf32>
    %cst_34 = arith.constant 1.000000e+00 : f32
    %80 = vector.broadcast %cst_34 : f32 to vector<1x32xf32>
    %81 = arith.subf %79, %80 : vector<1x32xf32>
    %82 = vector.extract_strided_slice %74 {offsets = [0, 96], sizes = [1, 32], strides = [1, 1]} : vector<1x128xf32> to vector<1x32xf32>
    %83 = arith.mulf %76, %61 : vector<1x32xf32>
    %84 = arith.mulf %75, %81 : vector<1x32xf32>
    %85 = arith.addf %83, %84 : vector<1x32xf32>
    %86 = math.tanh %85 : vector<1x32xf32>
    %87 = arith.mulf %82, %86 : vector<1x32xf32>
    %88 = arith.index_cast %c2_i32 : i32 to index
    %c0_35 = arith.constant 0 : index
    %89 = vector.load %arg22[%88, %c0_35] : memref<16x32xf32, #tpu.memory_space<vmem>>, vector<1x32xf32>
    tpu.vector_store %arg22[%88, %c0_35], %87 {strides = array<i32>} : memref<16x32xf32, #tpu.memory_space<vmem>>, vector<1x32xf32>,
    %c3_i32 = arith.constant 3 : i32
    %90 = arith.index_cast %c3_i32 : i32 to index
    %c0_36 = arith.constant 0 : index
    %91 = vector.load %arg21[%90, %c0_36] : memref<16x128xf32, #tpu.memory_space<vmem>>, vector<1x128xf32>
    %cst_37 = arith.constant dense<0.000000e+00> : vector<1x128xf32>
    %92 = tpu.matmul %87, %15, %cst_37 {dimension_numbers = #tpu.dot_dimension_numbers<[1], [0], [0], [1], [0, 0, 1, 1], [], []>} : vector<1x32xf32>, vector<32x128xf32>, vector<1x128xf32> -> vector<1x128xf32>
    %93 = arith.addf %91, %92 : vector<1x128xf32>
    %94 = arith.negf %93 : vector<1x128xf32>
    %95 = math.exp %94 : vector<1x128xf32>
    %cst_38 = arith.constant 1.000000e+00 : f32
    %96 = vector.broadcast %cst_38 : f32 to vector<1x128xf32>
    %97 = arith.addf %96, %95 : vector<1x128xf32>
    %98 = arith.divf %96, %97 : vector<1x128xf32>
    %99 = vector.extract_strided_slice %98 {offsets = [0, 0], sizes = [1, 32], strides = [1, 1]} : vector<1x128xf32> to vector<1x32xf32>
    %100 = vector.extract_strided_slice %98 {offsets = [0, 32], sizes = [1, 32], strides = [1, 1]} : vector<1x128xf32> to vector<1x32xf32>
    %101 = vector.extract_strided_slice %98 {offsets = [0, 64], sizes = [1, 32], strides = [1, 1]} : vector<1x128xf32> to vector<1x32xf32>
    %cst_39 = arith.constant 2.000000e+00 : f32
    %102 = vector.broadcast %cst_39 : f32 to vector<1x32xf32>
    %103 = arith.mulf %102, %101 : vector<1x32xf32>
    %cst_40 = arith.constant 1.000000e+00 : f32
    %104 = vector.broadcast %cst_40 : f32 to vector<1x32xf32>
    %105 = arith.subf %103, %104 : vector<1x32xf32>
    %106 = vector.extract_strided_slice %98 {offsets = [0, 96], sizes = [1, 32], strides = [1, 1]} : vector<1x128xf32> to vector<1x32xf32>
    %107 = arith.mulf %100, %85 : vector<1x32xf32>
    %108 = arith.mulf %99, %105 : vector<1x32xf32>
    %109 = arith.addf %107, %108 : vector<1x32xf32>
    %110 = math.tanh %109 : vector<1x32xf32>
    %111 = arith.mulf %106, %110 : vector<1x32xf32>
    %112 = arith.index_cast %c3_i32 : i32 to index
    %c0_41 = arith.constant 0 : index
    %113 = vector.load %arg22[%112, %c0_41] : memref<16x32xf32, #tpu.memory_space<vmem>>, vector<1x32xf32>
    tpu.vector_store %arg22[%112, %c0_41], %111 {strides = array<i32>} : memref<16x32xf32, #tpu.memory_space<vmem>>, vector<1x32xf32>,
    %c4_i32 = arith.constant 4 : i32
    %114 = arith.index_cast %c4_i32 : i32 to index
    %c0_42 = arith.constant 0 : index
    %115 = vector.load %arg21[%114, %c0_42] : memref<16x128xf32, #tpu.memory_space<vmem>>, vector<1x128xf32>
    %cst_43 = arith.constant dense<0.000000e+00> : vector<1x128xf32>
    %116 = tpu.matmul %111, %15, %cst_43 {dimension_numbers = #tpu.dot_dimension_numbers<[1], [0], [0], [1], [0, 0, 1, 1], [], []>} : vector<1x32xf32>, vector<32x128xf32>, vector<1x128xf32> -> vector<1x128xf32>
    %117 = arith.addf %115, %116 : vector<1x128xf32>
    %118 = arith.negf %117 : vector<1x128xf32>
    %119 = math.exp %118 : vector<1x128xf32>
    %cst_44 = arith.constant 1.000000e+00 : f32
    %120 = vector.broadcast %cst_44 : f32 to vector<1x128xf32>
    %121 = arith.addf %120, %119 : vector<1x128xf32>
    %122 = arith.divf %120, %121 : vector<1x128xf32>
    %123 = vector.extract_strided_slice %122 {offsets = [0, 0], sizes = [1, 32], strides = [1, 1]} : vector<1x128xf32> to vector<1x32xf32>
    %124 = vector.extract_strided_slice %122 {offsets = [0, 32], sizes = [1, 32], strides = [1, 1]} : vector<1x128xf32> to vector<1x32xf32>
    %125 = vector.extract_strided_slice %122 {offsets = [0, 64], sizes = [1, 32], strides = [1, 1]} : vector<1x128xf32> to vector<1x32xf32>
    %cst_45 = arith.constant 2.000000e+00 : f32
    %126 = vector.broadcast %cst_45 : f32 to vector<1x32xf32>
    %127 = arith.mulf %126, %125 : vector<1x32xf32>
    %cst_46 = arith.constant 1.000000e+00 : f32
    %128 = vector.broadcast %cst_46 : f32 to vector<1x32xf32>
    %129 = arith.subf %127, %128 : vector<1x32xf32>
    %130 = vector.extract_strided_slice %122 {offsets = [0, 96], sizes = [1, 32], strides = [1, 1]} : vector<1x128xf32> to vector<1x32xf32>
    %131 = arith.mulf %124, %109 : vector<1x32xf32>
    %132 = arith.mulf %123, %129 : vector<1x32xf32>
    %133 = arith.addf %131, %132 : vector<1x32xf32>
    %134 = math.tanh %133 : vector<1x32xf32>
    %135 = arith.mulf %130, %134 : vector<1x32xf32>
    %136 = arith.index_cast %c4_i32 : i32 to index
    %c0_47 = arith.constant 0 : index
    %137 = vector.load %arg22[%136, %c0_47] : memref<16x32xf32, #tpu.memory_space<vmem>>, vector<1x32xf32>
    tpu.vector_store %arg22[%136, %c0_47], %135 {strides = array<i32>} : memref<16x32xf32, #tpu.memory_space<vmem>>, vector<1x32xf32>,
    %c5_i32 = arith.constant 5 : i32
    %138 = arith.index_cast %c5_i32 : i32 to index
    %c0_48 = arith.constant 0 : index
    %139 = vector.load %arg21[%138, %c0_48] : memref<16x128xf32, #tpu.memory_space<vmem>>, vector<1x128xf32>
    %cst_49 = arith.constant dense<0.000000e+00> : vector<1x128xf32>
    %140 = tpu.matmul %135, %15, %cst_49 {dimension_numbers = #tpu.dot_dimension_numbers<[1], [0], [0], [1], [0, 0, 1, 1], [], []>} : vector<1x32xf32>, vector<32x128xf32>, vector<1x128xf32> -> vector<1x128xf32>
    %141 = arith.addf %139, %140 : vector<1x128xf32>
    %142 = arith.negf %141 : vector<1x128xf32>
    %143 = math.exp %142 : vector<1x128xf32>
    %cst_50 = arith.constant 1.000000e+00 : f32
    %144 = vector.broadcast %cst_50 : f32 to vector<1x128xf32>
    %145 = arith.addf %144, %143 : vector<1x128xf32>
    %146 = arith.divf %144, %145 : vector<1x128xf32>
    %147 = vector.extract_strided_slice %146 {offsets = [0, 0], sizes = [1, 32], strides = [1, 1]} : vector<1x128xf32> to vector<1x32xf32>
    %148 = vector.extract_strided_slice %146 {offsets = [0, 32], sizes = [1, 32], strides = [1, 1]} : vector<1x128xf32> to vector<1x32xf32>
    %149 = vector.extract_strided_slice %146 {offsets = [0, 64], sizes = [1, 32], strides = [1, 1]} : vector<1x128xf32> to vector<1x32xf32>
    %cst_51 = arith.constant 2.000000e+00 : f32
    %150 = vector.broadcast %cst_51 : f32 to vector<1x32xf32>
    %151 = arith.mulf %150, %149 : vector<1x32xf32>
    %cst_52 = arith.constant 1.000000e+00 : f32
    %152 = vector.broadcast %cst_52 : f32 to vector<1x32xf32>
    %153 = arith.subf %151, %152 : vector<1x32xf32>
    %154 = vector.extract_strided_slice %146 {offsets = [0, 96], sizes = [1, 32], strides = [1, 1]} : vector<1x128xf32> to vector<1x32xf32>
    %155 = arith.mulf %148, %133 : vector<1x32xf32>
    %156 = arith.mulf %147, %153 : vector<1x32xf32>
    %157 = arith.addf %155, %156 : vector<1x32xf32>
    %158 = math.tanh %157 : vector<1x32xf32>
    %159 = arith.mulf %154, %158 : vector<1x32xf32>
    %160 = arith.index_cast %c5_i32 : i32 to index
    %c0_53 = arith.constant 0 : index
    %161 = vector.load %arg22[%160, %c0_53] : memref<16x32xf32, #tpu.memory_space<vmem>>, vector<1x32xf32>
    tpu.vector_store %arg22[%160, %c0_53], %159 {strides = array<i32>} : memref<16x32xf32, #tpu.memory_space<vmem>>, vector<1x32xf32>,
    %c6_i32 = arith.constant 6 : i32
    %162 = arith.index_cast %c6_i32 : i32 to index
    %c0_54 = arith.constant 0 : index
    %163 = vector.load %arg21[%162, %c0_54] : memref<16x128xf32, #tpu.memory_space<vmem>>, vector<1x128xf32>
    %cst_55 = arith.constant dense<0.000000e+00> : vector<1x128xf32>
    %164 = tpu.matmul %159, %15, %cst_55 {dimension_numbers = #tpu.dot_dimension_numbers<[1], [0], [0], [1], [0, 0, 1, 1], [], []>} : vector<1x32xf32>, vector<32x128xf32>, vector<1x128xf32> -> vector<1x128xf32>
    %165 = arith.addf %163, %164 : vector<1x128xf32>
    %166 = arith.negf %165 : vector<1x128xf32>
    %167 = math.exp %166 : vector<1x128xf32>
    %cst_56 = arith.constant 1.000000e+00 : f32
    %168 = vector.broadcast %cst_56 : f32 to vector<1x128xf32>
    %169 = arith.addf %168, %167 : vector<1x128xf32>
    %170 = arith.divf %168, %169 : vector<1x128xf32>
    %171 = vector.extract_strided_slice %170 {offsets = [0, 0], sizes = [1, 32], strides = [1, 1]} : vector<1x128xf32> to vector<1x32xf32>
    %172 = vector.extract_strided_slice %170 {offsets = [0, 32], sizes = [1, 32], strides = [1, 1]} : vector<1x128xf32> to vector<1x32xf32>
    %173 = vector.extract_strided_slice %170 {offsets = [0, 64], sizes = [1, 32], strides = [1, 1]} : vector<1x128xf32> to vector<1x32xf32>
    %cst_57 = arith.constant 2.000000e+00 : f32
    %174 = vector.broadcast %cst_57 : f32 to vector<1x32xf32>
    %175 = arith.mulf %174, %173 : vector<1x32xf32>
    %cst_58 = arith.constant 1.000000e+00 : f32
    %176 = vector.broadcast %cst_58 : f32 to vector<1x32xf32>
    %177 = arith.subf %175, %176 : vector<1x32xf32>
    %178 = vector.extract_strided_slice %170 {offsets = [0, 96], sizes = [1, 32], strides = [1, 1]} : vector<1x128xf32> to vector<1x32xf32>
    %179 = arith.mulf %172, %157 : vector<1x32xf32>
    %180 = arith.mulf %171, %177 : vector<1x32xf32>
    %181 = arith.addf %179, %180 : vector<1x32xf32>
    %182 = math.tanh %181 : vector<1x32xf32>
    %183 = arith.mulf %178, %182 : vector<1x32xf32>
    %184 = arith.index_cast %c6_i32 : i32 to index
    %c0_59 = arith.constant 0 : index
    %185 = vector.load %arg22[%184, %c0_59] : memref<16x32xf32, #tpu.memory_space<vmem>>, vector<1x32xf32>
    tpu.vector_store %arg22[%184, %c0_59], %183 {strides = array<i32>} : memref<16x32xf32, #tpu.memory_space<vmem>>, vector<1x32xf32>,
    %c7_i32 = arith.constant 7 : i32
    %186 = arith.index_cast %c7_i32 : i32 to index
    %c0_60 = arith.constant 0 : index
    %187 = vector.load %arg21[%186, %c0_60] : memref<16x128xf32, #tpu.memory_space<vmem>>, vector<1x128xf32>
    %cst_61 = arith.constant dense<0.000000e+00> : vector<1x128xf32>
    %188 = tpu.matmul %183, %15, %cst_61 {dimension_numbers = #tpu.dot_dimension_numbers<[1], [0], [0], [1], [0, 0, 1, 1], [], []>} : vector<1x32xf32>, vector<32x128xf32>, vector<1x128xf32> -> vector<1x128xf32>
    %189 = arith.addf %187, %188 : vector<1x128xf32>
    %190 = arith.negf %189 : vector<1x128xf32>
    %191 = math.exp %190 : vector<1x128xf32>
    %cst_62 = arith.constant 1.000000e+00 : f32
    %192 = vector.broadcast %cst_62 : f32 to vector<1x128xf32>
    %193 = arith.addf %192, %191 : vector<1x128xf32>
    %194 = arith.divf %192, %193 : vector<1x128xf32>
    %195 = vector.extract_strided_slice %194 {offsets = [0, 0], sizes = [1, 32], strides = [1, 1]} : vector<1x128xf32> to vector<1x32xf32>
    %196 = vector.extract_strided_slice %194 {offsets = [0, 32], sizes = [1, 32], strides = [1, 1]} : vector<1x128xf32> to vector<1x32xf32>
    %197 = vector.extract_strided_slice %194 {offsets = [0, 64], sizes = [1, 32], strides = [1, 1]} : vector<1x128xf32> to vector<1x32xf32>
    %cst_63 = arith.constant 2.000000e+00 : f32
    %198 = vector.broadcast %cst_63 : f32 to vector<1x32xf32>
    %199 = arith.mulf %198, %197 : vector<1x32xf32>
    %cst_64 = arith.constant 1.000000e+00 : f32
    %200 = vector.broadcast %cst_64 : f32 to vector<1x32xf32>
    %201 = arith.subf %199, %200 : vector<1x32xf32>
    %202 = vector.extract_strided_slice %194 {offsets = [0, 96], sizes = [1, 32], strides = [1, 1]} : vector<1x128xf32> to vector<1x32xf32>
    %203 = arith.mulf %196, %181 : vector<1x32xf32>
    %204 = arith.mulf %195, %201 : vector<1x32xf32>
    %205 = arith.addf %203, %204 : vector<1x32xf32>
    %206 = math.tanh %205 : vector<1x32xf32>
    %207 = arith.mulf %202, %206 : vector<1x32xf32>
    %208 = arith.index_cast %c7_i32 : i32 to index
    %c0_65 = arith.constant 0 : index
    %209 = vector.load %arg22[%208, %c0_65] : memref<16x32xf32, #tpu.memory_space<vmem>>, vector<1x32xf32>
    tpu.vector_store %arg22[%208, %c0_65], %207 {strides = array<i32>} : memref<16x32xf32, #tpu.memory_space<vmem>>, vector<1x32xf32>,
    %c8_i32 = arith.constant 8 : i32
    %210 = arith.index_cast %c8_i32 : i32 to index
    %c0_66 = arith.constant 0 : index
    %211 = vector.load %arg21[%210, %c0_66] : memref<16x128xf32, #tpu.memory_space<vmem>>, vector<1x128xf32>
    %cst_67 = arith.constant dense<0.000000e+00> : vector<1x128xf32>
    %212 = tpu.matmul %207, %15, %cst_67 {dimension_numbers = #tpu.dot_dimension_numbers<[1], [0], [0], [1], [0, 0, 1, 1], [], []>} : vector<1x32xf32>, vector<32x128xf32>, vector<1x128xf32> -> vector<1x128xf32>
    %213 = arith.addf %211, %212 : vector<1x128xf32>
    %214 = arith.negf %213 : vector<1x128xf32>
    %215 = math.exp %214 : vector<1x128xf32>
    %cst_68 = arith.constant 1.000000e+00 : f32
    %216 = vector.broadcast %cst_68 : f32 to vector<1x128xf32>
    %217 = arith.addf %216, %215 : vector<1x128xf32>
    %218 = arith.divf %216, %217 : vector<1x128xf32>
    %219 = vector.extract_strided_slice %218 {offsets = [0, 0], sizes = [1, 32], strides = [1, 1]} : vector<1x128xf32> to vector<1x32xf32>
    %220 = vector.extract_strided_slice %218 {offsets = [0, 32], sizes = [1, 32], strides = [1, 1]} : vector<1x128xf32> to vector<1x32xf32>
    %221 = vector.extract_strided_slice %218 {offsets = [0, 64], sizes = [1, 32], strides = [1, 1]} : vector<1x128xf32> to vector<1x32xf32>
    %cst_69 = arith.constant 2.000000e+00 : f32
    %222 = vector.broadcast %cst_69 : f32 to vector<1x32xf32>
    %223 = arith.mulf %222, %221 : vector<1x32xf32>
    %cst_70 = arith.constant 1.000000e+00 : f32
    %224 = vector.broadcast %cst_70 : f32 to vector<1x32xf32>
    %225 = arith.subf %223, %224 : vector<1x32xf32>
    %226 = vector.extract_strided_slice %218 {offsets = [0, 96], sizes = [1, 32], strides = [1, 1]} : vector<1x128xf32> to vector<1x32xf32>
    %227 = arith.mulf %220, %205 : vector<1x32xf32>
    %228 = arith.mulf %219, %225 : vector<1x32xf32>
    %229 = arith.addf %227, %228 : vector<1x32xf32>
    %230 = math.tanh %229 : vector<1x32xf32>
    %231 = arith.mulf %226, %230 : vector<1x32xf32>
    %232 = arith.index_cast %c8_i32 : i32 to index
    %c0_71 = arith.constant 0 : index
    %233 = vector.load %arg22[%232, %c0_71] : memref<16x32xf32, #tpu.memory_space<vmem>>, vector<1x32xf32>
    tpu.vector_store %arg22[%232, %c0_71], %231 {strides = array<i32>} : memref<16x32xf32, #tpu.memory_space<vmem>>, vector<1x32xf32>,
    %c9_i32 = arith.constant 9 : i32
    %234 = arith.index_cast %c9_i32 : i32 to index
    %c0_72 = arith.constant 0 : index
    %235 = vector.load %arg21[%234, %c0_72] : memref<16x128xf32, #tpu.memory_space<vmem>>, vector<1x128xf32>
    %cst_73 = arith.constant dense<0.000000e+00> : vector<1x128xf32>
    %236 = tpu.matmul %231, %15, %cst_73 {dimension_numbers = #tpu.dot_dimension_numbers<[1], [0], [0], [1], [0, 0, 1, 1], [], []>} : vector<1x32xf32>, vector<32x128xf32>, vector<1x128xf32> -> vector<1x128xf32>
    %237 = arith.addf %235, %236 : vector<1x128xf32>
    %238 = arith.negf %237 : vector<1x128xf32>
    %239 = math.exp %238 : vector<1x128xf32>
    %cst_74 = arith.constant 1.000000e+00 : f32
    %240 = vector.broadcast %cst_74 : f32 to vector<1x128xf32>
    %241 = arith.addf %240, %239 : vector<1x128xf32>
    %242 = arith.divf %240, %241 : vector<1x128xf32>
    %243 = vector.extract_strided_slice %242 {offsets = [0, 0], sizes = [1, 32], strides = [1, 1]} : vector<1x128xf32> to vector<1x32xf32>
    %244 = vector.extract_strided_slice %242 {offsets = [0, 32], sizes = [1, 32], strides = [1, 1]} : vector<1x128xf32> to vector<1x32xf32>
    %245 = vector.extract_strided_slice %242 {offsets = [0, 64], sizes = [1, 32], strides = [1, 1]} : vector<1x128xf32> to vector<1x32xf32>
    %cst_75 = arith.constant 2.000000e+00 : f32
    %246 = vector.broadcast %cst_75 : f32 to vector<1x32xf32>
    %247 = arith.mulf %246, %245 : vector<1x32xf32>
    %cst_76 = arith.constant 1.000000e+00 : f32
    %248 = vector.broadcast %cst_76 : f32 to vector<1x32xf32>
    %249 = arith.subf %247, %248 : vector<1x32xf32>
    %250 = vector.extract_strided_slice %242 {offsets = [0, 96], sizes = [1, 32], strides = [1, 1]} : vector<1x128xf32> to vector<1x32xf32>
    %251 = arith.mulf %244, %229 : vector<1x32xf32>
    %252 = arith.mulf %243, %249 : vector<1x32xf32>
    %253 = arith.addf %251, %252 : vector<1x32xf32>
    %254 = math.tanh %253 : vector<1x32xf32>
    %255 = arith.mulf %250, %254 : vector<1x32xf32>
    %256 = arith.index_cast %c9_i32 : i32 to index
    %c0_77 = arith.constant 0 : index
    %257 = vector.load %arg22[%256, %c0_77] : memref<16x32xf32, #tpu.memory_space<vmem>>, vector<1x32xf32>
    tpu.vector_store %arg22[%256, %c0_77], %255 {strides = array<i32>} : memref<16x32xf32, #tpu.memory_space<vmem>>, vector<1x32xf32>,
    %c10_i32 = arith.constant 10 : i32
    %258 = arith.index_cast %c10_i32 : i32 to index
    %c0_78 = arith.constant 0 : index
    %259 = vector.load %arg21[%258, %c0_78] : memref<16x128xf32, #tpu.memory_space<vmem>>, vector<1x128xf32>
    %cst_79 = arith.constant dense<0.000000e+00> : vector<1x128xf32>
    %260 = tpu.matmul %255, %15, %cst_79 {dimension_numbers = #tpu.dot_dimension_numbers<[1], [0], [0], [1], [0, 0, 1, 1], [], []>} : vector<1x32xf32>, vector<32x128xf32>, vector<1x128xf32> -> vector<1x128xf32>
    %261 = arith.addf %259, %260 : vector<1x128xf32>
    %262 = arith.negf %261 : vector<1x128xf32>
    %263 = math.exp %262 : vector<1x128xf32>
    %cst_80 = arith.constant 1.000000e+00 : f32
    %264 = vector.broadcast %cst_80 : f32 to vector<1x128xf32>
    %265 = arith.addf %264, %263 : vector<1x128xf32>
    %266 = arith.divf %264, %265 : vector<1x128xf32>
    %267 = vector.extract_strided_slice %266 {offsets = [0, 0], sizes = [1, 32], strides = [1, 1]} : vector<1x128xf32> to vector<1x32xf32>
    %268 = vector.extract_strided_slice %266 {offsets = [0, 32], sizes = [1, 32], strides = [1, 1]} : vector<1x128xf32> to vector<1x32xf32>
    %269 = vector.extract_strided_slice %266 {offsets = [0, 64], sizes = [1, 32], strides = [1, 1]} : vector<1x128xf32> to vector<1x32xf32>
    %cst_81 = arith.constant 2.000000e+00 : f32
    %270 = vector.broadcast %cst_81 : f32 to vector<1x32xf32>
    %271 = arith.mulf %270, %269 : vector<1x32xf32>
    %cst_82 = arith.constant 1.000000e+00 : f32
    %272 = vector.broadcast %cst_82 : f32 to vector<1x32xf32>
    %273 = arith.subf %271, %272 : vector<1x32xf32>
    %274 = vector.extract_strided_slice %266 {offsets = [0, 96], sizes = [1, 32], strides = [1, 1]} : vector<1x128xf32> to vector<1x32xf32>
    %275 = arith.mulf %268, %253 : vector<1x32xf32>
    %276 = arith.mulf %267, %273 : vector<1x32xf32>
    %277 = arith.addf %275, %276 : vector<1x32xf32>
    %278 = math.tanh %277 : vector<1x32xf32>
    %279 = arith.mulf %274, %278 : vector<1x32xf32>
    %280 = arith.index_cast %c10_i32 : i32 to index
    %c0_83 = arith.constant 0 : index
    %281 = vector.load %arg22[%280, %c0_83] : memref<16x32xf32, #tpu.memory_space<vmem>>, vector<1x32xf32>
    tpu.vector_store %arg22[%280, %c0_83], %279 {strides = array<i32>} : memref<16x32xf32, #tpu.memory_space<vmem>>, vector<1x32xf32>,
    %c11_i32 = arith.constant 11 : i32
    %282 = arith.index_cast %c11_i32 : i32 to index
    %c0_84 = arith.constant 0 : index
    %283 = vector.load %arg21[%282, %c0_84] : memref<16x128xf32, #tpu.memory_space<vmem>>, vector<1x128xf32>
    %cst_85 = arith.constant dense<0.000000e+00> : vector<1x128xf32>
    %284 = tpu.matmul %279, %15, %cst_85 {dimension_numbers = #tpu.dot_dimension_numbers<[1], [0], [0], [1], [0, 0, 1, 1], [], []>} : vector<1x32xf32>, vector<32x128xf32>, vector<1x128xf32> -> vector<1x128xf32>
    %285 = arith.addf %283, %284 : vector<1x128xf32>
    %286 = arith.negf %285 : vector<1x128xf32>
    %287 = math.exp %286 : vector<1x128xf32>
    %cst_86 = arith.constant 1.000000e+00 : f32
    %288 = vector.broadcast %cst_86 : f32 to vector<1x128xf32>
    %289 = arith.addf %288, %287 : vector<1x128xf32>
    %290 = arith.divf %288, %289 : vector<1x128xf32>
    %291 = vector.extract_strided_slice %290 {offsets = [0, 0], sizes = [1, 32], strides = [1, 1]} : vector<1x128xf32> to vector<1x32xf32>
    %292 = vector.extract_strided_slice %290 {offsets = [0, 32], sizes = [1, 32], strides = [1, 1]} : vector<1x128xf32> to vector<1x32xf32>
    %293 = vector.extract_strided_slice %290 {offsets = [0, 64], sizes = [1, 32], strides = [1, 1]} : vector<1x128xf32> to vector<1x32xf32>
    %cst_87 = arith.constant 2.000000e+00 : f32
    %294 = vector.broadcast %cst_87 : f32 to vector<1x32xf32>
    %295 = arith.mulf %294, %293 : vector<1x32xf32>
    %cst_88 = arith.constant 1.000000e+00 : f32
    %296 = vector.broadcast %cst_88 : f32 to vector<1x32xf32>
    %297 = arith.subf %295, %296 : vector<1x32xf32>
    %298 = vector.extract_strided_slice %290 {offsets = [0, 96], sizes = [1, 32], strides = [1, 1]} : vector<1x128xf32> to vector<1x32xf32>
    %299 = arith.mulf %292, %277 : vector<1x32xf32>
    %300 = arith.mulf %291, %297 : vector<1x32xf32>
    %301 = arith.addf %299, %300 : vector<1x32xf32>
    %302 = math.tanh %301 : vector<1x32xf32>
    %303 = arith.mulf %298, %302 : vector<1x32xf32>
    %304 = arith.index_cast %c11_i32 : i32 to index
    %c0_89 = arith.constant 0 : index
    %305 = vector.load %arg22[%304, %c0_89] : memref<16x32xf32, #tpu.memory_space<vmem>>, vector<1x32xf32>
    tpu.vector_store %arg22[%304, %c0_89], %303 {strides = array<i32>} : memref<16x32xf32, #tpu.memory_space<vmem>>, vector<1x32xf32>,
    %c12_i32 = arith.constant 12 : i32
    %306 = arith.index_cast %c12_i32 : i32 to index
    %c0_90 = arith.constant 0 : index
    %307 = vector.load %arg21[%306, %c0_90] : memref<16x128xf32, #tpu.memory_space<vmem>>, vector<1x128xf32>
    %cst_91 = arith.constant dense<0.000000e+00> : vector<1x128xf32>
    %308 = tpu.matmul %303, %15, %cst_91 {dimension_numbers = #tpu.dot_dimension_numbers<[1], [0], [0], [1], [0, 0, 1, 1], [], []>} : vector<1x32xf32>, vector<32x128xf32>, vector<1x128xf32> -> vector<1x128xf32>
    %309 = arith.addf %307, %308 : vector<1x128xf32>
    %310 = arith.negf %309 : vector<1x128xf32>
    %311 = math.exp %310 : vector<1x128xf32>
    %cst_92 = arith.constant 1.000000e+00 : f32
    %312 = vector.broadcast %cst_92 : f32 to vector<1x128xf32>
    %313 = arith.addf %312, %311 : vector<1x128xf32>
    %314 = arith.divf %312, %313 : vector<1x128xf32>
    %315 = vector.extract_strided_slice %314 {offsets = [0, 0], sizes = [1, 32], strides = [1, 1]} : vector<1x128xf32> to vector<1x32xf32>
    %316 = vector.extract_strided_slice %314 {offsets = [0, 32], sizes = [1, 32], strides = [1, 1]} : vector<1x128xf32> to vector<1x32xf32>
    %317 = vector.extract_strided_slice %314 {offsets = [0, 64], sizes = [1, 32], strides = [1, 1]} : vector<1x128xf32> to vector<1x32xf32>
    %cst_93 = arith.constant 2.000000e+00 : f32
    %318 = vector.broadcast %cst_93 : f32 to vector<1x32xf32>
    %319 = arith.mulf %318, %317 : vector<1x32xf32>
    %cst_94 = arith.constant 1.000000e+00 : f32
    %320 = vector.broadcast %cst_94 : f32 to vector<1x32xf32>
    %321 = arith.subf %319, %320 : vector<1x32xf32>
    %322 = vector.extract_strided_slice %314 {offsets = [0, 96], sizes = [1, 32], strides = [1, 1]} : vector<1x128xf32> to vector<1x32xf32>
    %323 = arith.mulf %316, %301 : vector<1x32xf32>
    %324 = arith.mulf %315, %321 : vector<1x32xf32>
    %325 = arith.addf %323, %324 : vector<1x32xf32>
    %326 = math.tanh %325 : vector<1x32xf32>
    %327 = arith.mulf %322, %326 : vector<1x32xf32>
    %328 = arith.index_cast %c12_i32 : i32 to index
    %c0_95 = arith.constant 0 : index
    %329 = vector.load %arg22[%328, %c0_95] : memref<16x32xf32, #tpu.memory_space<vmem>>, vector<1x32xf32>
    tpu.vector_store %arg22[%328, %c0_95], %327 {strides = array<i32>} : memref<16x32xf32, #tpu.memory_space<vmem>>, vector<1x32xf32>,
    %c13_i32 = arith.constant 13 : i32
    %330 = arith.index_cast %c13_i32 : i32 to index
    %c0_96 = arith.constant 0 : index
    %331 = vector.load %arg21[%330, %c0_96] : memref<16x128xf32, #tpu.memory_space<vmem>>, vector<1x128xf32>
    %cst_97 = arith.constant dense<0.000000e+00> : vector<1x128xf32>
    %332 = tpu.matmul %327, %15, %cst_97 {dimension_numbers = #tpu.dot_dimension_numbers<[1], [0], [0], [1], [0, 0, 1, 1], [], []>} : vector<1x32xf32>, vector<32x128xf32>, vector<1x128xf32> -> vector<1x128xf32>
    %333 = arith.addf %331, %332 : vector<1x128xf32>
    %334 = arith.negf %333 : vector<1x128xf32>
    %335 = math.exp %334 : vector<1x128xf32>
    %cst_98 = arith.constant 1.000000e+00 : f32
    %336 = vector.broadcast %cst_98 : f32 to vector<1x128xf32>
    %337 = arith.addf %336, %335 : vector<1x128xf32>
    %338 = arith.divf %336, %337 : vector<1x128xf32>
    %339 = vector.extract_strided_slice %338 {offsets = [0, 0], sizes = [1, 32], strides = [1, 1]} : vector<1x128xf32> to vector<1x32xf32>
    %340 = vector.extract_strided_slice %338 {offsets = [0, 32], sizes = [1, 32], strides = [1, 1]} : vector<1x128xf32> to vector<1x32xf32>
    %341 = vector.extract_strided_slice %338 {offsets = [0, 64], sizes = [1, 32], strides = [1, 1]} : vector<1x128xf32> to vector<1x32xf32>
    %cst_99 = arith.constant 2.000000e+00 : f32
    %342 = vector.broadcast %cst_99 : f32 to vector<1x32xf32>
    %343 = arith.mulf %342, %341 : vector<1x32xf32>
    %cst_100 = arith.constant 1.000000e+00 : f32
    %344 = vector.broadcast %cst_100 : f32 to vector<1x32xf32>
    %345 = arith.subf %343, %344 : vector<1x32xf32>
    %346 = vector.extract_strided_slice %338 {offsets = [0, 96], sizes = [1, 32], strides = [1, 1]} : vector<1x128xf32> to vector<1x32xf32>
    %347 = arith.mulf %340, %325 : vector<1x32xf32>
    %348 = arith.mulf %339, %345 : vector<1x32xf32>
    %349 = arith.addf %347, %348 : vector<1x32xf32>
    %350 = math.tanh %349 : vector<1x32xf32>
    %351 = arith.mulf %346, %350 : vector<1x32xf32>
    %352 = arith.index_cast %c13_i32 : i32 to index
    %c0_101 = arith.constant 0 : index
    %353 = vector.load %arg22[%352, %c0_101] : memref<16x32xf32, #tpu.memory_space<vmem>>, vector<1x32xf32>
    tpu.vector_store %arg22[%352, %c0_101], %351 {strides = array<i32>} : memref<16x32xf32, #tpu.memory_space<vmem>>, vector<1x32xf32>,
    %c14_i32 = arith.constant 14 : i32
    %354 = arith.index_cast %c14_i32 : i32 to index
    %c0_102 = arith.constant 0 : index
    %355 = vector.load %arg21[%354, %c0_102] : memref<16x128xf32, #tpu.memory_space<vmem>>, vector<1x128xf32>
    %cst_103 = arith.constant dense<0.000000e+00> : vector<1x128xf32>
    %356 = tpu.matmul %351, %15, %cst_103 {dimension_numbers = #tpu.dot_dimension_numbers<[1], [0], [0], [1], [0, 0, 1, 1], [], []>} : vector<1x32xf32>, vector<32x128xf32>, vector<1x128xf32> -> vector<1x128xf32>
    %357 = arith.addf %355, %356 : vector<1x128xf32>
    %358 = arith.negf %357 : vector<1x128xf32>
    %359 = math.exp %358 : vector<1x128xf32>
    %cst_104 = arith.constant 1.000000e+00 : f32
    %360 = vector.broadcast %cst_104 : f32 to vector<1x128xf32>
    %361 = arith.addf %360, %359 : vector<1x128xf32>
    %362 = arith.divf %360, %361 : vector<1x128xf32>
    %363 = vector.extract_strided_slice %362 {offsets = [0, 0], sizes = [1, 32], strides = [1, 1]} : vector<1x128xf32> to vector<1x32xf32>
    %364 = vector.extract_strided_slice %362 {offsets = [0, 32], sizes = [1, 32], strides = [1, 1]} : vector<1x128xf32> to vector<1x32xf32>
    %365 = vector.extract_strided_slice %362 {offsets = [0, 64], sizes = [1, 32], strides = [1, 1]} : vector<1x128xf32> to vector<1x32xf32>
    %cst_105 = arith.constant 2.000000e+00 : f32
    %366 = vector.broadcast %cst_105 : f32 to vector<1x32xf32>
    %367 = arith.mulf %366, %365 : vector<1x32xf32>
    %cst_106 = arith.constant 1.000000e+00 : f32
    %368 = vector.broadcast %cst_106 : f32 to vector<1x32xf32>
    %369 = arith.subf %367, %368 : vector<1x32xf32>
    %370 = vector.extract_strided_slice %362 {offsets = [0, 96], sizes = [1, 32], strides = [1, 1]} : vector<1x128xf32> to vector<1x32xf32>
    %371 = arith.mulf %364, %349 : vector<1x32xf32>
    %372 = arith.mulf %363, %369 : vector<1x32xf32>
    %373 = arith.addf %371, %372 : vector<1x32xf32>
    %374 = math.tanh %373 : vector<1x32xf32>
    %375 = arith.mulf %370, %374 : vector<1x32xf32>
    %376 = arith.index_cast %c14_i32 : i32 to index
    %c0_107 = arith.constant 0 : index
    %377 = vector.load %arg22[%376, %c0_107] : memref<16x32xf32, #tpu.memory_space<vmem>>, vector<1x32xf32>
    tpu.vector_store %arg22[%376, %c0_107], %375 {strides = array<i32>} : memref<16x32xf32, #tpu.memory_space<vmem>>, vector<1x32xf32>,
    %c15_i32 = arith.constant 15 : i32
    %378 = arith.index_cast %c15_i32 : i32 to index
    %c0_108 = arith.constant 0 : index
    %379 = vector.load %arg21[%378, %c0_108] : memref<16x128xf32, #tpu.memory_space<vmem>>, vector<1x128xf32>
    %cst_109 = arith.constant dense<0.000000e+00> : vector<1x128xf32>
    %380 = tpu.matmul %375, %15, %cst_109 {dimension_numbers = #tpu.dot_dimension_numbers<[1], [0], [0], [1], [0, 0, 1, 1], [], []>} : vector<1x32xf32>, vector<32x128xf32>, vector<1x128xf32> -> vector<1x128xf32>
    %381 = arith.addf %379, %380 : vector<1x128xf32>
    %382 = arith.negf %381 : vector<1x128xf32>
    %383 = math.exp %382 : vector<1x128xf32>
    %cst_110 = arith.constant 1.000000e+00 : f32
    %384 = vector.broadcast %cst_110 : f32 to vector<1x128xf32>
    %385 = arith.addf %384, %383 : vector<1x128xf32>
    %386 = arith.divf %384, %385 : vector<1x128xf32>
    %387 = vector.extract_strided_slice %386 {offsets = [0, 0], sizes = [1, 32], strides = [1, 1]} : vector<1x128xf32> to vector<1x32xf32>
    %388 = vector.extract_strided_slice %386 {offsets = [0, 32], sizes = [1, 32], strides = [1, 1]} : vector<1x128xf32> to vector<1x32xf32>
    %389 = vector.extract_strided_slice %386 {offsets = [0, 64], sizes = [1, 32], strides = [1, 1]} : vector<1x128xf32> to vector<1x32xf32>
    %cst_111 = arith.constant 2.000000e+00 : f32
    %390 = vector.broadcast %cst_111 : f32 to vector<1x32xf32>
    %391 = arith.mulf %390, %389 : vector<1x32xf32>
    %cst_112 = arith.constant 1.000000e+00 : f32
    %392 = vector.broadcast %cst_112 : f32 to vector<1x32xf32>
    %393 = arith.subf %391, %392 : vector<1x32xf32>
    %394 = vector.extract_strided_slice %386 {offsets = [0, 96], sizes = [1, 32], strides = [1, 1]} : vector<1x128xf32> to vector<1x32xf32>
    %395 = arith.mulf %388, %373 : vector<1x32xf32>
    %396 = arith.mulf %387, %393 : vector<1x32xf32>
    %397 = arith.addf %395, %396 : vector<1x32xf32>
    %398 = math.tanh %397 : vector<1x32xf32>
    %399 = arith.mulf %394, %398 : vector<1x32xf32>
    %400 = arith.index_cast %c15_i32 : i32 to index
    %c0_113 = arith.constant 0 : index
    %401 = vector.load %arg22[%400, %c0_113] : memref<16x32xf32, #tpu.memory_space<vmem>>, vector<1x32xf32>
    tpu.vector_store %arg22[%400, %c0_113], %399 {strides = array<i32>} : memref<16x32xf32, #tpu.memory_space<vmem>>, vector<1x32xf32>,
    %c16_i32 = arith.constant 16 : i32
    %c0_114 = arith.constant 0 : index
    %c0_115 = arith.constant 0 : index
    %402 = vector.load %arg22[%c0_114, %c0_115] : memref<16x32xf32, #tpu.memory_space<vmem>>, vector<16x32xf32>
    %cst_116 = arith.constant dense<0.000000e+00> : vector<16x32xf32>
    %403 = tpu.matmul %0, %402, %cst_116 {dimension_numbers = #tpu.dot_dimension_numbers<[1], [0], [0], [1], [0, 0, 1, 1], [], []>} : vector<16x16xf32>, vector<16x32xf32>, vector<16x32xf32> -> vector<16x32xf32>
    %404 = arith.subf %403, %402 : vector<16x32xf32>
    %405 = vector.broadcast %2 : vector<1x32xf32> to vector<16x32xf32>
    %406 = arith.mulf %404, %405 : vector<16x32xf32>
    %407 = arith.addf %402, %406 : vector<16x32xf32>
    %c0_117 = arith.constant 0 : index
    %c0_118 = arith.constant 0 : index
    %408 = vector.load %arg7[%c0_117, %c0_118] : memref<32x128xf32, #tpu.memory_space<vmem>>, vector<32x128xf32>
    %cst_119 = arith.constant dense<0.000000e+00> : vector<16x128xf32>
    %409 = tpu.matmul %407, %408, %cst_119 {dimension_numbers = #tpu.dot_dimension_numbers<[1], [0], [0], [1], [0, 0, 1, 1], [], []>} : vector<16x32xf32>, vector<32x128xf32>, vector<16x128xf32> -> vector<16x128xf32>
    %c0_120 = arith.constant 0 : index
    %c0_121 = arith.constant 0 : index
    %410 = vector.load %arg9[%c0_120, %c0_121] : memref<1x128xf32, #tpu.memory_space<vmem>>, vector<1x128xf32>
    %411 = vector.broadcast %410 : vector<1x128xf32> to vector<16x128xf32>
    %412 = arith.addf %409, %411 : vector<16x128xf32>
    %cst_122 = arith.constant dense<0.000000e+00> : vector<16x128xf32>
    %413 = tpu.matmul %0, %412, %cst_122 {dimension_numbers = #tpu.dot_dimension_numbers<[1], [0], [0], [1], [0, 0, 1, 1], [], []>} : vector<16x16xf32>, vector<16x128xf32>, vector<16x128xf32> -> vector<16x128xf32>
    %414 = arith.subf %413, %412 : vector<16x128xf32>
    %415 = vector.broadcast %1 : vector<1x128xf32> to vector<16x128xf32>
    %416 = arith.mulf %414, %415 : vector<16x128xf32>
    %417 = arith.addf %412, %416 : vector<16x128xf32>
    %c0_123 = arith.constant 0 : index
    %c0_124 = arith.constant 0 : index
    %418 = vector.load %arg21[%c0_123, %c0_124] : memref<16x128xf32, #tpu.memory_space<vmem>>, vector<16x128xf32>
    tpu.vector_store %arg21[%c0_123, %c0_124], %417 {strides = array<i32>} : memref<16x128xf32, #tpu.memory_space<vmem>>, vector<16x128xf32>,
    %c0_125 = arith.constant 0 : index
    %c0_126 = arith.constant 0 : index
    %419 = vector.load %arg8[%c0_125, %c0_126] : memref<32x128xf32, #tpu.memory_space<vmem>>, vector<32x128xf32>
    %cst_127 = arith.constant 0.000000e+00 : f32
    %420 = vector.broadcast %cst_127 : f32 to vector<1x32xf32>
    %cst_128 = arith.constant 0.000000e+00 : f32
    %421 = vector.broadcast %cst_128 : f32 to vector<1x32xf32>
    %c0_i32_129 = arith.constant 0 : i32
    %422 = arith.index_cast %c0_i32_129 : i32 to index
    %c0_130 = arith.constant 0 : index
    %423 = vector.load %arg21[%422, %c0_130] : memref<16x128xf32, #tpu.memory_space<vmem>>, vector<1x128xf32>
    %cst_131 = arith.constant dense<0.000000e+00> : vector<1x128xf32>
    %424 = tpu.matmul %420, %419, %cst_131 {dimension_numbers = #tpu.dot_dimension_numbers<[1], [0], [0], [1], [0, 0, 1, 1], [], []>} : vector<1x32xf32>, vector<32x128xf32>, vector<1x128xf32> -> vector<1x128xf32>
    %425 = arith.addf %423, %424 : vector<1x128xf32>
    %426 = arith.negf %425 : vector<1x128xf32>
    %427 = math.exp %426 : vector<1x128xf32>
    %cst_132 = arith.constant 1.000000e+00 : f32
    %428 = vector.broadcast %cst_132 : f32 to vector<1x128xf32>
    %429 = arith.addf %428, %427 : vector<1x128xf32>
    %430 = arith.divf %428, %429 : vector<1x128xf32>
    %431 = vector.extract_strided_slice %430 {offsets = [0, 0], sizes = [1, 32], strides = [1, 1]} : vector<1x128xf32> to vector<1x32xf32>
    %432 = vector.extract_strided_slice %430 {offsets = [0, 32], sizes = [1, 32], strides = [1, 1]} : vector<1x128xf32> to vector<1x32xf32>
    %433 = vector.extract_strided_slice %430 {offsets = [0, 64], sizes = [1, 32], strides = [1, 1]} : vector<1x128xf32> to vector<1x32xf32>
    %cst_133 = arith.constant 2.000000e+00 : f32
    %434 = vector.broadcast %cst_133 : f32 to vector<1x32xf32>
    %435 = arith.mulf %434, %433 : vector<1x32xf32>
    %cst_134 = arith.constant 1.000000e+00 : f32
    %436 = vector.broadcast %cst_134 : f32 to vector<1x32xf32>
    %437 = arith.subf %435, %436 : vector<1x32xf32>
    %438 = vector.extract_strided_slice %430 {offsets = [0, 96], sizes = [1, 32], strides = [1, 1]} : vector<1x128xf32> to vector<1x32xf32>
    %439 = arith.mulf %432, %421 : vector<1x32xf32>
    %440 = arith.mulf %431, %437 : vector<1x32xf32>
    %441 = arith.addf %439, %440 : vector<1x32xf32>
    %442 = math.tanh %441 : vector<1x32xf32>
    %443 = arith.mulf %438, %442 : vector<1x32xf32>
    %444 = arith.index_cast %c0_i32_129 : i32 to index
    %c0_135 = arith.constant 0 : index
    %445 = vector.load %arg22[%444, %c0_135] : memref<16x32xf32, #tpu.memory_space<vmem>>, vector<1x32xf32>
    tpu.vector_store %arg22[%444, %c0_135], %443 {strides = array<i32>} : memref<16x32xf32, #tpu.memory_space<vmem>>, vector<1x32xf32>,
    %c1_i32_136 = arith.constant 1 : i32
    %446 = arith.index_cast %c1_i32_136 : i32 to index
    %c0_137 = arith.constant 0 : index
    %447 = vector.load %arg21[%446, %c0_137] : memref<16x128xf32, #tpu.memory_space<vmem>>, vector<1x128xf32>
    %cst_138 = arith.constant dense<0.000000e+00> : vector<1x128xf32>
    %448 = tpu.matmul %443, %419, %cst_138 {dimension_numbers = #tpu.dot_dimension_numbers<[1], [0], [0], [1], [0, 0, 1, 1], [], []>} : vector<1x32xf32>, vector<32x128xf32>, vector<1x128xf32> -> vector<1x128xf32>
    %449 = arith.addf %447, %448 : vector<1x128xf32>
    %450 = arith.negf %449 : vector<1x128xf32>
    %451 = math.exp %450 : vector<1x128xf32>
    %cst_139 = arith.constant 1.000000e+00 : f32
    %452 = vector.broadcast %cst_139 : f32 to vector<1x128xf32>
    %453 = arith.addf %452, %451 : vector<1x128xf32>
    %454 = arith.divf %452, %453 : vector<1x128xf32>
    %455 = vector.extract_strided_slice %454 {offsets = [0, 0], sizes = [1, 32], strides = [1, 1]} : vector<1x128xf32> to vector<1x32xf32>
    %456 = vector.extract_strided_slice %454 {offsets = [0, 32], sizes = [1, 32], strides = [1, 1]} : vector<1x128xf32> to vector<1x32xf32>
    %457 = vector.extract_strided_slice %454 {offsets = [0, 64], sizes = [1, 32], strides = [1, 1]} : vector<1x128xf32> to vector<1x32xf32>
    %cst_140 = arith.constant 2.000000e+00 : f32
    %458 = vector.broadcast %cst_140 : f32 to vector<1x32xf32>
    %459 = arith.mulf %458, %457 : vector<1x32xf32>
    %cst_141 = arith.constant 1.000000e+00 : f32
    %460 = vector.broadcast %cst_141 : f32 to vector<1x32xf32>
    %461 = arith.subf %459, %460 : vector<1x32xf32>
    %462 = vector.extract_strided_slice %454 {offsets = [0, 96], sizes = [1, 32], strides = [1, 1]} : vector<1x128xf32> to vector<1x32xf32>
    %463 = arith.mulf %456, %441 : vector<1x32xf32>
    %464 = arith.mulf %455, %461 : vector<1x32xf32>
    %465 = arith.addf %463, %464 : vector<1x32xf32>
    %466 = math.tanh %465 : vector<1x32xf32>
    %467 = arith.mulf %462, %466 : vector<1x32xf32>
    %468 = arith.index_cast %c1_i32_136 : i32 to index
    %c0_142 = arith.constant 0 : index
    %469 = vector.load %arg22[%468, %c0_142] : memref<16x32xf32, #tpu.memory_space<vmem>>, vector<1x32xf32>
    tpu.vector_store %arg22[%468, %c0_142], %467 {strides = array<i32>} : memref<16x32xf32, #tpu.memory_space<vmem>>, vector<1x32xf32>,
    %c2_i32_143 = arith.constant 2 : i32
    %470 = arith.index_cast %c2_i32_143 : i32 to index
    %c0_144 = arith.constant 0 : index
    %471 = vector.load %arg21[%470, %c0_144] : memref<16x128xf32, #tpu.memory_space<vmem>>, vector<1x128xf32>
    %cst_145 = arith.constant dense<0.000000e+00> : vector<1x128xf32>
    %472 = tpu.matmul %467, %419, %cst_145 {dimension_numbers = #tpu.dot_dimension_numbers<[1], [0], [0], [1], [0, 0, 1, 1], [], []>} : vector<1x32xf32>, vector<32x128xf32>, vector<1x128xf32> -> vector<1x128xf32>
    %473 = arith.addf %471, %472 : vector<1x128xf32>
    %474 = arith.negf %473 : vector<1x128xf32>
    %475 = math.exp %474 : vector<1x128xf32>
    %cst_146 = arith.constant 1.000000e+00 : f32
    %476 = vector.broadcast %cst_146 : f32 to vector<1x128xf32>
    %477 = arith.addf %476, %475 : vector<1x128xf32>
    %478 = arith.divf %476, %477 : vector<1x128xf32>
    %479 = vector.extract_strided_slice %478 {offsets = [0, 0], sizes = [1, 32], strides = [1, 1]} : vector<1x128xf32> to vector<1x32xf32>
    %480 = vector.extract_strided_slice %478 {offsets = [0, 32], sizes = [1, 32], strides = [1, 1]} : vector<1x128xf32> to vector<1x32xf32>
    %481 = vector.extract_strided_slice %478 {offsets = [0, 64], sizes = [1, 32], strides = [1, 1]} : vector<1x128xf32> to vector<1x32xf32>
    %cst_147 = arith.constant 2.000000e+00 : f32
    %482 = vector.broadcast %cst_147 : f32 to vector<1x32xf32>
    %483 = arith.mulf %482, %481 : vector<1x32xf32>
    %cst_148 = arith.constant 1.000000e+00 : f32
    %484 = vector.broadcast %cst_148 : f32 to vector<1x32xf32>
    %485 = arith.subf %483, %484 : vector<1x32xf32>
    %486 = vector.extract_strided_slice %478 {offsets = [0, 96], sizes = [1, 32], strides = [1, 1]} : vector<1x128xf32> to vector<1x32xf32>
    %487 = arith.mulf %480, %465 : vector<1x32xf32>
    %488 = arith.mulf %479, %485 : vector<1x32xf32>
    %489 = arith.addf %487, %488 : vector<1x32xf32>
    %490 = math.tanh %489 : vector<1x32xf32>
    %491 = arith.mulf %486, %490 : vector<1x32xf32>
    %492 = arith.index_cast %c2_i32_143 : i32 to index
    %c0_149 = arith.constant 0 : index
    %493 = vector.load %arg22[%492, %c0_149] : memref<16x32xf32, #tpu.memory_space<vmem>>, vector<1x32xf32>
    tpu.vector_store %arg22[%492, %c0_149], %491 {strides = array<i32>} : memref<16x32xf32, #tpu.memory_space<vmem>>, vector<1x32xf32>,
    %c3_i32_150 = arith.constant 3 : i32
    %494 = arith.index_cast %c3_i32_150 : i32 to index
    %c0_151 = arith.constant 0 : index
    %495 = vector.load %arg21[%494, %c0_151] : memref<16x128xf32, #tpu.memory_space<vmem>>, vector<1x128xf32>
    %cst_152 = arith.constant dense<0.000000e+00> : vector<1x128xf32>
    %496 = tpu.matmul %491, %419, %cst_152 {dimension_numbers = #tpu.dot_dimension_numbers<[1], [0], [0], [1], [0, 0, 1, 1], [], []>} : vector<1x32xf32>, vector<32x128xf32>, vector<1x128xf32> -> vector<1x128xf32>
    %497 = arith.addf %495, %496 : vector<1x128xf32>
    %498 = arith.negf %497 : vector<1x128xf32>
    %499 = math.exp %498 : vector<1x128xf32>
    %cst_153 = arith.constant 1.000000e+00 : f32
    %500 = vector.broadcast %cst_153 : f32 to vector<1x128xf32>
    %501 = arith.addf %500, %499 : vector<1x128xf32>
    %502 = arith.divf %500, %501 : vector<1x128xf32>
    %503 = vector.extract_strided_slice %502 {offsets = [0, 0], sizes = [1, 32], strides = [1, 1]} : vector<1x128xf32> to vector<1x32xf32>
    %504 = vector.extract_strided_slice %502 {offsets = [0, 32], sizes = [1, 32], strides = [1, 1]} : vector<1x128xf32> to vector<1x32xf32>
    %505 = vector.extract_strided_slice %502 {offsets = [0, 64], sizes = [1, 32], strides = [1, 1]} : vector<1x128xf32> to vector<1x32xf32>
    %cst_154 = arith.constant 2.000000e+00 : f32
    %506 = vector.broadcast %cst_154 : f32 to vector<1x32xf32>
    %507 = arith.mulf %506, %505 : vector<1x32xf32>
    %cst_155 = arith.constant 1.000000e+00 : f32
    %508 = vector.broadcast %cst_155 : f32 to vector<1x32xf32>
    %509 = arith.subf %507, %508 : vector<1x32xf32>
    %510 = vector.extract_strided_slice %502 {offsets = [0, 96], sizes = [1, 32], strides = [1, 1]} : vector<1x128xf32> to vector<1x32xf32>
    %511 = arith.mulf %504, %489 : vector<1x32xf32>
    %512 = arith.mulf %503, %509 : vector<1x32xf32>
    %513 = arith.addf %511, %512 : vector<1x32xf32>
    %514 = math.tanh %513 : vector<1x32xf32>
    %515 = arith.mulf %510, %514 : vector<1x32xf32>
    %516 = arith.index_cast %c3_i32_150 : i32 to index
    %c0_156 = arith.constant 0 : index
    %517 = vector.load %arg22[%516, %c0_156] : memref<16x32xf32, #tpu.memory_space<vmem>>, vector<1x32xf32>
    tpu.vector_store %arg22[%516, %c0_156], %515 {strides = array<i32>} : memref<16x32xf32, #tpu.memory_space<vmem>>, vector<1x32xf32>,
    %c4_i32_157 = arith.constant 4 : i32
    %518 = arith.index_cast %c4_i32_157 : i32 to index
    %c0_158 = arith.constant 0 : index
    %519 = vector.load %arg21[%518, %c0_158] : memref<16x128xf32, #tpu.memory_space<vmem>>, vector<1x128xf32>
    %cst_159 = arith.constant dense<0.000000e+00> : vector<1x128xf32>
    %520 = tpu.matmul %515, %419, %cst_159 {dimension_numbers = #tpu.dot_dimension_numbers<[1], [0], [0], [1], [0, 0, 1, 1], [], []>} : vector<1x32xf32>, vector<32x128xf32>, vector<1x128xf32> -> vector<1x128xf32>
    %521 = arith.addf %519, %520 : vector<1x128xf32>
    %522 = arith.negf %521 : vector<1x128xf32>
    %523 = math.exp %522 : vector<1x128xf32>
    %cst_160 = arith.constant 1.000000e+00 : f32
    %524 = vector.broadcast %cst_160 : f32 to vector<1x128xf32>
    %525 = arith.addf %524, %523 : vector<1x128xf32>
    %526 = arith.divf %524, %525 : vector<1x128xf32>
    %527 = vector.extract_strided_slice %526 {offsets = [0, 0], sizes = [1, 32], strides = [1, 1]} : vector<1x128xf32> to vector<1x32xf32>
    %528 = vector.extract_strided_slice %526 {offsets = [0, 32], sizes = [1, 32], strides = [1, 1]} : vector<1x128xf32> to vector<1x32xf32>
    %529 = vector.extract_strided_slice %526 {offsets = [0, 64], sizes = [1, 32], strides = [1, 1]} : vector<1x128xf32> to vector<1x32xf32>
    %cst_161 = arith.constant 2.000000e+00 : f32
    %530 = vector.broadcast %cst_161 : f32 to vector<1x32xf32>
    %531 = arith.mulf %530, %529 : vector<1x32xf32>
    %cst_162 = arith.constant 1.000000e+00 : f32
    %532 = vector.broadcast %cst_162 : f32 to vector<1x32xf32>
    %533 = arith.subf %531, %532 : vector<1x32xf32>
    %534 = vector.extract_strided_slice %526 {offsets = [0, 96], sizes = [1, 32], strides = [1, 1]} : vector<1x128xf32> to vector<1x32xf32>
    %535 = arith.mulf %528, %513 : vector<1x32xf32>
    %536 = arith.mulf %527, %533 : vector<1x32xf32>
    %537 = arith.addf %535, %536 : vector<1x32xf32>
    %538 = math.tanh %537 : vector<1x32xf32>
    %539 = arith.mulf %534, %538 : vector<1x32xf32>
    %540 = arith.index_cast %c4_i32_157 : i32 to index
    %c0_163 = arith.constant 0 : index
    %541 = vector.load %arg22[%540, %c0_163] : memref<16x32xf32, #tpu.memory_space<vmem>>, vector<1x32xf32>
    tpu.vector_store %arg22[%540, %c0_163], %539 {strides = array<i32>} : memref<16x32xf32, #tpu.memory_space<vmem>>, vector<1x32xf32>,
    %c5_i32_164 = arith.constant 5 : i32
    %542 = arith.index_cast %c5_i32_164 : i32 to index
    %c0_165 = arith.constant 0 : index
    %543 = vector.load %arg21[%542, %c0_165] : memref<16x128xf32, #tpu.memory_space<vmem>>, vector<1x128xf32>
    %cst_166 = arith.constant dense<0.000000e+00> : vector<1x128xf32>
    %544 = tpu.matmul %539, %419, %cst_166 {dimension_numbers = #tpu.dot_dimension_numbers<[1], [0], [0], [1], [0, 0, 1, 1], [], []>} : vector<1x32xf32>, vector<32x128xf32>, vector<1x128xf32> -> vector<1x128xf32>
    %545 = arith.addf %543, %544 : vector<1x128xf32>
    %546 = arith.negf %545 : vector<1x128xf32>
    %547 = math.exp %546 : vector<1x128xf32>
    %cst_167 = arith.constant 1.000000e+00 : f32
    %548 = vector.broadcast %cst_167 : f32 to vector<1x128xf32>
    %549 = arith.addf %548, %547 : vector<1x128xf32>
    %550 = arith.divf %548, %549 : vector<1x128xf32>
    %551 = vector.extract_strided_slice %550 {offsets = [0, 0], sizes = [1, 32], strides = [1, 1]} : vector<1x128xf32> to vector<1x32xf32>
    %552 = vector.extract_strided_slice %550 {offsets = [0, 32], sizes = [1, 32], strides = [1, 1]} : vector<1x128xf32> to vector<1x32xf32>
    %553 = vector.extract_strided_slice %550 {offsets = [0, 64], sizes = [1, 32], strides = [1, 1]} : vector<1x128xf32> to vector<1x32xf32>
    %cst_168 = arith.constant 2.000000e+00 : f32
    %554 = vector.broadcast %cst_168 : f32 to vector<1x32xf32>
    %555 = arith.mulf %554, %553 : vector<1x32xf32>
    %cst_169 = arith.constant 1.000000e+00 : f32
    %556 = vector.broadcast %cst_169 : f32 to vector<1x32xf32>
    %557 = arith.subf %555, %556 : vector<1x32xf32>
    %558 = vector.extract_strided_slice %550 {offsets = [0, 96], sizes = [1, 32], strides = [1, 1]} : vector<1x128xf32> to vector<1x32xf32>
    %559 = arith.mulf %552, %537 : vector<1x32xf32>
    %560 = arith.mulf %551, %557 : vector<1x32xf32>
    %561 = arith.addf %559, %560 : vector<1x32xf32>
    %562 = math.tanh %561 : vector<1x32xf32>
    %563 = arith.mulf %558, %562 : vector<1x32xf32>
    %564 = arith.index_cast %c5_i32_164 : i32 to index
    %c0_170 = arith.constant 0 : index
    %565 = vector.load %arg22[%564, %c0_170] : memref<16x32xf32, #tpu.memory_space<vmem>>, vector<1x32xf32>
    tpu.vector_store %arg22[%564, %c0_170], %563 {strides = array<i32>} : memref<16x32xf32, #tpu.memory_space<vmem>>, vector<1x32xf32>,
    %c6_i32_171 = arith.constant 6 : i32
    %566 = arith.index_cast %c6_i32_171 : i32 to index
    %c0_172 = arith.constant 0 : index
    %567 = vector.load %arg21[%566, %c0_172] : memref<16x128xf32, #tpu.memory_space<vmem>>, vector<1x128xf32>
    %cst_173 = arith.constant dense<0.000000e+00> : vector<1x128xf32>
    %568 = tpu.matmul %563, %419, %cst_173 {dimension_numbers = #tpu.dot_dimension_numbers<[1], [0], [0], [1], [0, 0, 1, 1], [], []>} : vector<1x32xf32>, vector<32x128xf32>, vector<1x128xf32> -> vector<1x128xf32>
    %569 = arith.addf %567, %568 : vector<1x128xf32>
    %570 = arith.negf %569 : vector<1x128xf32>
    %571 = math.exp %570 : vector<1x128xf32>
    %cst_174 = arith.constant 1.000000e+00 : f32
    %572 = vector.broadcast %cst_174 : f32 to vector<1x128xf32>
    %573 = arith.addf %572, %571 : vector<1x128xf32>
    %574 = arith.divf %572, %573 : vector<1x128xf32>
    %575 = vector.extract_strided_slice %574 {offsets = [0, 0], sizes = [1, 32], strides = [1, 1]} : vector<1x128xf32> to vector<1x32xf32>
    %576 = vector.extract_strided_slice %574 {offsets = [0, 32], sizes = [1, 32], strides = [1, 1]} : vector<1x128xf32> to vector<1x32xf32>
    %577 = vector.extract_strided_slice %574 {offsets = [0, 64], sizes = [1, 32], strides = [1, 1]} : vector<1x128xf32> to vector<1x32xf32>
    %cst_175 = arith.constant 2.000000e+00 : f32
    %578 = vector.broadcast %cst_175 : f32 to vector<1x32xf32>
    %579 = arith.mulf %578, %577 : vector<1x32xf32>
    %cst_176 = arith.constant 1.000000e+00 : f32
    %580 = vector.broadcast %cst_176 : f32 to vector<1x32xf32>
    %581 = arith.subf %579, %580 : vector<1x32xf32>
    %582 = vector.extract_strided_slice %574 {offsets = [0, 96], sizes = [1, 32], strides = [1, 1]} : vector<1x128xf32> to vector<1x32xf32>
    %583 = arith.mulf %576, %561 : vector<1x32xf32>
    %584 = arith.mulf %575, %581 : vector<1x32xf32>
    %585 = arith.addf %583, %584 : vector<1x32xf32>
    %586 = math.tanh %585 : vector<1x32xf32>
    %587 = arith.mulf %582, %586 : vector<1x32xf32>
    %588 = arith.index_cast %c6_i32_171 : i32 to index
    %c0_177 = arith.constant 0 : index
    %589 = vector.load %arg22[%588, %c0_177] : memref<16x32xf32, #tpu.memory_space<vmem>>, vector<1x32xf32>
    tpu.vector_store %arg22[%588, %c0_177], %587 {strides = array<i32>} : memref<16x32xf32, #tpu.memory_space<vmem>>, vector<1x32xf32>,
    %c7_i32_178 = arith.constant 7 : i32
    %590 = arith.index_cast %c7_i32_178 : i32 to index
    %c0_179 = arith.constant 0 : index
    %591 = vector.load %arg21[%590, %c0_179] : memref<16x128xf32, #tpu.memory_space<vmem>>, vector<1x128xf32>
    %cst_180 = arith.constant dense<0.000000e+00> : vector<1x128xf32>
    %592 = tpu.matmul %587, %419, %cst_180 {dimension_numbers = #tpu.dot_dimension_numbers<[1], [0], [0], [1], [0, 0, 1, 1], [], []>} : vector<1x32xf32>, vector<32x128xf32>, vector<1x128xf32> -> vector<1x128xf32>
    %593 = arith.addf %591, %592 : vector<1x128xf32>
    %594 = arith.negf %593 : vector<1x128xf32>
    %595 = math.exp %594 : vector<1x128xf32>
    %cst_181 = arith.constant 1.000000e+00 : f32
    %596 = vector.broadcast %cst_181 : f32 to vector<1x128xf32>
    %597 = arith.addf %596, %595 : vector<1x128xf32>
    %598 = arith.divf %596, %597 : vector<1x128xf32>
    %599 = vector.extract_strided_slice %598 {offsets = [0, 0], sizes = [1, 32], strides = [1, 1]} : vector<1x128xf32> to vector<1x32xf32>
    %600 = vector.extract_strided_slice %598 {offsets = [0, 32], sizes = [1, 32], strides = [1, 1]} : vector<1x128xf32> to vector<1x32xf32>
    %601 = vector.extract_strided_slice %598 {offsets = [0, 64], sizes = [1, 32], strides = [1, 1]} : vector<1x128xf32> to vector<1x32xf32>
    %cst_182 = arith.constant 2.000000e+00 : f32
    %602 = vector.broadcast %cst_182 : f32 to vector<1x32xf32>
    %603 = arith.mulf %602, %601 : vector<1x32xf32>
    %cst_183 = arith.constant 1.000000e+00 : f32
    %604 = vector.broadcast %cst_183 : f32 to vector<1x32xf32>
    %605 = arith.subf %603, %604 : vector<1x32xf32>
    %606 = vector.extract_strided_slice %598 {offsets = [0, 96], sizes = [1, 32], strides = [1, 1]} : vector<1x128xf32> to vector<1x32xf32>
    %607 = arith.mulf %600, %585 : vector<1x32xf32>
    %608 = arith.mulf %599, %605 : vector<1x32xf32>
    %609 = arith.addf %607, %608 : vector<1x32xf32>
    %610 = math.tanh %609 : vector<1x32xf32>
    %611 = arith.mulf %606, %610 : vector<1x32xf32>
    %612 = arith.index_cast %c7_i32_178 : i32 to index
    %c0_184 = arith.constant 0 : index
    %613 = vector.load %arg22[%612, %c0_184] : memref<16x32xf32, #tpu.memory_space<vmem>>, vector<1x32xf32>
    tpu.vector_store %arg22[%612, %c0_184], %611 {strides = array<i32>} : memref<16x32xf32, #tpu.memory_space<vmem>>, vector<1x32xf32>,
    %c8_i32_185 = arith.constant 8 : i32
    %614 = arith.index_cast %c8_i32_185 : i32 to index
    %c0_186 = arith.constant 0 : index
    %615 = vector.load %arg21[%614, %c0_186] : memref<16x128xf32, #tpu.memory_space<vmem>>, vector<1x128xf32>
    %cst_187 = arith.constant dense<0.000000e+00> : vector<1x128xf32>
    %616 = tpu.matmul %611, %419, %cst_187 {dimension_numbers = #tpu.dot_dimension_numbers<[1], [0], [0], [1], [0, 0, 1, 1], [], []>} : vector<1x32xf32>, vector<32x128xf32>, vector<1x128xf32> -> vector<1x128xf32>
    %617 = arith.addf %615, %616 : vector<1x128xf32>
    %618 = arith.negf %617 : vector<1x128xf32>
    %619 = math.exp %618 : vector<1x128xf32>
    %cst_188 = arith.constant 1.000000e+00 : f32
    %620 = vector.broadcast %cst_188 : f32 to vector<1x128xf32>
    %621 = arith.addf %620, %619 : vector<1x128xf32>
    %622 = arith.divf %620, %621 : vector<1x128xf32>
    %623 = vector.extract_strided_slice %622 {offsets = [0, 0], sizes = [1, 32], strides = [1, 1]} : vector<1x128xf32> to vector<1x32xf32>
    %624 = vector.extract_strided_slice %622 {offsets = [0, 32], sizes = [1, 32], strides = [1, 1]} : vector<1x128xf32> to vector<1x32xf32>
    %625 = vector.extract_strided_slice %622 {offsets = [0, 64], sizes = [1, 32], strides = [1, 1]} : vector<1x128xf32> to vector<1x32xf32>
    %cst_189 = arith.constant 2.000000e+00 : f32
    %626 = vector.broadcast %cst_189 : f32 to vector<1x32xf32>
    %627 = arith.mulf %626, %625 : vector<1x32xf32>
    %cst_190 = arith.constant 1.000000e+00 : f32
    %628 = vector.broadcast %cst_190 : f32 to vector<1x32xf32>
    %629 = arith.subf %627, %628 : vector<1x32xf32>
    %630 = vector.extract_strided_slice %622 {offsets = [0, 96], sizes = [1, 32], strides = [1, 1]} : vector<1x128xf32> to vector<1x32xf32>
    %631 = arith.mulf %624, %609 : vector<1x32xf32>
    %632 = arith.mulf %623, %629 : vector<1x32xf32>
    %633 = arith.addf %631, %632 : vector<1x32xf32>
    %634 = math.tanh %633 : vector<1x32xf32>
    %635 = arith.mulf %630, %634 : vector<1x32xf32>
    %636 = arith.index_cast %c8_i32_185 : i32 to index
    %c0_191 = arith.constant 0 : index
    %637 = vector.load %arg22[%636, %c0_191] : memref<16x32xf32, #tpu.memory_space<vmem>>, vector<1x32xf32>
    tpu.vector_store %arg22[%636, %c0_191], %635 {strides = array<i32>} : memref<16x32xf32, #tpu.memory_space<vmem>>, vector<1x32xf32>,
    %c9_i32_192 = arith.constant 9 : i32
    %638 = arith.index_cast %c9_i32_192 : i32 to index
    %c0_193 = arith.constant 0 : index
    %639 = vector.load %arg21[%638, %c0_193] : memref<16x128xf32, #tpu.memory_space<vmem>>, vector<1x128xf32>
    %cst_194 = arith.constant dense<0.000000e+00> : vector<1x128xf32>
    %640 = tpu.matmul %635, %419, %cst_194 {dimension_numbers = #tpu.dot_dimension_numbers<[1], [0], [0], [1], [0, 0, 1, 1], [], []>} : vector<1x32xf32>, vector<32x128xf32>, vector<1x128xf32> -> vector<1x128xf32>
    %641 = arith.addf %639, %640 : vector<1x128xf32>
    %642 = arith.negf %641 : vector<1x128xf32>
    %643 = math.exp %642 : vector<1x128xf32>
    %cst_195 = arith.constant 1.000000e+00 : f32
    %644 = vector.broadcast %cst_195 : f32 to vector<1x128xf32>
    %645 = arith.addf %644, %643 : vector<1x128xf32>
    %646 = arith.divf %644, %645 : vector<1x128xf32>
    %647 = vector.extract_strided_slice %646 {offsets = [0, 0], sizes = [1, 32], strides = [1, 1]} : vector<1x128xf32> to vector<1x32xf32>
    %648 = vector.extract_strided_slice %646 {offsets = [0, 32], sizes = [1, 32], strides = [1, 1]} : vector<1x128xf32> to vector<1x32xf32>
    %649 = vector.extract_strided_slice %646 {offsets = [0, 64], sizes = [1, 32], strides = [1, 1]} : vector<1x128xf32> to vector<1x32xf32>
    %cst_196 = arith.constant 2.000000e+00 : f32
    %650 = vector.broadcast %cst_196 : f32 to vector<1x32xf32>
    %651 = arith.mulf %650, %649 : vector<1x32xf32>
    %cst_197 = arith.constant 1.000000e+00 : f32
    %652 = vector.broadcast %cst_197 : f32 to vector<1x32xf32>
    %653 = arith.subf %651, %652 : vector<1x32xf32>
    %654 = vector.extract_strided_slice %646 {offsets = [0, 96], sizes = [1, 32], strides = [1, 1]} : vector<1x128xf32> to vector<1x32xf32>
    %655 = arith.mulf %648, %633 : vector<1x32xf32>
    %656 = arith.mulf %647, %653 : vector<1x32xf32>
    %657 = arith.addf %655, %656 : vector<1x32xf32>
    %658 = math.tanh %657 : vector<1x32xf32>
    %659 = arith.mulf %654, %658 : vector<1x32xf32>
    %660 = arith.index_cast %c9_i32_192 : i32 to index
    %c0_198 = arith.constant 0 : index
    %661 = vector.load %arg22[%660, %c0_198] : memref<16x32xf32, #tpu.memory_space<vmem>>, vector<1x32xf32>
    tpu.vector_store %arg22[%660, %c0_198], %659 {strides = array<i32>} : memref<16x32xf32, #tpu.memory_space<vmem>>, vector<1x32xf32>,
    %c10_i32_199 = arith.constant 10 : i32
    %662 = arith.index_cast %c10_i32_199 : i32 to index
    %c0_200 = arith.constant 0 : index
    %663 = vector.load %arg21[%662, %c0_200] : memref<16x128xf32, #tpu.memory_space<vmem>>, vector<1x128xf32>
    %cst_201 = arith.constant dense<0.000000e+00> : vector<1x128xf32>
    %664 = tpu.matmul %659, %419, %cst_201 {dimension_numbers = #tpu.dot_dimension_numbers<[1], [0], [0], [1], [0, 0, 1, 1], [], []>} : vector<1x32xf32>, vector<32x128xf32>, vector<1x128xf32> -> vector<1x128xf32>
    %665 = arith.addf %663, %664 : vector<1x128xf32>
    %666 = arith.negf %665 : vector<1x128xf32>
    %667 = math.exp %666 : vector<1x128xf32>
    %cst_202 = arith.constant 1.000000e+00 : f32
    %668 = vector.broadcast %cst_202 : f32 to vector<1x128xf32>
    %669 = arith.addf %668, %667 : vector<1x128xf32>
    %670 = arith.divf %668, %669 : vector<1x128xf32>
    %671 = vector.extract_strided_slice %670 {offsets = [0, 0], sizes = [1, 32], strides = [1, 1]} : vector<1x128xf32> to vector<1x32xf32>
    %672 = vector.extract_strided_slice %670 {offsets = [0, 32], sizes = [1, 32], strides = [1, 1]} : vector<1x128xf32> to vector<1x32xf32>
    %673 = vector.extract_strided_slice %670 {offsets = [0, 64], sizes = [1, 32], strides = [1, 1]} : vector<1x128xf32> to vector<1x32xf32>
    %cst_203 = arith.constant 2.000000e+00 : f32
    %674 = vector.broadcast %cst_203 : f32 to vector<1x32xf32>
    %675 = arith.mulf %674, %673 : vector<1x32xf32>
    %cst_204 = arith.constant 1.000000e+00 : f32
    %676 = vector.broadcast %cst_204 : f32 to vector<1x32xf32>
    %677 = arith.subf %675, %676 : vector<1x32xf32>
    %678 = vector.extract_strided_slice %670 {offsets = [0, 96], sizes = [1, 32], strides = [1, 1]} : vector<1x128xf32> to vector<1x32xf32>
    %679 = arith.mulf %672, %657 : vector<1x32xf32>
    %680 = arith.mulf %671, %677 : vector<1x32xf32>
    %681 = arith.addf %679, %680 : vector<1x32xf32>
    %682 = math.tanh %681 : vector<1x32xf32>
    %683 = arith.mulf %678, %682 : vector<1x32xf32>
    %684 = arith.index_cast %c10_i32_199 : i32 to index
    %c0_205 = arith.constant 0 : index
    %685 = vector.load %arg22[%684, %c0_205] : memref<16x32xf32, #tpu.memory_space<vmem>>, vector<1x32xf32>
    tpu.vector_store %arg22[%684, %c0_205], %683 {strides = array<i32>} : memref<16x32xf32, #tpu.memory_space<vmem>>, vector<1x32xf32>,
    %c11_i32_206 = arith.constant 11 : i32
    %686 = arith.index_cast %c11_i32_206 : i32 to index
    %c0_207 = arith.constant 0 : index
    %687 = vector.load %arg21[%686, %c0_207] : memref<16x128xf32, #tpu.memory_space<vmem>>, vector<1x128xf32>
    %cst_208 = arith.constant dense<0.000000e+00> : vector<1x128xf32>
    %688 = tpu.matmul %683, %419, %cst_208 {dimension_numbers = #tpu.dot_dimension_numbers<[1], [0], [0], [1], [0, 0, 1, 1], [], []>} : vector<1x32xf32>, vector<32x128xf32>, vector<1x128xf32> -> vector<1x128xf32>
    %689 = arith.addf %687, %688 : vector<1x128xf32>
    %690 = arith.negf %689 : vector<1x128xf32>
    %691 = math.exp %690 : vector<1x128xf32>
    %cst_209 = arith.constant 1.000000e+00 : f32
    %692 = vector.broadcast %cst_209 : f32 to vector<1x128xf32>
    %693 = arith.addf %692, %691 : vector<1x128xf32>
    %694 = arith.divf %692, %693 : vector<1x128xf32>
    %695 = vector.extract_strided_slice %694 {offsets = [0, 0], sizes = [1, 32], strides = [1, 1]} : vector<1x128xf32> to vector<1x32xf32>
    %696 = vector.extract_strided_slice %694 {offsets = [0, 32], sizes = [1, 32], strides = [1, 1]} : vector<1x128xf32> to vector<1x32xf32>
    %697 = vector.extract_strided_slice %694 {offsets = [0, 64], sizes = [1, 32], strides = [1, 1]} : vector<1x128xf32> to vector<1x32xf32>
    %cst_210 = arith.constant 2.000000e+00 : f32
    %698 = vector.broadcast %cst_210 : f32 to vector<1x32xf32>
    %699 = arith.mulf %698, %697 : vector<1x32xf32>
    %cst_211 = arith.constant 1.000000e+00 : f32
    %700 = vector.broadcast %cst_211 : f32 to vector<1x32xf32>
    %701 = arith.subf %699, %700 : vector<1x32xf32>
    %702 = vector.extract_strided_slice %694 {offsets = [0, 96], sizes = [1, 32], strides = [1, 1]} : vector<1x128xf32> to vector<1x32xf32>
    %703 = arith.mulf %696, %681 : vector<1x32xf32>
    %704 = arith.mulf %695, %701 : vector<1x32xf32>
    %705 = arith.addf %703, %704 : vector<1x32xf32>
    %706 = math.tanh %705 : vector<1x32xf32>
    %707 = arith.mulf %702, %706 : vector<1x32xf32>
    %708 = arith.index_cast %c11_i32_206 : i32 to index
    %c0_212 = arith.constant 0 : index
    %709 = vector.load %arg22[%708, %c0_212] : memref<16x32xf32, #tpu.memory_space<vmem>>, vector<1x32xf32>
    tpu.vector_store %arg22[%708, %c0_212], %707 {strides = array<i32>} : memref<16x32xf32, #tpu.memory_space<vmem>>, vector<1x32xf32>,
    %c12_i32_213 = arith.constant 12 : i32
    %710 = arith.index_cast %c12_i32_213 : i32 to index
    %c0_214 = arith.constant 0 : index
    %711 = vector.load %arg21[%710, %c0_214] : memref<16x128xf32, #tpu.memory_space<vmem>>, vector<1x128xf32>
    %cst_215 = arith.constant dense<0.000000e+00> : vector<1x128xf32>
    %712 = tpu.matmul %707, %419, %cst_215 {dimension_numbers = #tpu.dot_dimension_numbers<[1], [0], [0], [1], [0, 0, 1, 1], [], []>} : vector<1x32xf32>, vector<32x128xf32>, vector<1x128xf32> -> vector<1x128xf32>
    %713 = arith.addf %711, %712 : vector<1x128xf32>
    %714 = arith.negf %713 : vector<1x128xf32>
    %715 = math.exp %714 : vector<1x128xf32>
    %cst_216 = arith.constant 1.000000e+00 : f32
    %716 = vector.broadcast %cst_216 : f32 to vector<1x128xf32>
    %717 = arith.addf %716, %715 : vector<1x128xf32>
    %718 = arith.divf %716, %717 : vector<1x128xf32>
    %719 = vector.extract_strided_slice %718 {offsets = [0, 0], sizes = [1, 32], strides = [1, 1]} : vector<1x128xf32> to vector<1x32xf32>
    %720 = vector.extract_strided_slice %718 {offsets = [0, 32], sizes = [1, 32], strides = [1, 1]} : vector<1x128xf32> to vector<1x32xf32>
    %721 = vector.extract_strided_slice %718 {offsets = [0, 64], sizes = [1, 32], strides = [1, 1]} : vector<1x128xf32> to vector<1x32xf32>
    %cst_217 = arith.constant 2.000000e+00 : f32
    %722 = vector.broadcast %cst_217 : f32 to vector<1x32xf32>
    %723 = arith.mulf %722, %721 : vector<1x32xf32>
    %cst_218 = arith.constant 1.000000e+00 : f32
    %724 = vector.broadcast %cst_218 : f32 to vector<1x32xf32>
    %725 = arith.subf %723, %724 : vector<1x32xf32>
    %726 = vector.extract_strided_slice %718 {offsets = [0, 96], sizes = [1, 32], strides = [1, 1]} : vector<1x128xf32> to vector<1x32xf32>
    %727 = arith.mulf %720, %705 : vector<1x32xf32>
    %728 = arith.mulf %719, %725 : vector<1x32xf32>
    %729 = arith.addf %727, %728 : vector<1x32xf32>
    %730 = math.tanh %729 : vector<1x32xf32>
    %731 = arith.mulf %726, %730 : vector<1x32xf32>
    %732 = arith.index_cast %c12_i32_213 : i32 to index
    %c0_219 = arith.constant 0 : index
    %733 = vector.load %arg22[%732, %c0_219] : memref<16x32xf32, #tpu.memory_space<vmem>>, vector<1x32xf32>
    tpu.vector_store %arg22[%732, %c0_219], %731 {strides = array<i32>} : memref<16x32xf32, #tpu.memory_space<vmem>>, vector<1x32xf32>,
    %c13_i32_220 = arith.constant 13 : i32
    %734 = arith.index_cast %c13_i32_220 : i32 to index
    %c0_221 = arith.constant 0 : index
    %735 = vector.load %arg21[%734, %c0_221] : memref<16x128xf32, #tpu.memory_space<vmem>>, vector<1x128xf32>
    %cst_222 = arith.constant dense<0.000000e+00> : vector<1x128xf32>
    %736 = tpu.matmul %731, %419, %cst_222 {dimension_numbers = #tpu.dot_dimension_numbers<[1], [0], [0], [1], [0, 0, 1, 1], [], []>} : vector<1x32xf32>, vector<32x128xf32>, vector<1x128xf32> -> vector<1x128xf32>
    %737 = arith.addf %735, %736 : vector<1x128xf32>
    %738 = arith.negf %737 : vector<1x128xf32>
    %739 = math.exp %738 : vector<1x128xf32>
    %cst_223 = arith.constant 1.000000e+00 : f32
    %740 = vector.broadcast %cst_223 : f32 to vector<1x128xf32>
    %741 = arith.addf %740, %739 : vector<1x128xf32>
    %742 = arith.divf %740, %741 : vector<1x128xf32>
    %743 = vector.extract_strided_slice %742 {offsets = [0, 0], sizes = [1, 32], strides = [1, 1]} : vector<1x128xf32> to vector<1x32xf32>
    %744 = vector.extract_strided_slice %742 {offsets = [0, 32], sizes = [1, 32], strides = [1, 1]} : vector<1x128xf32> to vector<1x32xf32>
    %745 = vector.extract_strided_slice %742 {offsets = [0, 64], sizes = [1, 32], strides = [1, 1]} : vector<1x128xf32> to vector<1x32xf32>
    %cst_224 = arith.constant 2.000000e+00 : f32
    %746 = vector.broadcast %cst_224 : f32 to vector<1x32xf32>
    %747 = arith.mulf %746, %745 : vector<1x32xf32>
    %cst_225 = arith.constant 1.000000e+00 : f32
    %748 = vector.broadcast %cst_225 : f32 to vector<1x32xf32>
    %749 = arith.subf %747, %748 : vector<1x32xf32>
    %750 = vector.extract_strided_slice %742 {offsets = [0, 96], sizes = [1, 32], strides = [1, 1]} : vector<1x128xf32> to vector<1x32xf32>
    %751 = arith.mulf %744, %729 : vector<1x32xf32>
    %752 = arith.mulf %743, %749 : vector<1x32xf32>
    %753 = arith.addf %751, %752 : vector<1x32xf32>
    %754 = math.tanh %753 : vector<1x32xf32>
    %755 = arith.mulf %750, %754 : vector<1x32xf32>
    %756 = arith.index_cast %c13_i32_220 : i32 to index
    %c0_226 = arith.constant 0 : index
    %757 = vector.load %arg22[%756, %c0_226] : memref<16x32xf32, #tpu.memory_space<vmem>>, vector<1x32xf32>
    tpu.vector_store %arg22[%756, %c0_226], %755 {strides = array<i32>} : memref<16x32xf32, #tpu.memory_space<vmem>>, vector<1x32xf32>,
    %c14_i32_227 = arith.constant 14 : i32
    %758 = arith.index_cast %c14_i32_227 : i32 to index
    %c0_228 = arith.constant 0 : index
    %759 = vector.load %arg21[%758, %c0_228] : memref<16x128xf32, #tpu.memory_space<vmem>>, vector<1x128xf32>
    %cst_229 = arith.constant dense<0.000000e+00> : vector<1x128xf32>
    %760 = tpu.matmul %755, %419, %cst_229 {dimension_numbers = #tpu.dot_dimension_numbers<[1], [0], [0], [1], [0, 0, 1, 1], [], []>} : vector<1x32xf32>, vector<32x128xf32>, vector<1x128xf32> -> vector<1x128xf32>
    %761 = arith.addf %759, %760 : vector<1x128xf32>
    %762 = arith.negf %761 : vector<1x128xf32>
    %763 = math.exp %762 : vector<1x128xf32>
    %cst_230 = arith.constant 1.000000e+00 : f32
    %764 = vector.broadcast %cst_230 : f32 to vector<1x128xf32>
    %765 = arith.addf %764, %763 : vector<1x128xf32>
    %766 = arith.divf %764, %765 : vector<1x128xf32>
    %767 = vector.extract_strided_slice %766 {offsets = [0, 0], sizes = [1, 32], strides = [1, 1]} : vector<1x128xf32> to vector<1x32xf32>
    %768 = vector.extract_strided_slice %766 {offsets = [0, 32], sizes = [1, 32], strides = [1, 1]} : vector<1x128xf32> to vector<1x32xf32>
    %769 = vector.extract_strided_slice %766 {offsets = [0, 64], sizes = [1, 32], strides = [1, 1]} : vector<1x128xf32> to vector<1x32xf32>
    %cst_231 = arith.constant 2.000000e+00 : f32
    %770 = vector.broadcast %cst_231 : f32 to vector<1x32xf32>
    %771 = arith.mulf %770, %769 : vector<1x32xf32>
    %cst_232 = arith.constant 1.000000e+00 : f32
    %772 = vector.broadcast %cst_232 : f32 to vector<1x32xf32>
    %773 = arith.subf %771, %772 : vector<1x32xf32>
    %774 = vector.extract_strided_slice %766 {offsets = [0, 96], sizes = [1, 32], strides = [1, 1]} : vector<1x128xf32> to vector<1x32xf32>
    %775 = arith.mulf %768, %753 : vector<1x32xf32>
    %776 = arith.mulf %767, %773 : vector<1x32xf32>
    %777 = arith.addf %775, %776 : vector<1x32xf32>
    %778 = math.tanh %777 : vector<1x32xf32>
    %779 = arith.mulf %774, %778 : vector<1x32xf32>
    %780 = arith.index_cast %c14_i32_227 : i32 to index
    %c0_233 = arith.constant 0 : index
    %781 = vector.load %arg22[%780, %c0_233] : memref<16x32xf32, #tpu.memory_space<vmem>>, vector<1x32xf32>
    tpu.vector_store %arg22[%780, %c0_233], %779 {strides = array<i32>} : memref<16x32xf32, #tpu.memory_space<vmem>>, vector<1x32xf32>,
    %c15_i32_234 = arith.constant 15 : i32
    %782 = arith.index_cast %c15_i32_234 : i32 to index
    %c0_235 = arith.constant 0 : index
    %783 = vector.load %arg21[%782, %c0_235] : memref<16x128xf32, #tpu.memory_space<vmem>>, vector<1x128xf32>
    %cst_236 = arith.constant dense<0.000000e+00> : vector<1x128xf32>
    %784 = tpu.matmul %779, %419, %cst_236 {dimension_numbers = #tpu.dot_dimension_numbers<[1], [0], [0], [1], [0, 0, 1, 1], [], []>} : vector<1x32xf32>, vector<32x128xf32>, vector<1x128xf32> -> vector<1x128xf32>
    %785 = arith.addf %783, %784 : vector<1x128xf32>
    %786 = arith.negf %785 : vector<1x128xf32>
    %787 = math.exp %786 : vector<1x128xf32>
    %cst_237 = arith.constant 1.000000e+00 : f32
    %788 = vector.broadcast %cst_237 : f32 to vector<1x128xf32>
    %789 = arith.addf %788, %787 : vector<1x128xf32>
    %790 = arith.divf %788, %789 : vector<1x128xf32>
    %791 = vector.extract_strided_slice %790 {offsets = [0, 0], sizes = [1, 32], strides = [1, 1]} : vector<1x128xf32> to vector<1x32xf32>
    %792 = vector.extract_strided_slice %790 {offsets = [0, 32], sizes = [1, 32], strides = [1, 1]} : vector<1x128xf32> to vector<1x32xf32>
    %793 = vector.extract_strided_slice %790 {offsets = [0, 64], sizes = [1, 32], strides = [1, 1]} : vector<1x128xf32> to vector<1x32xf32>
    %cst_238 = arith.constant 2.000000e+00 : f32
    %794 = vector.broadcast %cst_238 : f32 to vector<1x32xf32>
    %795 = arith.mulf %794, %793 : vector<1x32xf32>
    %cst_239 = arith.constant 1.000000e+00 : f32
    %796 = vector.broadcast %cst_239 : f32 to vector<1x32xf32>
    %797 = arith.subf %795, %796 : vector<1x32xf32>
    %798 = vector.extract_strided_slice %790 {offsets = [0, 96], sizes = [1, 32], strides = [1, 1]} : vector<1x128xf32> to vector<1x32xf32>
    %799 = arith.mulf %792, %777 : vector<1x32xf32>
    %800 = arith.mulf %791, %797 : vector<1x32xf32>
    %801 = arith.addf %799, %800 : vector<1x32xf32>
    %802 = math.tanh %801 : vector<1x32xf32>
    %803 = arith.mulf %798, %802 : vector<1x32xf32>
    %804 = arith.index_cast %c15_i32_234 : i32 to index
    %c0_240 = arith.constant 0 : index
    %805 = vector.load %arg22[%804, %c0_240] : memref<16x32xf32, #tpu.memory_space<vmem>>, vector<1x32xf32>
    tpu.vector_store %arg22[%804, %c0_240], %803 {strides = array<i32>} : memref<16x32xf32, #tpu.memory_space<vmem>>, vector<1x32xf32>,
    %c16_i32_241 = arith.constant 16 : i32
    %c0_242 = arith.constant 0 : index
    %c0_243 = arith.constant 0 : index
    %806 = vector.load %arg22[%c0_242, %c0_243] : memref<16x32xf32, #tpu.memory_space<vmem>>, vector<16x32xf32>
    %cst_244 = arith.constant dense<0.000000e+00> : vector<16x32xf32>
    %807 = tpu.matmul %0, %806, %cst_244 {dimension_numbers = #tpu.dot_dimension_numbers<[1], [0], [0], [1], [0, 0, 1, 1], [], []>} : vector<16x16xf32>, vector<16x32xf32>, vector<16x32xf32> -> vector<16x32xf32>
    %808 = arith.subf %807, %806 : vector<16x32xf32>
    %809 = vector.broadcast %2 : vector<1x32xf32> to vector<16x32xf32>
    %810 = arith.mulf %808, %809 : vector<16x32xf32>
    %811 = arith.addf %806, %810 : vector<16x32xf32>
    %c0_245 = arith.constant 0 : index
    %c0_246 = arith.constant 0 : index
    %c0_247 = arith.constant 0 : index
    %812 = vector.load %arg10[%c0_245, %c0_246, %c0_247] : memref<3x14x16xf32, #tpu.memory_space<vmem>>, vector<1x14x16xf32>
    %813 = vector.shape_cast %812 : vector<1x14x16xf32> to vector<14x16xf32>
    %cst_248 = arith.constant dense<0.000000e+00> : vector<14x8xf32>
    %814 = tpu.matmul %813, %3, %cst_248 {dimension_numbers = #tpu.dot_dimension_numbers<[1], [0], [0], [1], [0, 0, 1, 1], [], []>} : vector<14x16xf32>, vector<16x8xf32>, vector<14x8xf32> -> vector<14x8xf32>
    %c0_249 = arith.constant 0 : index
    %c0_250 = arith.constant 0 : index
    %c0_251 = arith.constant 0 : index
    %815 = vector.load %arg11[%c0_249, %c0_250, %c0_251] : memref<3x8x32xf32, #tpu.memory_space<vmem>>, vector<1x8x32xf32>
    %816 = vector.shape_cast %815 : vector<1x8x32xf32> to vector<8x32xf32>
    %cst_252 = arith.constant dense<0.000000e+00> : vector<14x32xf32>
    %817 = tpu.matmul %814, %816, %cst_252 {dimension_numbers = #tpu.dot_dimension_numbers<[1], [0], [0], [1], [0, 0, 1, 1], [], []>} : vector<14x8xf32>, vector<8x32xf32>, vector<14x32xf32> -> vector<14x32xf32>
    %c1 = arith.constant 1 : index
    %c0_253 = arith.constant 0 : index
    %c0_254 = arith.constant 0 : index
    %818 = vector.load %arg10[%c1, %c0_253, %c0_254] : memref<3x14x16xf32, #tpu.memory_space<vmem>>, vector<1x14x16xf32>
    %819 = vector.shape_cast %818 : vector<1x14x16xf32> to vector<14x16xf32>
    %cst_255 = arith.constant dense<0.000000e+00> : vector<14x8xf32>
    %820 = tpu.matmul %819, %3, %cst_255 {dimension_numbers = #tpu.dot_dimension_numbers<[1], [0], [0], [1], [0, 0, 1, 1], [], []>} : vector<14x16xf32>, vector<16x8xf32>, vector<14x8xf32> -> vector<14x8xf32>
    %c1_256 = arith.constant 1 : index
    %c0_257 = arith.constant 0 : index
    %c0_258 = arith.constant 0 : index
    %821 = vector.load %arg11[%c1_256, %c0_257, %c0_258] : memref<3x8x32xf32, #tpu.memory_space<vmem>>, vector<1x8x32xf32>
    %822 = vector.shape_cast %821 : vector<1x8x32xf32> to vector<8x32xf32>
    %cst_259 = arith.constant dense<0.000000e+00> : vector<14x32xf32>
    %823 = tpu.matmul %820, %822, %cst_259 {dimension_numbers = #tpu.dot_dimension_numbers<[1], [0], [0], [1], [0, 0, 1, 1], [], []>} : vector<14x8xf32>, vector<8x32xf32>, vector<14x32xf32> -> vector<14x32xf32>
    %824 = arith.addf %817, %823 : vector<14x32xf32>
    %c2 = arith.constant 2 : index
    %c0_260 = arith.constant 0 : index
    %c0_261 = arith.constant 0 : index
    %825 = vector.load %arg10[%c2, %c0_260, %c0_261] : memref<3x14x16xf32, #tpu.memory_space<vmem>>, vector<1x14x16xf32>
    %826 = vector.shape_cast %825 : vector<1x14x16xf32> to vector<14x16xf32>
    %cst_262 = arith.constant dense<0.000000e+00> : vector<14x8xf32>
    %827 = tpu.matmul %826, %3, %cst_262 {dimension_numbers = #tpu.dot_dimension_numbers<[1], [0], [0], [1], [0, 0, 1, 1], [], []>} : vector<14x16xf32>, vector<16x8xf32>, vector<14x8xf32> -> vector<14x8xf32>
    %c2_263 = arith.constant 2 : index
    %c0_264 = arith.constant 0 : index
    %c0_265 = arith.constant 0 : index
    %828 = vector.load %arg11[%c2_263, %c0_264, %c0_265] : memref<3x8x32xf32, #tpu.memory_space<vmem>>, vector<1x8x32xf32>
    %829 = vector.shape_cast %828 : vector<1x8x32xf32> to vector<8x32xf32>
    %cst_266 = arith.constant dense<0.000000e+00> : vector<14x32xf32>
    %830 = tpu.matmul %827, %829, %cst_266 {dimension_numbers = #tpu.dot_dimension_numbers<[1], [0], [0], [1], [0, 0, 1, 1], [], []>} : vector<14x8xf32>, vector<8x32xf32>, vector<14x32xf32> -> vector<14x32xf32>
    %831 = arith.addf %824, %830 : vector<14x32xf32>
    %c0_267 = arith.constant 0 : index
    %c0_268 = arith.constant 0 : index
    %832 = vector.load %arg12[%c0_267, %c0_268] : memref<3x32xf32, #tpu.memory_space<vmem>>, vector<1x32xf32>
    %833 = vector.broadcast %832 : vector<1x32xf32> to vector<14x32xf32>
    %834 = arith.addf %831, %833 : vector<14x32xf32>
    %cst_269 = arith.constant 0.000000e+00 : f32
    %835 = vector.broadcast %cst_269 : f32 to vector<14x32xf32>
    %836 = arith.maximumf %834, %835 : vector<14x32xf32>
    %c1_270 = arith.constant 1 : index
    %c0_271 = arith.constant 0 : index
    %837 = vector.load %arg12[%c1_270, %c0_271] : memref<3x32xf32, #tpu.memory_space<vmem>>, vector<1x32xf32>
    %838 = vector.broadcast %837 : vector<1x32xf32> to vector<14x32xf32>
    %839 = arith.mulf %836, %838 : vector<14x32xf32>
    %c2_272 = arith.constant 2 : index
    %c0_273 = arith.constant 0 : index
    %840 = vector.load %arg12[%c2_272, %c0_273] : memref<3x32xf32, #tpu.memory_space<vmem>>, vector<1x32xf32>
    %841 = vector.broadcast %840 : vector<1x32xf32> to vector<14x32xf32>
    %842 = arith.addf %839, %841 : vector<14x32xf32>
    %c0_274 = arith.constant 0 : index
    %c0_275 = arith.constant 0 : index
    %c0_276 = arith.constant 0 : index
    %843 = vector.load %arg13[%c0_274, %c0_275, %c0_276] : memref<3x12x14xf32, #tpu.memory_space<vmem>>, vector<1x12x14xf32>
    %844 = vector.shape_cast %843 : vector<1x12x14xf32> to vector<12x14xf32>
    %cst_277 = arith.constant dense<0.000000e+00> : vector<12x32xf32>
    %845 = tpu.matmul %844, %842, %cst_277 {dimension_numbers = #tpu.dot_dimension_numbers<[1], [0], [0], [1], [0, 0, 1, 1], [], []>} : vector<12x14xf32>, vector<14x32xf32>, vector<12x32xf32> -> vector<12x32xf32>
    %c0_278 = arith.constant 0 : index
    %c0_279 = arith.constant 0 : index
    %c0_280 = arith.constant 0 : index
    %846 = vector.load %arg14[%c0_278, %c0_279, %c0_280] : memref<3x32x32xf32, #tpu.memory_space<vmem>>, vector<1x32x32xf32>
    %847 = vector.shape_cast %846 : vector<1x32x32xf32> to vector<32x32xf32>
    %cst_281 = arith.constant dense<0.000000e+00> : vector<12x32xf32>
    %848 = tpu.matmul %845, %847, %cst_281 {dimension_numbers = #tpu.dot_dimension_numbers<[1], [0], [0], [1], [0, 0, 1, 1], [], []>} : vector<12x32xf32>, vector<32x32xf32>, vector<12x32xf32> -> vector<12x32xf32>
    %c1_282 = arith.constant 1 : index
    %c0_283 = arith.constant 0 : index
    %c0_284 = arith.constant 0 : index
    %849 = vector.load %arg13[%c1_282, %c0_283, %c0_284] : memref<3x12x14xf32, #tpu.memory_space<vmem>>, vector<1x12x14xf32>
    %850 = vector.shape_cast %849 : vector<1x12x14xf32> to vector<12x14xf32>
    %cst_285 = arith.constant dense<0.000000e+00> : vector<12x32xf32>
    %851 = tpu.matmul %850, %842, %cst_285 {dimension_numbers = #tpu.dot_dimension_numbers<[1], [0], [0], [1], [0, 0, 1, 1], [], []>} : vector<12x14xf32>, vector<14x32xf32>, vector<12x32xf32> -> vector<12x32xf32>
    %c1_286 = arith.constant 1 : index
    %c0_287 = arith.constant 0 : index
    %c0_288 = arith.constant 0 : index
    %852 = vector.load %arg14[%c1_286, %c0_287, %c0_288] : memref<3x32x32xf32, #tpu.memory_space<vmem>>, vector<1x32x32xf32>
    %853 = vector.shape_cast %852 : vector<1x32x32xf32> to vector<32x32xf32>
    %cst_289 = arith.constant dense<0.000000e+00> : vector<12x32xf32>
    %854 = tpu.matmul %851, %853, %cst_289 {dimension_numbers = #tpu.dot_dimension_numbers<[1], [0], [0], [1], [0, 0, 1, 1], [], []>} : vector<12x32xf32>, vector<32x32xf32>, vector<12x32xf32> -> vector<12x32xf32>
    %855 = arith.addf %848, %854 : vector<12x32xf32>
    %c2_290 = arith.constant 2 : index
    %c0_291 = arith.constant 0 : index
    %c0_292 = arith.constant 0 : index
    %856 = vector.load %arg13[%c2_290, %c0_291, %c0_292] : memref<3x12x14xf32, #tpu.memory_space<vmem>>, vector<1x12x14xf32>
    %857 = vector.shape_cast %856 : vector<1x12x14xf32> to vector<12x14xf32>
    %cst_293 = arith.constant dense<0.000000e+00> : vector<12x32xf32>
    %858 = tpu.matmul %857, %842, %cst_293 {dimension_numbers = #tpu.dot_dimension_numbers<[1], [0], [0], [1], [0, 0, 1, 1], [], []>} : vector<12x14xf32>, vector<14x32xf32>, vector<12x32xf32> -> vector<12x32xf32>
    %c2_294 = arith.constant 2 : index
    %c0_295 = arith.constant 0 : index
    %c0_296 = arith.constant 0 : index
    %859 = vector.load %arg14[%c2_294, %c0_295, %c0_296] : memref<3x32x32xf32, #tpu.memory_space<vmem>>, vector<1x32x32xf32>
    %860 = vector.shape_cast %859 : vector<1x32x32xf32> to vector<32x32xf32>
    %cst_297 = arith.constant dense<0.000000e+00> : vector<12x32xf32>
    %861 = tpu.matmul %858, %860, %cst_297 {dimension_numbers = #tpu.dot_dimension_numbers<[1], [0], [0], [1], [0, 0, 1, 1], [], []>} : vector<12x32xf32>, vector<32x32xf32>, vector<12x32xf32> -> vector<12x32xf32>
    %862 = arith.addf %855, %861 : vector<12x32xf32>
    %c0_298 = arith.constant 0 : index
    %c0_299 = arith.constant 0 : index
    %863 = vector.load %arg15[%c0_298, %c0_299] : memref<3x32xf32, #tpu.memory_space<vmem>>, vector<1x32xf32>
    %864 = vector.broadcast %863 : vector<1x32xf32> to vector<12x32xf32>
    %865 = arith.addf %862, %864 : vector<12x32xf32>
    %cst_300 = arith.constant 0.000000e+00 : f32
    %866 = vector.broadcast %cst_300 : f32 to vector<12x32xf32>
    %867 = arith.maximumf %865, %866 : vector<12x32xf32>
    %c1_301 = arith.constant 1 : index
    %c0_302 = arith.constant 0 : index
    %868 = vector.load %arg15[%c1_301, %c0_302] : memref<3x32xf32, #tpu.memory_space<vmem>>, vector<1x32xf32>
    %869 = vector.broadcast %868 : vector<1x32xf32> to vector<12x32xf32>
    %870 = arith.mulf %867, %869 : vector<12x32xf32>
    %c2_303 = arith.constant 2 : index
    %c0_304 = arith.constant 0 : index
    %871 = vector.load %arg15[%c2_303, %c0_304] : memref<3x32xf32, #tpu.memory_space<vmem>>, vector<1x32xf32>
    %872 = vector.broadcast %871 : vector<1x32xf32> to vector<12x32xf32>
    %873 = arith.addf %870, %872 : vector<12x32xf32>
    %c0_305 = arith.constant 0 : index
    %c0_306 = arith.constant 0 : index
    %874 = vector.load %arg16[%c0_305, %c0_306] : memref<2x12xf32, #tpu.memory_space<vmem>>, vector<2x12xf32>
    %cst_307 = arith.constant dense<0.000000e+00> : vector<2x32xf32>
    %875 = tpu.matmul %874, %873, %cst_307 {dimension_numbers = #tpu.dot_dimension_numbers<[1], [0], [0], [1], [0, 0, 1, 1], [], []>} : vector<2x12xf32>, vector<12x32xf32>, vector<2x32xf32> -> vector<2x32xf32>
    %c0_308 = arith.constant 0 : index
    %c0_309 = arith.constant 0 : index
    %876 = vector.load %arg17[%c0_308, %c0_309] : memref<16x32xf32, #tpu.memory_space<vmem>>, vector<16x32xf32>
    %877 = arith.mulf %811, %876 : vector<16x32xf32>
    %cst_310 = arith.constant dense<0.000000e+00> : vector<16xf32>
    %878 = vector.multi_reduction <add>, %877, %cst_310 [1] : vector<16x32xf32> to vector<16xf32>
    %879 = vector.shape_cast %878 : vector<16xf32> to vector<16x1xf32>
    %cst_311 = arith.constant dense<0.000000e+00> : vector<1xf32>
    %880 = vector.multi_reduction <add>, %879, %cst_311 [0] : vector<16x1xf32> to vector<1xf32>
    %881 = vector.shape_cast %880 : vector<1xf32> to vector<1x1xf32>
    %c0_312 = arith.constant 0 : index
    %c0_313 = arith.constant 0 : index
    %882 = vector.load %arg18[%c0_312, %c0_313] : memref<2x32xf32, #tpu.memory_space<vmem>>, vector<2x32xf32>
    %883 = arith.mulf %875, %882 : vector<2x32xf32>
    %cst_314 = arith.constant dense<0.000000e+00> : vector<2xf32>
    %884 = vector.multi_reduction <add>, %883, %cst_314 [1] : vector<2x32xf32> to vector<2xf32>
    %885 = vector.shape_cast %884 : vector<2xf32> to vector<2x1xf32>
    %cst_315 = arith.constant dense<0.000000e+00> : vector<1xf32>
    %886 = vector.multi_reduction <add>, %885, %cst_315 [0] : vector<2x1xf32> to vector<1xf32>
    %887 = vector.shape_cast %886 : vector<1xf32> to vector<1x1xf32>
    %888 = arith.addf %881, %887 : vector<1x1xf32>
    %c0_316 = arith.constant 0 : index
    %c0_317 = arith.constant 0 : index
    %889 = vector.load %arg19[%c0_316, %c0_317] : memref<1x1xf32, #tpu.memory_space<vmem>>, vector<1x1xf32>
    %890 = arith.addf %888, %889 : vector<1x1xf32>
    %891 = arith.negf %890 : vector<1x1xf32>
    %892 = math.exp %891 : vector<1x1xf32>
    %cst_318 = arith.constant 1.000000e+00 : f32
    %893 = vector.broadcast %cst_318 : f32 to vector<1x1xf32>
    %894 = arith.addf %893, %892 : vector<1x1xf32>
    %895 = arith.divf %893, %894 : vector<1x1xf32>
    %c0_319 = arith.constant 0 : index
    %c0_320 = arith.constant 0 : index
    %896 = vector.load %arg20[%c0_319, %c0_320] : memref<1x1xf32, #tpu.memory_space<vmem>>, vector<1x1xf32>
    tpu.vector_store %arg20[%c0_319, %c0_320], %895 {strides = array<i32>} : memref<1x1xf32, #tpu.memory_space<vmem>>, vector<1x1xf32>,
    return
  }
}

</mosaic_0001>

<bundles_post_ra>
// kernel: base_model_forward.1
= control target key start
LH: loop header
LB: loop body
LE: loop exit
PB: predicated region body
PF: predicated region fallthrough
CT: control target
= control target key end

     0   :  { %s7948_s0 = inlined_call_operand.vmem [shape: f32[16,8], index: 0, kind: input, shape index: {}]   ;;  %s7949_s1 = inlined_call_operand.hbm [shape: f32[16,16], index: 1, kind: input, shape index: {}]   ;;  %s7950_s2 = inlined_call_operand.vmem [shape: f32[1,128], index: 2, kind: input, shape index: {}]   ;;  %s7951_s3 = inlined_call_operand.hbm [shape: f32[1,32], index: 3, kind: input, shape index: {}]   ;;  %s7952_s4 = inlined_call_operand.hbm [shape: f32[8,128], index: 4, kind: input, shape index: {}]   ;;  %s7953_s5 = inlined_call_operand.hbm [shape: f32[32,128], index: 5, kind: input, shape index: {}]   ;;  %s7954_s6 = inlined_call_operand.hbm [shape: f32[1,128], index: 6, kind: input, shape index: {}]   ;;  %s7955_s7 = inlined_call_operand.hbm [shape: f32[32,128], index: 7, kind: input, shape index: {}]   ;;  %s7956_s8 = inlined_call_operand.hbm [shape: f32[32,128], index: 8, kind: input, shape index: {}]   ;;  %s7957_s9 = inlined_call_operand.hbm [shape: f32[1,128], index: 9, kind: input, shape index: {}]   ;;  %s7958_s10 = inlined_call_operand.hbm [shape: f32[3,14,16], index: 10, kind: input, shape index: {}]   ;;  %s7959_s11 = inlined_call_operand.hbm [shape: f32[3,8,32], index: 11, kind: input, shape index: {}]   ;;  %s7960_s12 = inlined_call_operand.hbm [shape: f32[3,32], index: 12, kind: input, shape index: {}]   ;;  %s7961_s13 = inlined_call_operand.hbm [shape: f32[3,12,14], index: 13, kind: input, shape index: {}]   ;;  %s7962_s14 = inlined_call_operand.vmem [shape: f32[3,32,32], index: 14, kind: input, shape index: {}]   ;;  %s7963_s15 = inlined_call_operand.hbm [shape: f32[3,32], index: 15, kind: input, shape index: {}]   ;;  %s7964_s16 = inlined_call_operand.vmem [shape: f32[2,12], index: 16, kind: input, shape index: {}]   ;;  %s7965_s17 = inlined_call_operand.hbm [shape: f32[16,32], index: 17, kind: input, shape index: {}]   ;;  %s7966_s18 = inlined_call_operand.hbm [shape: f32[2,32], index: 18, kind: input, shape index: {}]   ;;  %s7967_s19 = inlined_call_operand.<no memory space> [shape: f32[1,1], index: 19, kind: input, shape index: {}]   ;;  %s7968_s20 = inlined_call_operand.hbm [shape: f32[1,1], index: 20, kind: output, shape index: {}]  }
   0x1   :  { %7974 = sst [smem:[#allocation39_spill]] %s7948_s0  ;;  %v25_v0 = vstv %s7967_s19 }
   0x2   :  { %7975 = sst [smem:[#allocation40_spill]] %s7949_s1  ;;  %26 = vst [vmem:[#allocation4] sm:$0x1] %v25_v0 }
   0x3   :  { %7976 = sst [smem:[#allocation41_spill]] %s7950_s2 }
   0x4   :  { %7977 = sst [smem:[#allocation42_spill]] %s7951_s3 }
   0x5   :  { %7978 = sst [smem:[#allocation43_spill]] %s7952_s4 }
   0x6   :  { %27 = vsyncpa [#allocation6], 0 }
   0x7   :  { %28 = vsyncpa [#allocation9], 0 }
   0x8   :  { %29 = vsyncpa [#allocation12], 0 }
   0x9   :  { %30 = vsyncpa [#allocation15], 0 }
   0xa   :  { %31 = vsyncpa [#allocation18], 0 }
   0xb   :  { %32 = vsyncpa [#allocation21], 0 }
   0xc   :  { %33 = vsyncpa [#allocation24], 0 }
   0xd   :  { %34 = vsyncpa [#allocation27], 0 }
   0xe   :  { %35 = vsyncpa [#allocation7], 0  ;;  %s7102_s23 = smov [#allocation8]   ;;  %s7979_s3 = sld [smem:[#allocation42_spill]] }
   0xf   :  { %s58_s24 = sshll.u32 %s7102_s23, 4  ;;  %s59_s24 = int_to_ptr.vmem [resolvable:$true] %s58_s24 }
  0x14   :  { %s6732_s26 = scalar_lea.hbm %s7979_s3, 16 }
  0x15   :  { %p6733_p0 = scmp.ne.s32.totalorder %s7979_s3, %s6732_s26  ;;  %p6736_p1 = scmp.lt.u32.totalorder %s6732_s26, %s7979_s3 }
  0x17   :  { %p6738_p2 = pnand %p6736_p1, %p6733_p0 }
  0x19   :  { %6741 = shalt.err (!%p6738_p2)
}
  0x1a   :  { %s6742_s29 = scalar_lea.vmem %s59_s24, 16  ;;  %s6746_s30 = scalar_lea.vmem %s59_s24, 32 }
  0x1b   :  { %p6743_p3 = scmp.ne.s32.totalorder %s59_s24, %s6742_s29  ;;  %p6747_p4 = scmp.lt.s32.totalorder %s59_s24, %s59_s24 }
  0x1c   :  { %p6748_p5 = scmp.lt.s32.totalorder %s6746_s30, %s6742_s29 }
  0x1e   :  { %p6749_p6 = por %p6748_p5, %p6747_p4 }
  0x20   :  { %p6750_p7 = pnand %p6749_p6, %p6743_p3 }
  0x22   :  { %6753 = shalt.err (!%p6750_p7)
}
  0x23   :  { %61 = dma.hbm_to_vmem [thread:$0]  %s7979_s3, 16, %s59_s24, [#allocation9]  }
  0x24   :  { %s7103_s1 = smov [#allocation11]   ;;  %s7104_s23 = smov [#allocation14]  }
  0x25   :  { %s77_s22 = sshll.u32 %s7103_s1, 4  ;;  %s99_s2 = sshll.u32 %s7104_s23, 4  ;;  %s78_s22 = int_to_ptr.vmem [resolvable:$true] %s77_s22  ;;  %s100_s2 = int_to_ptr.vmem [resolvable:$true] %s99_s2 }
  0x26   :  { %s6754_s27 = scalar_lea.hbm %s7953_s5, 512 }
  0x27   :  { %p6755_p8 = scmp.ne.s32.totalorder %s7953_s5, %s6754_s27  ;;  %p6758_p9 = scmp.lt.u32.totalorder %s6754_s27, %s7953_s5 }
  0x29   :  { %p6760_p10 = pnand %p6758_p9, %p6755_p8 }
  0x2b   :  { %6763 = shalt.err (!%p6760_p10)
}
  0x2c   :  { %s6764_s24 = scalar_lea.vmem %s78_s22, 512  ;;  %p6769_p12 = scmp.lt.s32.totalorder %s78_s22, %s78_s22 }
  0x2d   :  { %p6765_p11 = scmp.ne.s32.totalorder %s78_s22, %s6764_s24  ;;  %p6770_p13 = scmp.lt.s32.totalorder %s6764_s24, %s6764_s24 }
  0x2f   :  { %p6771_p0 = por %p6770_p13, %p6769_p12 }
  0x31   :  { %p6772_p1 = pnand %p6771_p0, %p6765_p11 }
  0x33   :  { %6775 = shalt.err (!%p6772_p1)
}
  0x34   :  { %s7105_s3 = smov 128   ;;  %s7106_s30 = smov 8  }
  0x35   :  { %83 = dma.hbm_to_vmem [thread:$0]  %s7953_s5, 512, %s78_s22, [#allocation12], %s7105_s3, %s7105_s3, %s7106_s30  }
  0x36   :  { %s6776_s25 = scalar_lea.hbm %s7955_s7, 512 }
  0x37   :  { %p6777_p2 = scmp.ne.s32.totalorder %s7955_s7, %s6776_s25  ;;  %p6780_p3 = scmp.lt.u32.totalorder %s6776_s25, %s7955_s7 }
  0x39   :  { %p6782_p4 = pnand %p6780_p3, %p6777_p2 }
  0x3b   :  { %6785 = shalt.err (!%p6782_p4)
}
  0x3c   :  { %s6786_s4 = scalar_lea.vmem %s100_s2, 512  ;;  %p6791_p6 = scmp.lt.s32.totalorder %s100_s2, %s100_s2 }
  0x3d   :  { %p6787_p5 = scmp.ne.s32.totalorder %s100_s2, %s6786_s4  ;;  %p6792_p7 = scmp.lt.s32.totalorder %s6786_s4, %s6786_s4 }
  0x3f   :  { %p6793_p8 = por %p6792_p7, %p6791_p6 }
  0x41   :  { %p6794_p9 = pnand %p6793_p8, %p6787_p5 }
  0x43   :  { %6797 = shalt.err (!%p6794_p9)
}
  0x44   :  { %105 = dma.hbm_to_vmem [thread:$0]  %s7955_s7, 512, %s100_s2, [#allocation15], %s7105_s3, %s7105_s3, %s7106_s30  }
  0x45   :  { %s7107_s29 = smov [#allocation17]   ;;  %s7108_s0 = smov [#allocation20]  }
  0x46   :  { %s124_s24 = sshll.u32 %s7107_s29, 4  ;;  %s145_s21 = sshll.u32 %s7108_s0, 4  ;;  %s125_s24 = int_to_ptr.vmem [resolvable:$true] %s124_s24  ;;  %s146_s21 = int_to_ptr.vmem [resolvable:$true] %s145_s21 }
  0x47   :  { %s6798_s25 = scalar_lea.hbm %s7957_s9, 16 }
  0x48   :  { %p6799_p10 = scmp.ne.s32.totalorder %s7957_s9, %s6798_s25  ;;  %p6802_p11 = scmp.lt.u32.totalorder %s6798_s25, %s7957_s9 }
  0x4a   :  { %p6804_p12 = pnand %p6802_p11, %p6799_p10 }
  0x4c   :  { %6807 = shalt.err (!%p6804_p12)
}
  0x4d   :  { %s6808_s7 = scalar_lea.vmem %s125_s24, 16  ;;  %s6812_s2 = scalar_lea.vmem %s125_s24, 32 }
  0x4e   :  { %p6809_p13 = scmp.ne.s32.totalorder %s125_s24, %s6808_s7  ;;  %p6813_p0 = scmp.lt.s32.totalorder %s125_s24, %s125_s24 }
  0x4f   :  { %p6814_p1 = scmp.lt.s32.totalorder %s6812_s2, %s6808_s7 }
  0x51   :  { %p6815_p2 = por %p6814_p1, %p6813_p0 }
  0x53   :  { %p6816_p3 = pnand %p6815_p2, %p6809_p13 }
  0x55   :  { %6819 = shalt.err (!%p6816_p3)
}
  0x56   :  { %127 = dma.hbm_to_vmem [thread:$0]  %s7957_s9, 16, %s125_s24, [#allocation18]  }
  0x57   :  { %s6820_s0 = scalar_lea.hbm %s7959_s11, 384 }
  0x58   :  { %p6821_p4 = scmp.ne.s32.totalorder %s7959_s11, %s6820_s0  ;;  %p6824_p5 = scmp.lt.u32.totalorder %s6820_s0, %s7959_s11 }
  0x5a   :  { %p6826_p6 = pnand %p6824_p5, %p6821_p4 }
  0x5c   :  { %6829 = shalt.err (!%p6826_p6)
}
  0x5d   :  { %s6830_s27 = scalar_lea.vmem %s146_s21, 384  ;;  %p6835_p8 = scmp.lt.s32.totalorder %s146_s21, %s146_s21 }
  0x5e   :  { %p6831_p7 = scmp.ne.s32.totalorder %s146_s21, %s6830_s27  ;;  %p6836_p9 = scmp.lt.s32.totalorder %s6830_s27, %s6830_s27 }
  0x60   :  { %p6837_p10 = por %p6836_p9, %p6835_p8 }
  0x62   :  { %p6838_p11 = pnand %p6837_p10, %p6831_p7 }
  0x64   :  { %6841 = shalt.err (!%p6838_p11)
}
  0x65   :  { %151 = dma.hbm_to_vmem [thread:$0]  %s7959_s11, 384, %s146_s21, [#allocation21], %s7105_s3, %s7105_s3, %s7106_s30  }
  0x66   :  { %s7109_s28 = smov [#allocation23]   ;;  %s7110_s7 = smov [#allocation26]  }
  0x67   :  { %s167_s19 = sshll.u32 %s7109_s28, 4  ;;  %s193_s2 = sshll.u32 %s7110_s7, 4  ;;  %s168_s19 = int_to_ptr.vmem [resolvable:$true] %s167_s19  ;;  %s194_s2 = int_to_ptr.vmem [resolvable:$true] %s193_s2 }
  0x68   :  { %s6842_s22 = scalar_lea.hbm %s7961_s13, 768 }
  0x69   :  { %p6843_p12 = scmp.ne.s32.totalorder %s7961_s13, %s6842_s22  ;;  %p6846_p13 = scmp.lt.u32.totalorder %s6842_s22, %s7961_s13 }
  0x6b   :  { %p6848_p0 = pnand %p6846_p13, %p6843_p12 }
  0x6d   :  { %6851 = shalt.err (!%p6848_p0)
}
  0x6e   :  { %s6852_s11 = scalar_lea.vmem %s168_s19, 768  ;;  %p6857_p2 = scmp.lt.s32.totalorder %s168_s19, %s168_s19 }
  0x6f   :  { %p6853_p1 = scmp.ne.s32.totalorder %s168_s19, %s6852_s11  ;;  %p6858_p3 = scmp.lt.s32.totalorder %s6852_s11, %s6852_s11 }
  0x71   :  { %p6859_p4 = por %p6858_p3, %p6857_p2 }
  0x73   :  { %p6860_p5 = pnand %p6859_p4, %p6853_p1 }
  0x75   :  { %6863 = shalt.err (!%p6860_p5)
}
  0x76   :  { %173 = dma.hbm_to_vmem [thread:$0]  %s7961_s13, 768, %s168_s19, [#allocation24], %s7105_s3, %s7105_s3, %s7106_s30  }
  0x77   :  { %s6864_s9 = scalar_lea.hbm %s7965_s17, 256 }
  0x78   :  { %p6865_p6 = scmp.ne.s32.totalorder %s7965_s17, %s6864_s9  ;;  %p6868_p7 = scmp.lt.u32.totalorder %s6864_s9, %s7965_s17 }
  0x7a   :  { %p6870_p8 = pnand %p6868_p7, %p6865_p6 }
  0x7c   :  { %6873 = shalt.err (!%p6870_p8)
}
  0x7d   :  { %s6874_s5 = scalar_lea.vmem %s194_s2, 256  ;;  %p6879_p10 = scmp.lt.s32.totalorder %s194_s2, %s194_s2 }
  0x7e   :  { %p6875_p9 = scmp.ne.s32.totalorder %s194_s2, %s6874_s5  ;;  %p6880_p11 = scmp.lt.s32.totalorder %s6874_s5, %s6874_s5 }
  0x80   :  { %p6881_p12 = por %p6880_p11, %p6879_p10 }
  0x82   :  { %p6882_p13 = pnand %p6881_p12, %p6875_p9 }
  0x84   :  { %6885 = shalt.err (!%p6882_p13)
}
  0x85   :  { %199 = dma.hbm_to_vmem [thread:$0]  %s7965_s17, 256, %s194_s2, [#allocation27], %s7105_s3, %s7105_s3, %s7106_s30  }
  0x86   :  { %s7111_s22 = smov [#allocation5]   ;;  %s7112_s0 = smov [#allocation10]  }
  0x87   :  { %s43_s29 = sshll.u32 %s7111_s22, 4  ;;  %s68_s1 = sshll.u32 %s7112_s0, 4  ;;  %s44_s29 = int_to_ptr.vmem [resolvable:$true] %s43_s29  ;;  %s69_s1 = int_to_ptr.vmem [resolvable:$true] %s68_s1 }
  0x88   :  { %s7980_s21 = sld [smem:[#allocation40_spill]] }
  0x8e   :  { %s6886_s25 = scalar_lea.hbm %s7980_s21, 256 }
  0x8f   :  { %p6887_p0 = scmp.ne.s32.totalorder %s7980_s21, %s6886_s25  ;;  %p6890_p1 = scmp.lt.u32.totalorder %s6886_s25, %s7980_s21 }
  0x91   :  { %p6892_p2 = pnand %p6890_p1, %p6887_p0 }
  0x93   :  { %6895 = shalt.err (!%p6892_p2)
}
  0x94   :  { %s6896_s17 = scalar_lea.vmem %s44_s29, 256  ;;  %p6901_p4 = scmp.lt.s32.totalorder %s44_s29, %s44_s29 }
  0x95   :  { %p6897_p3 = scmp.ne.s32.totalorder %s44_s29, %s6896_s17  ;;  %p6902_p5 = scmp.lt.s32.totalorder %s6896_s17, %s6896_s17 }
  0x97   :  { %p6903_p6 = por %p6902_p5, %p6901_p4 }
  0x99   :  { %p6904_p7 = pnand %p6903_p6, %p6897_p3 }
  0x9b   :  { %6907 = shalt.err (!%p6904_p7)
}
  0x9c   :  { %49 = dma.hbm_to_vmem [thread:$0]  %s7980_s21, 256, %s44_s29, [#allocation6], %s7105_s3, %s7105_s3, %s7106_s30  }
  0x9d   :  { %s7981_s5 = sld [smem:[#allocation43_spill]] }
  0xa3   :  { %s6908_s13 = scalar_lea.hbm %s7981_s5, 128 }
  0xa4   :  { %p6909_p8 = scmp.ne.s32.totalorder %s7981_s5, %s6908_s13  ;;  %p6912_p9 = scmp.lt.u32.totalorder %s6908_s13, %s7981_s5 }
  0xa6   :  { %p6914_p10 = pnand %p6912_p9, %p6909_p8 }
  0xa8   :  { %6917 = shalt.err (!%p6914_p10)
}
  0xa9   :  { %s6918_s11 = scalar_lea.vmem %s69_s1, 128  ;;  %p6923_p12 = scmp.lt.s32.totalorder %s69_s1, %s69_s1 }
  0xaa   :  { %p6919_p11 = scmp.ne.s32.totalorder %s69_s1, %s6918_s11  ;;  %p6924_p13 = scmp.lt.s32.totalorder %s6918_s11, %s6918_s11 }
  0xac   :  { %p6925_p0 = por %p6924_p13, %p6923_p12 }
  0xae   :  { %p6926_p1 = pnand %p6925_p0, %p6919_p11 }
  0xb0   :  { %6929 = shalt.err (!%p6926_p1)
}
  0xb1   :  { %71 = dma.hbm_to_vmem [thread:$0]  %s7981_s5, 128, %s69_s1, [#allocation9]  }
  0xb2   :  { %s7113_s25 = smov [#allocation13]   ;;  %s7114_s27 = smov [#allocation16]  }
  0xb3   :  { %s90_s26 = sshll.u32 %s7113_s25, 4  ;;  %s111_s9 = sshll.u32 %s7114_s27, 4  ;;  %s91_s26 = int_to_ptr.vmem [resolvable:$true] %s90_s26  ;;  %s112_s9 = int_to_ptr.vmem [resolvable:$true] %s111_s9 }
  0xb4   :  { %s6930_s2 = scalar_lea.hbm %s7954_s6, 16 }
  0xb5   :  { %p6931_p2 = scmp.ne.s32.totalorder %s7954_s6, %s6930_s2  ;;  %p6934_p3 = scmp.lt.u32.totalorder %s6930_s2, %s7954_s6 }
  0xb7   :  { %p6936_p4 = pnand %p6934_p3, %p6931_p2 }
  0xb9   :  { %6939 = shalt.err (!%p6936_p4)
}
  0xba   :  { %s6940_s1 = scalar_lea.vmem %s91_s26, 16  ;;  %s6944_s5 = scalar_lea.vmem %s91_s26, 32 }
  0xbb   :  { %p6941_p5 = scmp.ne.s32.totalorder %s91_s26, %s6940_s1  ;;  %p6945_p6 = scmp.lt.s32.totalorder %s91_s26, %s91_s26 }
  0xbc   :  { %p6946_p7 = scmp.lt.s32.totalorder %s6944_s5, %s6940_s1 }
  0xbe   :  { %p6947_p8 = por %p6946_p7, %p6945_p6 }
  0xc0   :  { %p6948_p9 = pnand %p6947_p8, %p6941_p5 }
  0xc2   :  { %6951 = shalt.err (!%p6948_p9)
}
  0xc3   :  { %93 = dma.hbm_to_vmem [thread:$0]  %s7954_s6, 16, %s91_s26, [#allocation12]  }
  0xc4   :  { %s6952_s11 = scalar_lea.hbm %s7956_s8, 512 }
  0xc5   :  { %p6953_p10 = scmp.ne.s32.totalorder %s7956_s8, %s6952_s11  ;;  %p6956_p11 = scmp.lt.u32.totalorder %s6952_s11, %s7956_s8 }
  0xc7   :  { %p6958_p12 = pnand %p6956_p11, %p6953_p10 }
  0xc9   :  { %6961 = shalt.err (!%p6958_p12)
}
  0xca   :  { %s6962_s24 = scalar_lea.vmem %s112_s9, 512  ;;  %p6967_p0 = scmp.lt.s32.totalorder %s112_s9, %s112_s9 }
  0xcb   :  { %p6963_p13 = scmp.ne.s32.totalorder %s112_s9, %s6962_s24  ;;  %p6968_p1 = scmp.lt.s32.totalorder %s6962_s24, %s6962_s24 }
  0xcd   :  { %p6969_p2 = por %p6968_p1, %p6967_p0 }
  0xcf   :  { %p6970_p3 = pnand %p6969_p2, %p6963_p13 }
  0xd1   :  { %6973 = shalt.err (!%p6970_p3)
}
  0xd2   :  { %117 = dma.hbm_to_vmem [thread:$0]  %s7956_s8, 512, %s112_s9, [#allocation15], %s7105_s3, %s7105_s3, %s7106_s30  }
  0xd3   :  { %s7115_s17 = smov [#allocation19]   ;;  %s7116_s28 = smov [#allocation22]  }
  0xd4   :  { %s133_s2 = sshll.u32 %s7115_s17, 4  ;;  %s158_s7 = sshll.u32 %s7116_s28, 4  ;;  %s134_s2 = int_to_ptr.vmem [resolvable:$true] %s133_s2  ;;  %s159_s7 = int_to_ptr.vmem [resolvable:$true] %s158_s7 }
  0xd5   :  { %s6974_s1 = scalar_lea.hbm %s7958_s10, 768 }
  0xd6   :  { %p6975_p4 = scmp.ne.s32.totalorder %s7958_s10, %s6974_s1  ;;  %p6978_p5 = scmp.lt.u32.totalorder %s6974_s1, %s7958_s10 }
  0xd8   :  { %p6980_p6 = pnand %p6978_p5, %p6975_p4 }
  0xda   :  { %6983 = shalt.err (!%p6980_p6)
}
  0xdb   :  { %s6984_s8 = scalar_lea.vmem %s134_s2, 768  ;;  %p6989_p8 = scmp.lt.s32.totalorder %s134_s2, %s134_s2 }
  0xdc   :  { %p6985_p7 = scmp.ne.s32.totalorder %s134_s2, %s6984_s8  ;;  %p6990_p9 = scmp.lt.s32.totalorder %s6984_s8, %s6984_s8 }
  0xde   :  { %p6991_p10 = por %p6990_p9, %p6989_p8 }
  0xe0   :  { %p6992_p11 = pnand %p6991_p10, %p6985_p7 }
  0xe2   :  { %6995 = shalt.err (!%p6992_p11)
}
  0xe3   :  { %139 = dma.hbm_to_vmem [thread:$0]  %s7958_s10, 768, %s134_s2, [#allocation18], %s7105_s3, %s7105_s3, %s7106_s30  }
  0xe4   :  { %s6996_s21 = scalar_lea.hbm %s7960_s12, 64 }
  0xe5   :  { %p6997_p12 = scmp.ne.s32.totalorder %s7960_s12, %s6996_s21  ;;  %p7000_p13 = scmp.lt.u32.totalorder %s6996_s21, %s7960_s12 }
  0xe7   :  { %p7002_p0 = pnand %p7000_p13, %p6997_p12 }
  0xe9   :  { %7005 = shalt.err (!%p7002_p0)
}
  0xea   :  { %s7006_s26 = scalar_lea.vmem %s159_s7, 64  ;;  %p7011_p2 = scmp.lt.s32.totalorder %s159_s7, %s159_s7 }
  0xeb   :  { %p7007_p1 = scmp.ne.s32.totalorder %s159_s7, %s7006_s26  ;;  %p7012_p3 = scmp.lt.s32.totalorder %s7006_s26, %s7006_s26 }
  0xed   :  { %p7013_p4 = por %p7012_p3, %p7011_p2 }
  0xef   :  { %p7014_p5 = pnand %p7013_p4, %p7007_p1 }
  0xf1   :  { %7017 = shalt.err (!%p7014_p5)
}
  0xf2   :  { %161 = dma.hbm_to_vmem [thread:$0]  %s7960_s12, 64, %s159_s7, [#allocation21]  }
  0xf3   :  { %s7117_s30 = smov [#allocation25]   ;;  %s7118_s2 = smov [#allocation28]  }
  0xf4   :  { %s182_s17 = sshll.u32 %s7117_s30, 4  ;;  %s206_s28 = sshll.u32 %s7118_s2, 4  ;;  %s183_s17 = int_to_ptr.vmem [resolvable:$true] %s182_s17  ;;  %s207_s28 = int_to_ptr.vmem [resolvable:$true] %s206_s28 }
  0xf5   :  { %s7018_s1 = scalar_lea.hbm %s7963_s15, 64 }
  0xf6   :  { %p7019_p6 = scmp.ne.s32.totalorder %s7963_s15, %s7018_s1  ;;  %p7022_p7 = scmp.lt.u32.totalorder %s7018_s1, %s7963_s15 }
  0xf8   :  { %p7024_p8 = pnand %p7022_p7, %p7019_p6 }
  0xfa   :  { %7027 = shalt.err (!%p7024_p8)
}
  0xfb   :  { %s7028_s12 = scalar_lea.vmem %s183_s17, 64  ;;  %p7033_p10 = scmp.lt.s32.totalorder %s183_s17, %s183_s17 }
  0xfc   :  { %p7029_p9 = scmp.ne.s32.totalorder %s183_s17, %s7028_s12  ;;  %p7034_p11 = scmp.lt.s32.totalorder %s7028_s12, %s7028_s12 }
  0xfe   :  { %p7035_p12 = por %p7034_p11, %p7033_p10 }
 0x100   :  { %p7036_p13 = pnand %p7035_p12, %p7029_p9 }
 0x102   :  { %7039 = shalt.err (!%p7036_p13)
}
 0x103   :  { %185 = dma.hbm_to_vmem [thread:$0]  %s7963_s15, 64, %s183_s17, [#allocation24]  }
 0x104   :  { %s7040_s11 = scalar_lea.hbm %s7966_s18, 32 }
 0x105   :  { %p7041_p0 = scmp.ne.s32.totalorder %s7966_s18, %s7040_s11  ;;  %p7044_p1 = scmp.lt.u32.totalorder %s7040_s11, %s7966_s18 }
 0x107   :  { %p7046_p2 = pnand %p7044_p1, %p7041_p0 }
 0x109   :  { %7049 = shalt.err (!%p7046_p2)
}
 0x10a   :  { %s7050_s24 = scalar_lea.vmem %s207_s28, 32  ;;  %p7055_p4 = scmp.lt.s32.totalorder %s207_s28, %s207_s28 }
 0x10b   :  { %p7051_p3 = scmp.ne.s32.totalorder %s207_s28, %s7050_s24  ;;  %p7056_p5 = scmp.lt.s32.totalorder %s7050_s24, %s7050_s24 }
 0x10d   :  { %p7057_p6 = por %p7056_p5, %p7055_p4 }
 0x10f   :  { %p7058_p7 = pnand %p7057_p6, %p7051_p3 }
 0x111   :  { %7061 = shalt.err (!%p7058_p7)
}
 0x112   :  { %209 = dma.hbm_to_vmem [thread:$0]  %s7966_s18, 32, %s207_s28, [#allocation27]  }
 0x113   :  { %7084 = dma.done.wait [#allocation6], 256  }
 0x114   :  { %7085 = vsyncadd [#allocation6], 4294967040 }
 0x115   :  { %7086 = dma.done.wait [#allocation9], 144  }
 0x116   :  { %7087 = vsyncadd [#allocation9], 4294967152 }
 0x117   :  { %7088 = dma.done.wait [#allocation12], 528  }
 0x118   :  { %7089 = vsyncadd [#allocation12], 4294966768 }
 0x119   :  { %7090 = dma.done.wait [#allocation15], 1024  }
 0x11a   :  { %7091 = vsyncadd [#allocation15], 4294966272 }
 0x11b   :  { %7092 = dma.done.wait [#allocation18], 784  }
 0x11c   :  { %7093 = vsyncadd [#allocation18], 4294966512 }
 0x11d   :  { %7094 = dma.done.wait [#allocation21], 448  }
 0x11e   :  { %7095 = vsyncadd [#allocation21], 4294966848 }
 0x11f   :  { %7096 = dma.done.wait [#allocation24], 832  }
 0x120   :  { %7097 = vsyncadd [#allocation24], 4294966464 }
 0x121   :  { %7098 = dma.done.wait [#allocation27], 288  }
 0x122   :  { %7099 = vsyncadd [#allocation27], 4294967008  ;;  %vm271_vm0 = vcmask 64512   ;;  %v263_v1 = vld [vmem:[#allocation10] sm:$0xff]  ;;  %s7982_s10 = sld [smem:[#allocation39_spill]]  ;;  %v7448_v5 = vld [vmem:[#allocation5] sm:$0xff] }
 0x123   :  { %5731 = vmatprep.subr.mxu0 %v263_v1  ;;  %vm353_vm1 = vcmask 130048   ;;  %v449_v6 = vld [vmem:[#allocation11] sm:$0xff]  ;;  %v450_v7 = vld [vmem:[#allocation11 + $0x8] sm:$0xff]  ;;  %v451_v8 = vld [vmem:[#allocation11 + $0x10] sm:$0xff]  ;;  %v7119_v9 = vmov 0.0|0.0   ;;  %vm7120_vm2 = vmmov 0  }
 0x124   :  { %5732 = vmatpush3.msra.mxu0 %v263_v1  ;;  %5740 = vmatprep.mubr.msk.f32.mxu1 %vm353_vm1, %v7448_v5  ;;  %v7453_v10 = vpack.c.bf16 %v450_v7, %v449_v6  ;;  %v452_v11 = vld [vmem:[#allocation11 + $0x18] sm:$0xff]  ;;  %v7121_v12 = vmov 0.0   ;;  %v5338_v14 = vld [vmem:[#allocation13] ss:$0 sm:$0xff]  ;;  %v258_v20 = vld [vmem:[#allocation5 + $0x8] sm:$0xff]  ;;  %s7983_s28 = sld [smem:[#allocation41_spill]] }
 0x125   :  { %6228 = vmatprep.subr.bf16.mxu0 %v7119_v9  ;;  %v7458_v13 = vpack.c.bf16 %v452_v11, %v451_v8  ;;  %s7122_s4 = smov 64   ;;  %s7123_s13 = smov 32   ;;  %vm558_vm3 = vcmask 253952   ;;  %vm454_vm4 = vcmask 261120   ;;  %vm4659_vm5 = vcmask 113664  }
 0x126   :  { %vm4666_vm6 = vcmask 1045504   ;;  %vm7124_vm7 = vmmov 1   ;;  %vm5200_vm9 = vcmask 1043456   ;;  %vm5196_vm11 = vcmask 97280  }
 0x127   :  { %vm6453_vm8 = vmpackc.low %vm4666_vm6, %vm7124_vm7  ;;  %vm5293_vm12 = vcmask 254976   ;;  %vm5297_vm13 = vcmask 1041408   ;;  %vm5314_vm14 = vcmask 0  }
 0x128   :  { %v261_v2 = vld [vmem:[%s7982_s10] sm:$0xff]  ;;  %v262_v3 = vld [vmem:[%s7982_s10 + $0x8] sm:$0xff]  ;;  %vm6496_vm10 = vmpackc.low %vm5200_vm9, %vm7124_vm7 }
 0x129   :  { %5733 = vmatprep.mubr.msk.f32.mxu0 %vm271_vm0, %v261_v2  ;;  %v7445_v4 = vpack.c.bf16 %v262_v3, %v261_v2 }
 0x12a   :  { %5734 = vmatmul.mubr.msk.f32.vlgmr.msra.gmra.mrb[0].mxu0 %vm271_vm0, %v262_v3  ;;  %v5343_v23 = vld [vmem:[%s7983_s28] ss:$0 sm:$0xff] }
 0x12b   :  { %5751 = vmatprep.mubr.msk.f32.mxu0 %vm7120_vm2, %v7121_v12  ;;  %6230 = vmatpush3.bf16.msra.mxu0 %v7453_v10 }
 0x12c   :  { %6231 = vmatprep.subr.bf16.mxu0 %v7119_v9 }
 0x12f   :  { %6233 = vmatpush3.bf16.msra.mxu0 %v7458_v13 }
 0x130   :  { %6234 = vmatprep.subr.bf16.mxu0 %v7119_v9 }
 0x132   :  { %5752 = vmatmul.mubr.f32.vlgmr.msra.gmra.mrb[2].mxu0 %v7121_v12 }
 0x133   :  { %6236 = vmatpush3.bf16.msra.mxu0 %v7453_v10  ;;  %5762 = vmatprep.mubr.msk.f32.mxu0 %vm7120_vm2, %v7121_v12 }
 0x134   :  { %6237 = vmatprep.subr.bf16.mxu0 %v7119_v9 }
 0x137   :  { %6239 = vmatpush3.bf16.msra.mxu0 %v7458_v13 }
 0x138   :  { %6240 = vmatprep.subr.bf16.mxu0 %v7119_v9 }
 0x1fd   :  { %v5735_v15 = vpop.f32.mrb[0].mxu0 }
 0x1fe   :  { %v350_v16 = vadd.f32 %v5735_v15, %v5338_v14  ;;  %v344_v17 = vpop.f32.mrb[1].mxu0 }
 0x1ff   :  { %v345_v18 = vadd.f32 %v5338_v14, %v344_v17 }
 0x201   :  { %v6224_v19 = vpack.c.bf16 %v350_v16, %v345_v18 }
 0x203   :  { %6225 = vmatprep.subr.bf16.mxu1 %v6224_v19 }
 0x204   :  { %6227 = vmatpush3.bf16.msra.mxu1 %v6224_v19 }
 0x205   :  { %6246 = vmatprep.subr.bf16.mxu1 %v7119_v9  ;;  %v524_v21 = vpop.f32.mrb[2].mxu0 }
 0x206   :  { %v5753_v22 = vpop.f32.mrb[3].mxu0 }
 0x207   :  { %5741 = vmatmul.mubr.msk.f32.vlgmr.msra.gmra.mrb[0].mxu1 %vm353_vm1, %v258_v20 }
 0x208   :  { %6248 = vmatpush3.bf16.msra.mxu1 %v7453_v10  ;;  %5784 = vmatprep.mubr.msk.f32.mxu1 %vm7120_vm2, %v7121_v12 }
 0x209   :  { %6249 = vmatprep.subr.bf16.mxu1 %v7119_v9 }
 0x20c   :  { %6251 = vmatpush3.bf16.msra.mxu1 %v7458_v13 }
 0x20d   :  { %6258 = vmatprep.subr.bf16.mxu1 %v7119_v9 }
 0x2da   :  { %v5742_v24 = vpop.f32.mrb[0].mxu1 }
 0x2db   :  { %v436_v25 = vsub.f32 %v5742_v24, %v350_v16  ;;  %v426_v26 = vpop.f32.mrb[1].mxu1 }
 0x2dc   :  { %v435_v27 = vsub.f32 %v426_v26, %v345_v18 }
 0x2dd   :  { %v444_v28 = vmul.f32 %v5343_v23, %v436_v25 }
 0x2de   :  { %v443_v29 = vmul.f32 %v5343_v23, %v435_v27 }
 0x2df   :  { %v446_v30 = vadd.f32 %v444_v28, %v350_v16 }
 0x2e0   :  { %v445_v31 = vadd.f32 %v443_v29, %v345_v18 }
 0x2e1   :  { %448 = vst [vmem:[#allocation2 + $0x8] sm:$0xff] %v446_v30 }
 0x2e2   :  { %447 = vst [vmem:[#allocation2] sm:$0xff] %v445_v31 }
 0x2e9   :  { %v453_v32 = vld [vmem:[#allocation2] sm:$0x1]  ;;  %v560_v49 = vld [vmem:[#allocation2 + $0x1] sm:$0x1]  ;;  %v664_v6 = vld [vmem:[#allocation2 + $0x2] sm:$0x1] }
 0x2ea   :  { %v528_v33 = vadd.f32 %v524_v21, %v453_v32  ;;  %v768_v29 = vld [vmem:[#allocation2 + $0x3] sm:$0x1] }
 0x2ec   :  { %v5344_v34 = vmul.f32 -1.442695, %v528_v33 }
 0x2ee   :  { %6530 = vpow2.f32 %v5344_v34 }
 0x2f8   :  { %v6531_v35 = vpop.eup %6530 }
 0x2f9   :  { %v532_v36 = vadd.f32 1.0, %v6531_v35 }
 0x2fb   :  { %6532 = vrcp.f32 %v532_v36 }
 0x305   :  { %v6533_v37 = vpop.eup %6532 }
 0x306   :  { %v535_v38 = vmul.f32 2.0, %v6533_v37  ;;  %v537_v42 = vmul.f32 0.0, %v6533_v37 }
 0x308   :  { %v5345_v39 = vadd.f32 -1.0, %v535_v38 }
 0x30a   :  { %539 = vrot.lane.b32.xlu0 %v5345_v39, %s7122_s4 }
 0x37c   :  { %v540_v40 = vpop.permute.xlu0 %539 }
 0x37d   :  { %v542_v41 = vmul.f32 %v6533_v37, %v540_v40 }
 0x37f   :  { %544 = vrot.lane.b32.xlu0 %v542_v41, %s7123_s13 }
 0x3f1   :  { %v545_v43 = vpop.permute.xlu0 %544 }
 0x3f2   :  { %v547_v44 = vadd.f32 %v545_v43, %v537_v42 }
 0x3f4   :  { %6534 = vtanh.f32 %v547_v44 }
 0x3fe   :  { %v6535_v45 = vpop.eup %6534 }
 0x3ff   :  { %550 = vrot.lane.b32.xlu1 %v6535_v45, %s7122_s4 }
 0x471   :  { %v551_v46 = vpop.permute.xlu1 %550 }
 0x472   :  { %v553_v47 = vmul.f32 %v6533_v37, %v551_v46 }
 0x474   :  { %555 = vrot.lane.b32.xlu1 %v553_v47, %s7123_s13 }
 0x4e6   :  { %v556_v48 = vpop.permute.xlu1 %555 }
 0x4e7   :  { %559 = vst.msk [vmem:[#allocation3] sm:$0x1] %vm558_vm3, %v556_v48  ;;  %5763 = vmatmul.mubr.msk.f32.vlgmr.msra.gmra.mrb[4].mxu0 %vm454_vm4, %v556_v48  ;;  %v872_v48 = vld [vmem:[#allocation2 + $0x4] sm:$0x1] }
 0x4e8   :  { %6242 = vmatpush3.bf16.msra.mxu0 %v7453_v10  ;;  %5773 = vmatprep.mubr.msk.f32.mxu0 %vm7120_vm2, %v7121_v12 }
 0x4e9   :  { %6243 = vmatprep.subr.bf16.mxu0 %v7119_v9 }
 0x4ec   :  { %6245 = vmatpush3.bf16.msra.mxu0 %v7458_v13 }
 0x4ed   :  { %6252 = vmatprep.subr.bf16.mxu0 %v7119_v9 }
 0x5ba   :  { %v629_v50 = vpop.f32.mrb[4].mxu0 }
 0x5bb   :  { %v633_v51 = vadd.f32 %v629_v50, %v560_v49  ;;  %v5764_v52 = vpop.f32.mrb[5].mxu0 }
 0x5bd   :  { %v5347_v53 = vmul.f32 -1.442695, %v633_v51 }
 0x5bf   :  { %6536 = vpow2.f32 %v5347_v53 }
 0x5c9   :  { %v6537_v54 = vpop.eup %6536 }
 0x5ca   :  { %v637_v55 = vadd.f32 1.0, %v6537_v54 }
 0x5cc   :  { %6538 = vrcp.f32 %v637_v55 }
 0x5d6   :  { %v6539_v56 = vpop.eup %6538 }
 0x5d7   :  { %v640_v57 = vmul.f32 2.0, %v6539_v56  ;;  %v642_v61 = vmul.f32 %v6539_v56, %v547_v44 }
 0x5d9   :  { %v5348_v58 = vadd.f32 -1.0, %v640_v57 }
 0x5db   :  { %644 = vrot.lane.b32.xlu0 %v5348_v58, %s7122_s4 }
 0x64d   :  { %v645_v59 = vpop.permute.xlu0 %644 }
 0x64e   :  { %v647_v60 = vmul.f32 %v6539_v56, %v645_v59 }
 0x650   :  { %649 = vrot.lane.b32.xlu1 %v647_v60, %s7123_s13 }
 0x6c2   :  { %v650_v62 = vpop.permute.xlu1 %649 }
 0x6c3   :  { %v652_v63 = vadd.f32 %v650_v62, %v642_v61 }
 0x6c5   :  { %6540 = vtanh.f32 %v652_v63 }
 0x6cf   :  { %v6541_v0 = vpop.eup %6540 }
 0x6d0   :  { %655 = vrot.lane.b32.xlu0 %v6541_v0, %s7122_s4 }
 0x742   :  { %v656_v1 = vpop.permute.xlu0 %655 }
 0x743   :  { %v658_v2 = vmul.f32 %v6539_v56, %v656_v1 }
 0x745   :  { %660 = vrot.lane.b32.xlu1 %v658_v2, %s7123_s13 }
 0x7b7   :  { %v661_v3 = vpop.permute.xlu1 %660 }
 0x7b8   :  { %663 = vst.msk [vmem:[#allocation3 + $0x1] sm:$0x1] %vm558_vm3, %v661_v3  ;;  %5774 = vmatmul.mubr.msk.f32.vlgmr.msra.gmra.mrb[6].mxu0 %vm454_vm4, %v661_v3  ;;  %v976_v3 = vld [vmem:[#allocation2 + $0x5] sm:$0x1] }
 0x7b9   :  { %6254 = vmatpush3.bf16.msra.mxu0 %v7453_v10  ;;  %5795 = vmatprep.mubr.msk.f32.mxu0 %vm7120_vm2, %v7121_v12 }
 0x7ba   :  { %6255 = vmatprep.subr.bf16.mxu0 %v7119_v9 }
 0x7bd   :  { %6257 = vmatpush3.bf16.msra.mxu0 %v7458_v13 }
 0x7be   :  { %6264 = vmatprep.subr.bf16.mxu0 %v7119_v9 }
 0x88b   :  { %v733_v7 = vpop.f32.mrb[6].mxu0 }
 0x88c   :  { %v737_v8 = vadd.f32 %v733_v7, %v664_v6  ;;  %v5775_v11 = vpop.f32.mrb[7].mxu0 }
 0x88e   :  { %v5350_v14 = vmul.f32 -1.442695, %v737_v8 }
 0x890   :  { %6542 = vpow2.f32 %v5350_v14 }
 0x89a   :  { %v6543_v15 = vpop.eup %6542 }
 0x89b   :  { %v741_v16 = vadd.f32 1.0, %v6543_v15 }
 0x89d   :  { %6544 = vrcp.f32 %v741_v16 }
 0x8a7   :  { %v6545_v17 = vpop.eup %6544 }
 0x8a8   :  { %v744_v18 = vmul.f32 2.0, %v6545_v17  ;;  %v746_v22 = vmul.f32 %v6545_v17, %v652_v63 }
 0x8aa   :  { %v5351_v19 = vadd.f32 -1.0, %v744_v18 }
 0x8ac   :  { %748 = vrot.lane.b32.xlu0 %v5351_v19, %s7122_s4 }
 0x91e   :  { %v749_v20 = vpop.permute.xlu0 %748 }
 0x91f   :  { %v751_v21 = vmul.f32 %v6545_v17, %v749_v20 }
 0x921   :  { %753 = vrot.lane.b32.xlu1 %v751_v21, %s7123_s13 }
 0x993   :  { %v754_v23 = vpop.permute.xlu1 %753 }
 0x994   :  { %v756_v24 = vadd.f32 %v754_v23, %v746_v22 }
 0x996   :  { %6546 = vtanh.f32 %v756_v24 }
 0x9a0   :  { %v6547_v25 = vpop.eup %6546 }
 0x9a1   :  { %759 = vrot.lane.b32.xlu0 %v6547_v25, %s7122_s4 }
 0xa13   :  { %v760_v26 = vpop.permute.xlu0 %759 }
 0xa14   :  { %v762_v27 = vmul.f32 %v6545_v17, %v760_v26 }
 0xa16   :  { %764 = vrot.lane.b32.xlu1 %v762_v27, %s7123_s13 }
 0xa88   :  { %v765_v28 = vpop.permute.xlu1 %764 }
 0xa89   :  { %767 = vst.msk [vmem:[#allocation3 + $0x2] sm:$0x1] %vm558_vm3, %v765_v28  ;;  %5785 = vmatmul.mubr.msk.f32.vlgmr.msra.gmra.mrb[2].mxu1 %vm454_vm4, %v765_v28  ;;  %v1080_v28 = vld [vmem:[#allocation2 + $0x6] sm:$0x1] }
 0xa8a   :  { %6260 = vmatpush3.bf16.msra.mxu1 %v7453_v10  ;;  %5806 = vmatprep.mubr.msk.f32.mxu1 %vm7120_vm2, %v7121_v12 }
 0xa8b   :  { %6261 = vmatprep.subr.bf16.mxu1 %v7119_v9 }
 0xa8e   :  { %6263 = vmatpush3.bf16.msra.mxu1 %v7458_v13 }
 0xa8f   :  { %6270 = vmatprep.subr.bf16.mxu1 %v7119_v9 }
 0xb5c   :  { %v837_v30 = vpop.f32.mrb[2].mxu1 }
 0xb5d   :  { %v841_v31 = vadd.f32 %v837_v30, %v768_v29  ;;  %v5786_v32 = vpop.f32.mrb[3].mxu1 }
 0xb5f   :  { %v5353_v33 = vmul.f32 -1.442695, %v841_v31 }
 0xb61   :  { %6548 = vpow2.f32 %v5353_v33 }
 0xb6b   :  { %v6549_v34 = vpop.eup %6548 }
 0xb6c   :  { %v845_v35 = vadd.f32 1.0, %v6549_v34 }
 0xb6e   :  { %6550 = vrcp.f32 %v845_v35 }
 0xb78   :  { %v6551_v36 = vpop.eup %6550 }
 0xb79   :  { %v848_v37 = vmul.f32 2.0, %v6551_v36  ;;  %v850_v41 = vmul.f32 %v6551_v36, %v756_v24 }
 0xb7b   :  { %v5354_v38 = vadd.f32 -1.0, %v848_v37 }
 0xb7d   :  { %852 = vrot.lane.b32.xlu0 %v5354_v38, %s7122_s4 }
 0xbef   :  { %v853_v39 = vpop.permute.xlu0 %852 }
 0xbf0   :  { %v855_v40 = vmul.f32 %v6551_v36, %v853_v39 }
 0xbf2   :  { %857 = vrot.lane.b32.xlu1 %v855_v40, %s7123_s13 }
 0xc64   :  { %v858_v42 = vpop.permute.xlu1 %857 }
 0xc65   :  { %v860_v43 = vadd.f32 %v858_v42, %v850_v41 }
 0xc67   :  { %6552 = vtanh.f32 %v860_v43 }
 0xc71   :  { %v6553_v44 = vpop.eup %6552 }
 0xc72   :  { %863 = vrot.lane.b32.xlu0 %v6553_v44, %s7122_s4 }
 0xce4   :  { %v864_v45 = vpop.permute.xlu0 %863 }
 0xce5   :  { %v866_v46 = vmul.f32 %v6551_v36, %v864_v45 }
 0xce7   :  { %868 = vrot.lane.b32.xlu1 %v866_v46, %s7123_s13 }
 0xd59   :  { %v869_v47 = vpop.permute.xlu1 %868 }
 0xd5a   :  { %871 = vst.msk [vmem:[#allocation3 + $0x3] sm:$0x1] %vm558_vm3, %v869_v47  ;;  %5796 = vmatmul.mubr.msk.f32.vlgmr.msra.gmra.mrb[8].mxu0 %vm454_vm4, %v869_v47  ;;  %v1184_v47 = vld [vmem:[#allocation2 + $0x7] sm:$0x1] }
 0xd5b   :  { %6266 = vmatpush3.bf16.msra.mxu0 %v7453_v10  ;;  %5817 = vmatprep.mubr.msk.f32.mxu0 %vm7120_vm2, %v7121_v12 }
 0xd5c   :  { %6267 = vmatprep.subr.bf16.mxu0 %v7119_v9 }
 0xd5f   :  { %6269 = vmatpush3.bf16.msra.mxu0 %v7458_v13 }
 0xd60   :  { %6276 = vmatprep.subr.bf16.mxu0 %v7119_v9 }
 0xe2d   :  { %v941_v49 = vpop.f32.mrb[8].mxu0 }
 0xe2e   :  { %v945_v50 = vadd.f32 %v941_v49, %v872_v48  ;;  %v5797_v51 = vpop.f32.mrb[9].mxu0 }
 0xe30   :  { %v5356_v52 = vmul.f32 -1.442695, %v945_v50 }
 0xe32   :  { %6554 = vpow2.f32 %v5356_v52 }
 0xe3c   :  { %v6555_v53 = vpop.eup %6554 }
 0xe3d   :  { %v949_v54 = vadd.f32 1.0, %v6555_v53 }
 0xe3f   :  { %6556 = vrcp.f32 %v949_v54 }
 0xe49   :  { %v6557_v55 = vpop.eup %6556 }
 0xe4a   :  { %v952_v56 = vmul.f32 2.0, %v6557_v55  ;;  %v954_v60 = vmul.f32 %v6557_v55, %v860_v43 }
 0xe4c   :  { %v5357_v57 = vadd.f32 -1.0, %v952_v56 }
 0xe4e   :  { %956 = vrot.lane.b32.xlu0 %v5357_v57, %s7122_s4 }
 0xec0   :  { %v957_v58 = vpop.permute.xlu0 %956 }
 0xec1   :  { %v959_v59 = vmul.f32 %v6557_v55, %v957_v58 }
 0xec3   :  { %961 = vrot.lane.b32.xlu1 %v959_v59, %s7123_s13 }
 0xf35   :  { %v962_v61 = vpop.permute.xlu1 %961 }
 0xf36   :  { %v964_v62 = vadd.f32 %v962_v61, %v954_v60 }
 0xf38   :  { %6558 = vtanh.f32 %v964_v62 }
 0xf42   :  { %v6559_v63 = vpop.eup %6558 }
 0xf43   :  { %967 = vrot.lane.b32.xlu0 %v6559_v63, %s7122_s4 }
 0xfb5   :  { %v968_v0 = vpop.permute.xlu0 %967 }
 0xfb6   :  { %v970_v1 = vmul.f32 %v6557_v55, %v968_v0 }
 0xfb8   :  { %972 = vrot.lane.b32.xlu1 %v970_v1, %s7123_s13 }
0x102a   :  { %v973_v2 = vpop.permute.xlu1 %972 }
0x102b   :  { %975 = vst.msk [vmem:[#allocation3 + $0x4] sm:$0x1] %vm558_vm3, %v973_v2  ;;  %5807 = vmatmul.mubr.msk.f32.vlgmr.msra.gmra.mrb[4].mxu1 %vm454_vm4, %v973_v2  ;;  %v1288_v2 = vld [vmem:[#allocation2 + $0x8] sm:$0x1] }
0x102c   :  { %6272 = vmatpush3.bf16.msra.mxu1 %v7453_v10  ;;  %5828 = vmatprep.mubr.msk.f32.mxu1 %vm7120_vm2, %v7121_v12 }
0x102d   :  { %6273 = vmatprep.subr.bf16.mxu1 %v7119_v9 }
0x1030   :  { %6275 = vmatpush3.bf16.msra.mxu1 %v7458_v13 }
0x1031   :  { %6282 = vmatprep.subr.bf16.mxu1 %v7119_v9 }
0x10fe   :  { %v1045_v6 = vpop.f32.mrb[4].mxu1 }
0x10ff   :  { %v1049_v7 = vadd.f32 %v1045_v6, %v976_v3  ;;  %v5808_v8 = vpop.f32.mrb[5].mxu1 }
0x1101   :  { %v5359_v11 = vmul.f32 -1.442695, %v1049_v7 }
0x1103   :  { %6560 = vpow2.f32 %v5359_v11 }
0x110d   :  { %v6561_v14 = vpop.eup %6560 }
0x110e   :  { %v1053_v15 = vadd.f32 1.0, %v6561_v14 }
0x1110   :  { %6562 = vrcp.f32 %v1053_v15 }
0x111a   :  { %v6563_v16 = vpop.eup %6562 }
0x111b   :  { %v1056_v17 = vmul.f32 2.0, %v6563_v16  ;;  %v1058_v21 = vmul.f32 %v6563_v16, %v964_v62 }
0x111d   :  { %v5360_v18 = vadd.f32 -1.0, %v1056_v17 }
0x111f   :  { %1060 = vrot.lane.b32.xlu0 %v5360_v18, %s7122_s4 }
0x1191   :  { %v1061_v19 = vpop.permute.xlu0 %1060 }
0x1192   :  { %v1063_v20 = vmul.f32 %v6563_v16, %v1061_v19 }
0x1194   :  { %1065 = vrot.lane.b32.xlu1 %v1063_v20, %s7123_s13 }
0x1206   :  { %v1066_v22 = vpop.permute.xlu1 %1065 }
0x1207   :  { %v1068_v23 = vadd.f32 %v1066_v22, %v1058_v21 }
0x1209   :  { %6564 = vtanh.f32 %v1068_v23 }
0x1213   :  { %v6565_v24 = vpop.eup %6564 }
0x1214   :  { %1071 = vrot.lane.b32.xlu0 %v6565_v24, %s7122_s4 }
0x1286   :  { %v1072_v25 = vpop.permute.xlu0 %1071 }
0x1287   :  { %v1074_v26 = vmul.f32 %v6563_v16, %v1072_v25 }
0x1289   :  { %1076 = vrot.lane.b32.xlu1 %v1074_v26, %s7123_s13 }
0x12fb   :  { %v1077_v27 = vpop.permute.xlu1 %1076 }
0x12fc   :  { %1079 = vst.msk [vmem:[#allocation3 + $0x5] sm:$0x1] %vm558_vm3, %v1077_v27  ;;  %5818 = vmatmul.mubr.msk.f32.vlgmr.msra.gmra.mrb[10].mxu0 %vm454_vm4, %v1077_v27  ;;  %v1392_v27 = vld [vmem:[#allocation2 + $0x9] sm:$0x1] }
0x12fd   :  { %6278 = vmatpush3.bf16.msra.mxu0 %v7453_v10  ;;  %5839 = vmatprep.mubr.msk.f32.mxu0 %vm7120_vm2, %v7121_v12 }
0x12fe   :  { %6279 = vmatprep.subr.bf16.mxu0 %v7119_v9 }
0x1301   :  { %6281 = vmatpush3.bf16.msra.mxu0 %v7458_v13 }
0x1302   :  { %6288 = vmatprep.subr.bf16.mxu0 %v7119_v9 }
0x13cf   :  { %v1149_v29 = vpop.f32.mrb[10].mxu0 }
0x13d0   :  { %v1153_v30 = vadd.f32 %v1149_v29, %v1080_v28  ;;  %v5819_v31 = vpop.f32.mrb[11].mxu0 }
0x13d2   :  { %v5362_v32 = vmul.f32 -1.442695, %v1153_v30 }
0x13d4   :  { %6566 = vpow2.f32 %v5362_v32 }
0x13de   :  { %v6567_v33 = vpop.eup %6566 }
0x13df   :  { %v1157_v34 = vadd.f32 1.0, %v6567_v33 }
0x13e1   :  { %6568 = vrcp.f32 %v1157_v34 }
0x13eb   :  { %v6569_v35 = vpop.eup %6568 }
0x13ec   :  { %v1160_v36 = vmul.f32 2.0, %v6569_v35  ;;  %v1162_v40 = vmul.f32 %v6569_v35, %v1068_v23 }
0x13ee   :  { %v5363_v37 = vadd.f32 -1.0, %v1160_v36 }
0x13f0   :  { %1164 = vrot.lane.b32.xlu0 %v5363_v37, %s7122_s4 }
0x1462   :  { %v1165_v38 = vpop.permute.xlu0 %1164 }
0x1463   :  { %v1167_v39 = vmul.f32 %v6569_v35, %v1165_v38 }
0x1465   :  { %1169 = vrot.lane.b32.xlu1 %v1167_v39, %s7123_s13 }
0x14d7   :  { %v1170_v41 = vpop.permute.xlu1 %1169 }
0x14d8   :  { %v1172_v42 = vadd.f32 %v1170_v41, %v1162_v40 }
0x14da   :  { %6570 = vtanh.f32 %v1172_v42 }
0x14e4   :  { %v6571_v43 = vpop.eup %6570 }
0x14e5   :  { %1175 = vrot.lane.b32.xlu0 %v6571_v43, %s7122_s4 }
0x1557   :  { %v1176_v44 = vpop.permute.xlu0 %1175 }
0x1558   :  { %v1178_v45 = vmul.f32 %v6569_v35, %v1176_v44 }
0x155a   :  { %1180 = vrot.lane.b32.xlu1 %v1178_v45, %s7123_s13 }
0x15cc   :  { %v1181_v46 = vpop.permute.xlu1 %1180 }
0x15cd   :  { %1183 = vst.msk [vmem:[#allocation3 + $0x6] sm:$0x1] %vm558_vm3, %v1181_v46  ;;  %5829 = vmatmul.mubr.msk.f32.vlgmr.msra.gmra.mrb[6].mxu1 %vm454_vm4, %v1181_v46  ;;  %v1496_v46 = vld [vmem:[#allocation2 + $0xa] sm:$0x1] }
0x15ce   :  { %6284 = vmatpush3.bf16.msra.mxu1 %v7453_v10  ;;  %5850 = vmatprep.mubr.msk.f32.mxu1 %vm7120_vm2, %v7121_v12 }
0x15cf   :  { %6285 = vmatprep.subr.bf16.mxu1 %v7119_v9 }
0x15d2   :  { %6287 = vmatpush3.bf16.msra.mxu1 %v7458_v13 }
0x15d3   :  { %6294 = vmatprep.subr.bf16.mxu1 %v7119_v9 }
0x16a0   :  { %v1253_v48 = vpop.f32.mrb[6].mxu1 }
0x16a1   :  { %v1257_v49 = vadd.f32 %v1253_v48, %v1184_v47  ;;  %v5830_v50 = vpop.f32.mrb[7].mxu1 }
0x16a3   :  { %v5365_v51 = vmul.f32 -1.442695, %v1257_v49 }
0x16a5   :  { %6572 = vpow2.f32 %v5365_v51 }
0x16af   :  { %v6573_v52 = vpop.eup %6572 }
0x16b0   :  { %v1261_v53 = vadd.f32 1.0, %v6573_v52 }
0x16b2   :  { %6574 = vrcp.f32 %v1261_v53 }
0x16bc   :  { %v6575_v54 = vpop.eup %6574 }
0x16bd   :  { %v1264_v55 = vmul.f32 2.0, %v6575_v54  ;;  %v1266_v59 = vmul.f32 %v6575_v54, %v1172_v42 }
0x16bf   :  { %v5366_v56 = vadd.f32 -1.0, %v1264_v55 }
0x16c1   :  { %1268 = vrot.lane.b32.xlu0 %v5366_v56, %s7122_s4 }
0x1733   :  { %v1269_v57 = vpop.permute.xlu0 %1268 }
0x1734   :  { %v1271_v58 = vmul.f32 %v6575_v54, %v1269_v57 }
0x1736   :  { %1273 = vrot.lane.b32.xlu1 %v1271_v58, %s7123_s13 }
0x17a8   :  { %v1274_v60 = vpop.permute.xlu1 %1273 }
0x17a9   :  { %v1276_v61 = vadd.f32 %v1274_v60, %v1266_v59 }
0x17ab   :  { %6576 = vtanh.f32 %v1276_v61 }
0x17b5   :  { %v6577_v62 = vpop.eup %6576 }
0x17b6   :  { %1279 = vrot.lane.b32.xlu0 %v6577_v62, %s7122_s4 }
0x1828   :  { %v1280_v63 = vpop.permute.xlu0 %1279 }
0x1829   :  { %v1282_v0 = vmul.f32 %v6575_v54, %v1280_v63 }
0x182b   :  { %1284 = vrot.lane.b32.xlu1 %v1282_v0, %s7123_s13 }
0x189d   :  { %v1285_v1 = vpop.permute.xlu1 %1284 }
0x189e   :  { %1287 = vst.msk [vmem:[#allocation3 + $0x7] sm:$0x1] %vm558_vm3, %v1285_v1  ;;  %5840 = vmatmul.mubr.msk.f32.vlgmr.msra.gmra.mrb[12].mxu0 %vm454_vm4, %v1285_v1  ;;  %v1600_v1 = vld [vmem:[#allocation2 + $0xb] sm:$0x1] }
0x189f   :  { %6290 = vmatpush3.bf16.msra.mxu0 %v7453_v10  ;;  %5861 = vmatprep.mubr.msk.f32.mxu0 %vm7120_vm2, %v7121_v12 }
0x18a0   :  { %6291 = vmatprep.subr.bf16.mxu0 %v7119_v9 }
0x18a3   :  { %6293 = vmatpush3.bf16.msra.mxu0 %v7458_v13 }
0x18a4   :  { %6300 = vmatprep.subr.bf16.mxu0 %v7119_v9 }
0x1971   :  { %v1357_v3 = vpop.f32.mrb[12].mxu0 }
0x1972   :  { %v1361_v6 = vadd.f32 %v1357_v3, %v1288_v2  ;;  %v5841_v7 = vpop.f32.mrb[13].mxu0 }
0x1974   :  { %v5368_v8 = vmul.f32 -1.442695, %v1361_v6 }
0x1976   :  { %6578 = vpow2.f32 %v5368_v8 }
0x1980   :  { %v6579_v11 = vpop.eup %6578 }
0x1981   :  { %v1365_v14 = vadd.f32 1.0, %v6579_v11 }
0x1983   :  { %6580 = vrcp.f32 %v1365_v14 }
0x198d   :  { %v6581_v15 = vpop.eup %6580 }
0x198e   :  { %v1368_v16 = vmul.f32 2.0, %v6581_v15  ;;  %v1370_v20 = vmul.f32 %v6581_v15, %v1276_v61 }
0x1990   :  { %v5369_v17 = vadd.f32 -1.0, %v1368_v16 }
0x1992   :  { %1372 = vrot.lane.b32.xlu0 %v5369_v17, %s7122_s4 }
0x1a04   :  { %v1373_v18 = vpop.permute.xlu0 %1372 }
0x1a05   :  { %v1375_v19 = vmul.f32 %v6581_v15, %v1373_v18 }
0x1a07   :  { %1377 = vrot.lane.b32.xlu1 %v1375_v19, %s7123_s13 }
0x1a79   :  { %v1378_v21 = vpop.permute.xlu1 %1377 }
0x1a7a   :  { %v1380_v22 = vadd.f32 %v1378_v21, %v1370_v20 }
0x1a7c   :  { %6582 = vtanh.f32 %v1380_v22 }
0x1a86   :  { %v6583_v23 = vpop.eup %6582 }
0x1a87   :  { %1383 = vrot.lane.b32.xlu0 %v6583_v23, %s7122_s4 }
0x1af9   :  { %v1384_v24 = vpop.permute.xlu0 %1383 }
0x1afa   :  { %v1386_v25 = vmul.f32 %v6581_v15, %v1384_v24 }
0x1afc   :  { %1388 = vrot.lane.b32.xlu1 %v1386_v25, %s7123_s13 }
0x1b6e   :  { %v1389_v26 = vpop.permute.xlu1 %1388 }
0x1b6f   :  { %1391 = vst.msk [vmem:[#allocation3 + $0x8] sm:$0x1] %vm558_vm3, %v1389_v26  ;;  %5851 = vmatmul.mubr.msk.f32.vlgmr.msra.gmra.mrb[8].mxu1 %vm454_vm4, %v1389_v26  ;;  %v1704_v26 = vld [vmem:[#allocation2 + $0xc] sm:$0x1] }
0x1b70   :  { %6296 = vmatpush3.bf16.msra.mxu1 %v7453_v10  ;;  %5872 = vmatprep.mubr.msk.f32.mxu1 %vm7120_vm2, %v7121_v12 }
0x1b71   :  { %6297 = vmatprep.subr.bf16.mxu1 %v7119_v9 }
0x1b74   :  { %6299 = vmatpush3.bf16.msra.mxu1 %v7458_v13 }
0x1b75   :  { %6306 = vmatprep.subr.bf16.mxu1 %v7119_v9 }
0x1c42   :  { %v1461_v28 = vpop.f32.mrb[8].mxu1 }
0x1c43   :  { %v1465_v29 = vadd.f32 %v1461_v28, %v1392_v27  ;;  %v5852_v30 = vpop.f32.mrb[9].mxu1 }
0x1c45   :  { %v5371_v31 = vmul.f32 -1.442695, %v1465_v29 }
0x1c47   :  { %6584 = vpow2.f32 %v5371_v31 }
0x1c51   :  { %v6585_v32 = vpop.eup %6584 }
0x1c52   :  { %v1469_v33 = vadd.f32 1.0, %v6585_v32 }
0x1c54   :  { %6586 = vrcp.f32 %v1469_v33 }
0x1c5e   :  { %v6587_v34 = vpop.eup %6586 }
0x1c5f   :  { %v1472_v35 = vmul.f32 2.0, %v6587_v34  ;;  %v1474_v39 = vmul.f32 %v6587_v34, %v1380_v22 }
0x1c61   :  { %v5372_v36 = vadd.f32 -1.0, %v1472_v35 }
0x1c63   :  { %1476 = vrot.lane.b32.xlu0 %v5372_v36, %s7122_s4 }
0x1cd5   :  { %v1477_v37 = vpop.permute.xlu0 %1476 }
0x1cd6   :  { %v1479_v38 = vmul.f32 %v6587_v34, %v1477_v37 }
0x1cd8   :  { %1481 = vrot.lane.b32.xlu1 %v1479_v38, %s7123_s13 }
0x1d4a   :  { %v1482_v40 = vpop.permute.xlu1 %1481 }
0x1d4b   :  { %v1484_v41 = vadd.f32 %v1482_v40, %v1474_v39 }
0x1d4d   :  { %6588 = vtanh.f32 %v1484_v41 }
0x1d57   :  { %v6589_v42 = vpop.eup %6588 }
0x1d58   :  { %1487 = vrot.lane.b32.xlu0 %v6589_v42, %s7122_s4 }
0x1dca   :  { %v1488_v43 = vpop.permute.xlu0 %1487 }
0x1dcb   :  { %v1490_v44 = vmul.f32 %v6587_v34, %v1488_v43 }
0x1dcd   :  { %1492 = vrot.lane.b32.xlu1 %v1490_v44, %s7123_s13 }
0x1e3f   :  { %v1493_v45 = vpop.permute.xlu1 %1492 }
0x1e40   :  { %1495 = vst.msk [vmem:[#allocation3 + $0x9] sm:$0x1] %vm558_vm3, %v1493_v45  ;;  %5862 = vmatmul.mubr.msk.f32.vlgmr.msra.gmra.mrb[14].mxu0 %vm454_vm4, %v1493_v45  ;;  %v1808_v45 = vld [vmem:[#allocation2 + $0xd] sm:$0x1] }
0x1e41   :  { %6302 = vmatpush3.bf16.msra.mxu0 %v7453_v10  ;;  %5883 = vmatprep.mubr.msk.f32.mxu0 %vm7120_vm2, %v7121_v12 }
0x1e42   :  { %6303 = vmatprep.subr.bf16.mxu0 %v7119_v9 }
0x1e45   :  { %6305 = vmatpush3.bf16.msra.mxu0 %v7458_v13 }
0x1e46   :  { %6312 = vmatprep.subr.bf16.mxu0 %v7119_v9 }
0x1f13   :  { %v1565_v47 = vpop.f32.mrb[14].mxu0 }
0x1f14   :  { %v1569_v48 = vadd.f32 %v1565_v47, %v1496_v46  ;;  %v5863_v49 = vpop.f32.mrb[15].mxu0 }
0x1f16   :  { %v5374_v50 = vmul.f32 -1.442695, %v1569_v48 }
0x1f18   :  { %6590 = vpow2.f32 %v5374_v50 }
0x1f22   :  { %v6591_v51 = vpop.eup %6590 }
0x1f23   :  { %v1573_v52 = vadd.f32 1.0, %v6591_v51 }
0x1f25   :  { %6592 = vrcp.f32 %v1573_v52 }
0x1f2f   :  { %v6593_v53 = vpop.eup %6592 }
0x1f30   :  { %v1576_v54 = vmul.f32 2.0, %v6593_v53  ;;  %v1578_v58 = vmul.f32 %v6593_v53, %v1484_v41 }
0x1f32   :  { %v5375_v55 = vadd.f32 -1.0, %v1576_v54 }
0x1f34   :  { %1580 = vrot.lane.b32.xlu0 %v5375_v55, %s7122_s4 }
0x1fa6   :  { %v1581_v56 = vpop.permute.xlu0 %1580 }
0x1fa7   :  { %v1583_v57 = vmul.f32 %v6593_v53, %v1581_v56 }
0x1fa9   :  { %1585 = vrot.lane.b32.xlu1 %v1583_v57, %s7123_s13 }
0x201b   :  { %v1586_v59 = vpop.permute.xlu1 %1585 }
0x201c   :  { %v1588_v60 = vadd.f32 %v1586_v59, %v1578_v58 }
0x201e   :  { %6594 = vtanh.f32 %v1588_v60 }
0x2028   :  { %v6595_v61 = vpop.eup %6594 }
0x2029   :  { %1591 = vrot.lane.b32.xlu0 %v6595_v61, %s7122_s4 }
0x209b   :  { %v1592_v62 = vpop.permute.xlu0 %1591 }
0x209c   :  { %v1594_v63 = vmul.f32 %v6593_v53, %v1592_v62  ;;  %v1912_v62 = vld [vmem:[#allocation2 + $0xe] sm:$0x1] }
0x209e   :  { %1596 = vrot.lane.b32.xlu1 %v1594_v63, %s7123_s13 }
0x2110   :  { %v1597_v0 = vpop.permute.xlu1 %1596 }
0x2111   :  { %1599 = vst.msk [vmem:[#allocation3 + $0xa] sm:$0x1] %vm558_vm3, %v1597_v0  ;;  %5873 = vmatmul.mubr.msk.f32.vlgmr.msra.gmra.mrb[10].mxu1 %vm454_vm4, %v1597_v0 }
0x2112   :  { %6308 = vmatpush3.bf16.msra.mxu1 %v7453_v10  ;;  %5894 = vmatprep.mubr.msk.f32.mxu1 %vm7120_vm2, %v7121_v12 }
0x2113   :  { %6309 = vmatprep.subr.bf16.mxu1 %v7119_v9 }
0x2116   :  { %6311 = vmatpush3.bf16.msra.mxu1 %v7458_v13 }
0x2117   :  { %6318 = vmatprep.subr.bf16.mxu1 %v7119_v9 }
0x21e4   :  { %v1669_v2 = vpop.f32.mrb[10].mxu1 }
0x21e5   :  { %v1673_v3 = vadd.f32 %v1669_v2, %v1600_v1  ;;  %v5874_v6 = vpop.f32.mrb[11].mxu1 }
0x21e7   :  { %v5377_v7 = vmul.f32 -1.442695, %v1673_v3 }
0x21e9   :  { %6596 = vpow2.f32 %v5377_v7 }
0x21f3   :  { %v6597_v8 = vpop.eup %6596 }
0x21f4   :  { %v1677_v11 = vadd.f32 1.0, %v6597_v8 }
0x21f6   :  { %6598 = vrcp.f32 %v1677_v11 }
0x2200   :  { %v6599_v14 = vpop.eup %6598 }
0x2201   :  { %v1680_v15 = vmul.f32 2.0, %v6599_v14  ;;  %v1682_v19 = vmul.f32 %v6599_v14, %v1588_v60 }
0x2203   :  { %v5378_v16 = vadd.f32 -1.0, %v1680_v15 }
0x2205   :  { %1684 = vrot.lane.b32.xlu0 %v5378_v16, %s7122_s4 }
0x2277   :  { %v1685_v17 = vpop.permute.xlu0 %1684 }
0x2278   :  { %v1687_v18 = vmul.f32 %v6599_v14, %v1685_v17 }
0x227a   :  { %1689 = vrot.lane.b32.xlu1 %v1687_v18, %s7123_s13 }
0x22ec   :  { %v1690_v20 = vpop.permute.xlu1 %1689 }
0x22ed   :  { %v1692_v21 = vadd.f32 %v1690_v20, %v1682_v19 }
0x22ef   :  { %6600 = vtanh.f32 %v1692_v21 }
0x22f9   :  { %v6601_v22 = vpop.eup %6600 }
0x22fa   :  { %1695 = vrot.lane.b32.xlu0 %v6601_v22, %s7122_s4  ;;  %v2016_v22 = vld [vmem:[#allocation2 + $0xf] sm:$0x1] }
0x236c   :  { %v1696_v23 = vpop.permute.xlu0 %1695 }
0x236d   :  { %v1698_v24 = vmul.f32 %v6599_v14, %v1696_v23 }
0x236f   :  { %1700 = vrot.lane.b32.xlu1 %v1698_v24, %s7123_s13 }
0x23e1   :  { %v1701_v25 = vpop.permute.xlu1 %1700 }
0x23e2   :  { %1703 = vst.msk [vmem:[#allocation3 + $0xb] sm:$0x1] %vm558_vm3, %v1701_v25  ;;  %5884 = vmatmul.mubr.msk.f32.vlgmr.msra.gmra.mrb[16].mxu0 %vm454_vm4, %v1701_v25 }
0x23e3   :  { %6314 = vmatpush3.bf16.msra.mxu0 %v7453_v10  ;;  %5905 = vmatprep.mubr.msk.f32.mxu0 %vm7120_vm2, %v7121_v12 }
0x23e4   :  { %6315 = vmatprep.subr.bf16.mxu0 %v7119_v9 }
0x23e7   :  { %6317 = vmatpush3.bf16.msra.mxu0 %v7458_v13 }
0x24b5   :  { %v1773_v27 = vpop.f32.mrb[16].mxu0 }
0x24b6   :  { %v1777_v28 = vadd.f32 %v1773_v27, %v1704_v26  ;;  %v5885_v29 = vpop.f32.mrb[17].mxu0 }
0x24b8   :  { %v5380_v30 = vmul.f32 -1.442695, %v1777_v28 }
0x24ba   :  { %6602 = vpow2.f32 %v5380_v30 }
0x24c4   :  { %v6603_v31 = vpop.eup %6602 }
0x24c5   :  { %v1781_v32 = vadd.f32 1.0, %v6603_v31 }
0x24c7   :  { %6604 = vrcp.f32 %v1781_v32 }
0x24d1   :  { %v6605_v33 = vpop.eup %6604 }
0x24d2   :  { %v1784_v34 = vmul.f32 2.0, %v6605_v33  ;;  %v1786_v38 = vmul.f32 %v6605_v33, %v1692_v21 }
0x24d4   :  { %v5381_v35 = vadd.f32 -1.0, %v1784_v34 }
0x24d6   :  { %1788 = vrot.lane.b32.xlu0 %v5381_v35, %s7122_s4 }
0x2548   :  { %v1789_v36 = vpop.permute.xlu0 %1788 }
0x2549   :  { %v1791_v37 = vmul.f32 %v6605_v33, %v1789_v36 }
0x254b   :  { %1793 = vrot.lane.b32.xlu1 %v1791_v37, %s7123_s13 }
0x25bd   :  { %v1794_v39 = vpop.permute.xlu1 %1793 }
0x25be   :  { %v1796_v40 = vadd.f32 %v1794_v39, %v1786_v38 }
0x25c0   :  { %6606 = vtanh.f32 %v1796_v40 }
0x25ca   :  { %v6607_v41 = vpop.eup %6606 }
0x25cb   :  { %1799 = vrot.lane.b32.xlu0 %v6607_v41, %s7122_s4 }
0x263d   :  { %v1800_v42 = vpop.permute.xlu0 %1799 }
0x263e   :  { %v1802_v43 = vmul.f32 %v6605_v33, %v1800_v42  ;;  %v2120_v42 = vld [vmem:[#allocation3] sm:$0xff] }
0x2640   :  { %1804 = vrot.lane.b32.xlu1 %v1802_v43, %s7123_s13 }
0x26b2   :  { %v1805_v44 = vpop.permute.xlu1 %1804 }
0x26b3   :  { %1807 = vst.msk [vmem:[#allocation3 + $0xc] sm:$0x1] %vm558_vm3, %v1805_v44  ;;  %5895 = vmatmul.mubr.msk.f32.vlgmr.msra.gmra.mrb[12].mxu1 %vm454_vm4, %v1805_v44  ;;  %v6726_v44 = vld [vmem:[#allocation5 + $0x8] sm:$0xff] }
0x26b4   :  { %6320 = vmatpush3.bf16.msra.mxu1 %v7453_v10  ;;  %5916 = vmatprep.mubr.msk.f32.mxu1 %vm7120_vm2, %v7121_v12 }
0x26b5   :  { %6321 = vmatprep.subr.bf16.mxu1 %v7119_v9 }
0x26b8   :  { %6323 = vmatpush3.bf16.msra.mxu1 %v7458_v13 }
0x2786   :  { %v1877_v46 = vpop.f32.mrb[12].mxu1 }
0x2787   :  { %v1881_v47 = vadd.f32 %v1877_v46, %v1808_v45  ;;  %v5896_v48 = vpop.f32.mrb[13].mxu1  ;;  %v6727_v45 = vld [vmem:[#allocation5] sm:$0xff] }
0x2788   :  { %v2209_v46 = vld [vmem:[#allocation14] sm:$0xff] }
0x2789   :  { %v5383_v49 = vmul.f32 -1.442695, %v1881_v47  ;;  %v2210_v47 = vld [vmem:[#allocation14 + $0x8] sm:$0xff] }
0x278a   :  { %v6328_v48 = vpack.c.bf16 %v2210_v47, %v2209_v46 }
0x278b   :  { %6608 = vpow2.f32 %v5383_v49  ;;  %v2211_v49 = vld [vmem:[#allocation14 + $0x10] sm:$0xff] }
0x278c   :  { %6329 = vmatprep.subr.bf16.mxu1 %v6328_v48 }
0x2795   :  { %v6609_v50 = vpop.eup %6608 }
0x2796   :  { %v1885_v51 = vadd.f32 1.0, %v6609_v50  ;;  %v2212_v50 = vld [vmem:[#allocation14 + $0x18] sm:$0xff] }
0x2798   :  { %6610 = vrcp.f32 %v1885_v51  ;;  %v6332_v51 = vpack.c.bf16 %v2212_v50, %v2211_v49 }
0x27a2   :  { %v6611_v52 = vpop.eup %6610 }
0x27a3   :  { %v1888_v53 = vmul.f32 2.0, %v6611_v52  ;;  %v1890_v56 = vmul.f32 %v6611_v52, %v1796_v40 }
0x27a5   :  { %v5384_v54 = vadd.f32 -1.0, %v1888_v53 }
0x27a7   :  { %1892 = vrot.lane.b32.xlu0 %v5384_v54, %s7122_s4 }
0x2819   :  { %v1893_v10 = vpop.permute.xlu0 %1892 }
0x281a   :  { %v1895_v55 = vmul.f32 %v6611_v52, %v1893_v10 }
0x281c   :  { %1897 = vrot.lane.b32.xlu1 %v1895_v55, %s7123_s13 }
0x288e   :  { %v1898_v13 = vpop.permute.xlu1 %1897 }
0x288f   :  { %v1900_v57 = vadd.f32 %v1898_v13, %v1890_v56 }
0x2891   :  { %6612 = vtanh.f32 %v1900_v57 }
0x289b   :  { %v6613_v58 = vpop.eup %6612 }
0x289c   :  { %1903 = vrot.lane.b32.xlu0 %v6613_v58, %s7122_s4 }
0x290e   :  { %v1904_v59 = vpop.permute.xlu0 %1903 }
0x290f   :  { %v1906_v60 = vmul.f32 %v6611_v52, %v1904_v59  ;;  %v5393_v52 = vld [vmem:[#allocation8] ss:$0 sm:$0xff]  ;;  %v2384_v59 = vld [vmem:[#allocation16] sm:$0xff] }
0x2911   :  { %1908 = vrot.lane.b32.xlu1 %v1906_v60, %s7123_s13  ;;  %v2385_v60 = vld [vmem:[#allocation16 + $0x8] sm:$0xff] }
0x2983   :  { %v1909_v61 = vpop.permute.xlu1 %1908 }
0x2984   :  { %1911 = vst.msk [vmem:[#allocation3 + $0xd] sm:$0x1] %vm558_vm3, %v1909_v61  ;;  %5906 = vmatmul.mubr.msk.f32.vlgmr.msra.gmra.mrb[18].mxu0 %vm454_vm4, %v1909_v61  ;;  %v7661_v61 = vpack.c.bf16 %v2385_v60, %v2384_v59 }
0x2985   :  { %5923 = vmatprep.mubr.msk.f32.mxu0 %vm353_vm1, %v7448_v5 }
0x2a57   :  { %v1981_v63 = vpop.f32.mrb[18].mxu0 }
0x2a58   :  { %v1985_v0 = vadd.f32 %v1981_v63, %v1912_v62  ;;  %v5907_v1 = vpop.f32.mrb[19].mxu0  ;;  %v2386_v62 = vld [vmem:[#allocation16 + $0x10] sm:$0xff]  ;;  %v2387_v63 = vld [vmem:[#allocation16 + $0x18] sm:$0xff] }
0x2a59   :  { %v5394_v1 = vld [vmem:[#allocation17] ss:$0 sm:$0xff] }
0x2a5a   :  { %v5386_v2 = vmul.f32 -1.442695, %v1985_v0  ;;  %v7665_v0 = vpack.c.bf16 %v2387_v63, %v2386_v62 }
0x2a5c   :  { %6614 = vpow2.f32 %v5386_v2 }
0x2a66   :  { %v6615_v3 = vpop.eup %6614 }
0x2a67   :  { %v1989_v6 = vadd.f32 1.0, %v6615_v3 }
0x2a69   :  { %6616 = vrcp.f32 %v1989_v6 }
0x2a73   :  { %v6617_v7 = vpop.eup %6616 }
0x2a74   :  { %v1992_v8 = vmul.f32 2.0, %v6617_v7  ;;  %v1994_v16 = vmul.f32 %v6617_v7, %v1900_v57 }
0x2a76   :  { %v5387_v11 = vadd.f32 -1.0, %v1992_v8 }
0x2a78   :  { %1996 = vrot.lane.b32.xlu0 %v5387_v11, %s7122_s4 }
0x2aea   :  { %v1997_v14 = vpop.permute.xlu0 %1996 }
0x2aeb   :  { %v1999_v15 = vmul.f32 %v6617_v7, %v1997_v14 }
0x2aed   :  { %2001 = vrot.lane.b32.xlu1 %v1999_v15, %s7123_s13 }
0x2b5f   :  { %v2002_v5 = vpop.permute.xlu1 %2001 }
0x2b60   :  { %v2004_v17 = vadd.f32 %v2002_v5, %v1994_v16  ;;  %v6728_v5 = vld [vmem:[%s7983_s28] ss:$0 sm:$0xff] }
0x2b62   :  { %6618 = vtanh.f32 %v2004_v17 }
0x2b6c   :  { %v6619_v18 = vpop.eup %6618 }
0x2b6d   :  { %2007 = vrot.lane.b32.xlu0 %v6619_v18, %s7122_s4 }
0x2bdf   :  { %v2008_v19 = vpop.permute.xlu0 %2007 }
0x2be0   :  { %v2010_v20 = vmul.f32 %v6617_v7, %v2008_v19 }
0x2be2   :  { %2012 = vrot.lane.b32.xlu1 %v2010_v20, %s7123_s13 }
0x2c54   :  { %v2013_v21 = vpop.permute.xlu1 %2012 }
0x2c55   :  { %2015 = vst.msk [vmem:[#allocation3 + $0xe] sm:$0x1] %vm558_vm3, %v2013_v21  ;;  %5917 = vmatmul.mubr.msk.f32.vlgmr.msra.gmra.mrb[14].mxu1 %vm454_vm4, %v2013_v21 }
0x2c56   :  { %6331 = vmatpush3.bf16.msra.mxu1 %v6328_v48 }
0x2c57   :  { %6333 = vmatprep.subr.bf16.mxu1 %v6332_v51 }
0x2c5a   :  { %6335 = vmatpush3.bf16.msra.mxu1 %v6332_v51 }
0x2c5b   :  { %6346 = vmatprep.subr.bf16.mxu1 %v7119_v9 }
0x2d28   :  { %v2085_v23 = vpop.f32.mrb[14].mxu1 }
0x2d29   :  { %v2089_v24 = vadd.f32 %v2085_v23, %v2016_v22  ;;  %v5918_v25 = vpop.f32.mrb[15].mxu1 }
0x2d2b   :  { %v5389_v26 = vmul.f32 -1.442695, %v2089_v24 }
0x2d2d   :  { %6620 = vpow2.f32 %v5389_v26 }
0x2d37   :  { %v6621_v27 = vpop.eup %6620 }
0x2d38   :  { %v2093_v28 = vadd.f32 1.0, %v6621_v27 }
0x2d3a   :  { %6622 = vrcp.f32 %v2093_v28 }
0x2d44   :  { %v6623_v29 = vpop.eup %6622 }
0x2d45   :  { %v2096_v30 = vmul.f32 2.0, %v6623_v29  ;;  %v2098_v34 = vmul.f32 %v6623_v29, %v2004_v17 }
0x2d47   :  { %v5390_v31 = vadd.f32 -1.0, %v2096_v30 }
0x2d49   :  { %2100 = vrot.lane.b32.xlu0 %v5390_v31, %s7122_s4 }
0x2dbb   :  { %v2101_v32 = vpop.permute.xlu0 %2100 }
0x2dbc   :  { %v2103_v33 = vmul.f32 %v6623_v29, %v2101_v32 }
0x2dbe   :  { %2105 = vrot.lane.b32.xlu1 %v2103_v33, %s7123_s13 }
0x2e30   :  { %v2106_v35 = vpop.permute.xlu1 %2105 }
0x2e31   :  { %v2108_v36 = vadd.f32 %v2106_v35, %v2098_v34 }
0x2e33   :  { %6624 = vtanh.f32 %v2108_v36 }
0x2e3d   :  { %v6625_v37 = vpop.eup %6624 }
0x2e3e   :  { %2111 = vrot.lane.b32.xlu0 %v6625_v37, %s7122_s4 }
0x2eb0   :  { %v2112_v38 = vpop.permute.xlu0 %2111 }
0x2eb1   :  { %v2114_v39 = vmul.f32 %v6623_v29, %v2112_v38 }
0x2eb3   :  { %2116 = vrot.lane.b32.xlu1 %v2114_v39, %s7123_s13 }
0x2f25   :  { %v2117_v40 = vpop.permute.xlu1 %2116 }
0x2f26   :  { %2119 = vst.msk [vmem:[#allocation3 + $0xf] sm:$0x1] %vm558_vm3, %v2117_v40 }
0x2f2d   :  { %v2121_v41 = vld [vmem:[#allocation3 + $0x8] sm:$0xff] }
0x2f2e   :  { %v6324_v43 = vpack.c.bf16 %v2121_v41, %v2120_v42 }
0x2f30   :  { %6325 = vmatprep.subr.bf16.mxu0 %v6324_v43 }
0x2f31   :  { %6327 = vmatpush3.bf16.msra.mxu0 %v6324_v43 }
0x2f34   :  { %5924 = vmatmul.mubr.msk.f32.vlgmr.msra.gmra.mrb[20].mxu0 %vm353_vm1, %v6726_v44 }
0x2f35   :  { %5941 = vmatprep.mubr.msk.f32.mxu0 %vm353_vm1, %v6727_v45 }
0x3007   :  { %v5925_v53 = vpop.f32.mrb[20].mxu0 }
0x3008   :  { %v2198_v54 = vsub.f32 %v5925_v53, %v2121_v41  ;;  %v2188_v10 = vpop.f32.mrb[21].mxu0 }
0x3009   :  { %v2197_v55 = vsub.f32 %v2188_v10, %v2120_v42 }
0x300a   :  { %v2206_v56 = vmul.f32 %v5393_v52, %v2198_v54 }
0x300b   :  { %v2205_v13 = vmul.f32 %v5393_v52, %v2197_v55 }
0x300c   :  { %v2208_v58 = vadd.f32 %v2206_v56, %v2121_v41 }
0x300d   :  { %v2207_v57 = vadd.f32 %v2205_v13, %v2120_v42 }
0x300f   :  { %5934 = vmatprep.mubr.msk.f32.mxu1 %vm454_vm4, %v2207_v57 }
0x3010   :  { %5935 = vmatmul.mubr.msk.f32.vlgmr.msra.gmra.mrb[16].mxu1 %vm454_vm4, %v2208_v58 }
0x3011   :  { %5963 = vmatprep.mubr.msk.f32.mxu1 %vm7120_vm2, %v7121_v12  ;;  %6348 = vmatpush3.bf16.msra.mxu1 %v7661_v61 }
0x3012   :  { %6349 = vmatprep.subr.bf16.mxu1 %v7119_v9 }
0x3015   :  { %6351 = vmatpush3.bf16.msra.mxu1 %v7665_v0 }
0x3016   :  { %6358 = vmatprep.subr.bf16.mxu1 %v7119_v9 }
0x30e3   :  { %v5936_v2 = vpop.f32.mrb[16].mxu1 }
0x30e4   :  { %v2298_v3 = vadd.f32 %v5936_v2, %v5394_v1  ;;  %v2292_v6 = vpop.f32.mrb[17].mxu1 }
0x30e5   :  { %v2293_v7 = vadd.f32 %v5394_v1, %v2292_v6 }
0x30e7   :  { %v6336_v8 = vpack.c.bf16 %v2298_v3, %v2293_v7 }
0x30e9   :  { %6337 = vmatprep.subr.bf16.mxu0 %v6336_v8 }
0x30ea   :  { %6339 = vmatpush3.bf16.msra.mxu0 %v6336_v8 }
0x30eb   :  { %6340 = vmatprep.subr.bf16.mxu0 %v7119_v9 }
0x30ed   :  { %5942 = vmatmul.mubr.msk.f32.vlgmr.msra.gmra.mrb[22].mxu0 %vm353_vm1, %v6726_v44 }
0x30ee   :  { %6342 = vmatpush3.bf16.msra.mxu0 %v7661_v61  ;;  %5952 = vmatprep.mubr.msk.f32.mxu0 %vm7120_vm2, %v7121_v12 }
0x30ef   :  { %6343 = vmatprep.subr.bf16.mxu0 %v7119_v9 }
0x30f2   :  { %6345 = vmatpush3.bf16.msra.mxu0 %v7665_v0 }
0x30f3   :  { %6352 = vmatprep.subr.bf16.mxu0 %v7119_v9 }
0x30f5   :  { %5953 = vmatmul.mubr.f32.vlgmr.msra.gmra.mrb[24].mxu0 %v7121_v12 }
0x30f6   :  { %6354 = vmatpush3.bf16.msra.mxu0 %v7661_v61  ;;  %5974 = vmatprep.mubr.msk.f32.mxu0 %vm7120_vm2, %v7121_v12 }
0x30f7   :  { %6355 = vmatprep.subr.bf16.mxu0 %v7119_v9 }
0x30fa   :  { %6357 = vmatpush3.bf16.msra.mxu0 %v7665_v0 }
0x30fb   :  { %6364 = vmatprep.subr.bf16.mxu0 %v7119_v9 }
0x31c0   :  { %v5943_v11 = vpop.f32.mrb[22].mxu0 }
0x31c1   :  { %v2377_v14 = vsub.f32 %v5943_v11, %v2298_v3  ;;  %v2367_v15 = vpop.f32.mrb[23].mxu0 }
0x31c2   :  { %v2376_v16 = vsub.f32 %v2367_v15, %v2293_v7 }
0x31c3   :  { %v2379_v17 = vmul.f32 %v6728_v5, %v2377_v14 }
0x31c4   :  { %v2378_v18 = vmul.f32 %v6728_v5, %v2376_v16 }
0x31c5   :  { %v2381_v19 = vadd.f32 %v2379_v17, %v2298_v3 }
0x31c6   :  { %v2380_v20 = vadd.f32 %v2378_v18, %v2293_v7 }
0x31c7   :  { %2383 = vst [vmem:[#allocation2 + $0x8] sm:$0xff] %v2381_v19 }
0x31c8   :  { %2382 = vst [vmem:[#allocation2] sm:$0xff] %v2380_v20  ;;  %v2455_v21 = vpop.f32.mrb[24].mxu0 }
0x31c9   :  { %v5954_v22 = vpop.f32.mrb[25].mxu0 }
0x31cf   :  { %v2388_v23 = vld [vmem:[#allocation2] sm:$0x1]  ;;  %v2490_v40 = vld [vmem:[#allocation2 + $0x1] sm:$0x1]  ;;  %v2594_v57 = vld [vmem:[#allocation2 + $0x2] sm:$0x1] }
0x31d0   :  { %v2459_v24 = vadd.f32 %v2455_v21, %v2388_v23  ;;  %v2698_v19 = vld [vmem:[#allocation2 + $0x3] sm:$0x1] }
0x31d2   :  { %v5399_v25 = vmul.f32 -1.442695, %v2459_v24 }
0x31d4   :  { %6626 = vpow2.f32 %v5399_v25 }
0x31de   :  { %v6627_v26 = vpop.eup %6626 }
0x31df   :  { %v2463_v27 = vadd.f32 1.0, %v6627_v26 }
0x31e1   :  { %6628 = vrcp.f32 %v2463_v27 }
0x31eb   :  { %v6629_v28 = vpop.eup %6628 }
0x31ec   :  { %v2466_v29 = vmul.f32 2.0, %v6629_v28  ;;  %v2468_v33 = vmul.f32 0.0, %v6629_v28 }
0x31ee   :  { %v5400_v30 = vadd.f32 -1.0, %v2466_v29 }
0x31f0   :  { %2470 = vrot.lane.b32.xlu0 %v5400_v30, %s7122_s4 }
0x3262   :  { %v2471_v31 = vpop.permute.xlu0 %2470 }
0x3263   :  { %v2473_v32 = vmul.f32 %v6629_v28, %v2471_v31 }
0x3265   :  { %2475 = vrot.lane.b32.xlu1 %v2473_v32, %s7123_s13 }
0x32d7   :  { %v2476_v34 = vpop.permute.xlu1 %2475 }
0x32d8   :  { %v2478_v35 = vadd.f32 %v2476_v34, %v2468_v33 }
0x32da   :  { %6630 = vtanh.f32 %v2478_v35 }
0x32e4   :  { %v6631_v36 = vpop.eup %6630 }
0x32e5   :  { %2481 = vrot.lane.b32.xlu0 %v6631_v36, %s7122_s4 }
0x3357   :  { %v2482_v37 = vpop.permute.xlu0 %2481 }
0x3358   :  { %v2484_v38 = vmul.f32 %v6629_v28, %v2482_v37 }
0x335a   :  { %2486 = vrot.lane.b32.xlu1 %v2484_v38, %s7123_s13  ;;  %v2802_v38 = vld [vmem:[#allocation2 + $0x4] sm:$0x1] }
0x33cc   :  { %v2487_v39 = vpop.permute.xlu1 %2486 }
0x33cd   :  { %2489 = vst.msk [vmem:[#allocation3] sm:$0x1] %vm558_vm3, %v2487_v39  ;;  %5964 = vmatmul.mubr.msk.f32.vlgmr.msra.gmra.mrb[18].mxu1 %vm454_vm4, %v2487_v39 }
0x33ce   :  { %6360 = vmatpush3.bf16.msra.mxu1 %v7661_v61  ;;  %5985 = vmatprep.mubr.msk.f32.mxu1 %vm7120_vm2, %v7121_v12 }
0x33cf   :  { %6361 = vmatprep.subr.bf16.mxu1 %v7119_v9 }
0x33d2   :  { %6363 = vmatpush3.bf16.msra.mxu1 %v7665_v0 }
0x33d3   :  { %6370 = vmatprep.subr.bf16.mxu1 %v7119_v9 }
0x34a0   :  { %v2559_v41 = vpop.f32.mrb[18].mxu1 }
0x34a1   :  { %v2563_v42 = vadd.f32 %v2559_v41, %v2490_v40  ;;  %v5965_v43 = vpop.f32.mrb[19].mxu1 }
0x34a3   :  { %v5402_v44 = vmul.f32 -1.442695, %v2563_v42 }
0x34a5   :  { %6632 = vpow2.f32 %v5402_v44 }
0x34af   :  { %v6633_v45 = vpop.eup %6632 }
0x34b0   :  { %v2567_v46 = vadd.f32 1.0, %v6633_v45 }
0x34b2   :  { %6634 = vrcp.f32 %v2567_v46 }
0x34bc   :  { %v6635_v47 = vpop.eup %6634 }
0x34bd   :  { %v2570_v48 = vmul.f32 2.0, %v6635_v47  ;;  %v2572_v52 = vmul.f32 %v6635_v47, %v2478_v35 }
0x34bf   :  { %v5403_v49 = vadd.f32 -1.0, %v2570_v48 }
0x34c1   :  { %2574 = vrot.lane.b32.xlu0 %v5403_v49, %s7122_s4 }
0x3533   :  { %v2575_v50 = vpop.permute.xlu0 %2574 }
0x3534   :  { %v2577_v51 = vmul.f32 %v6635_v47, %v2575_v50 }
0x3536   :  { %2579 = vrot.lane.b32.xlu1 %v2577_v51, %s7123_s13 }
0x35a8   :  { %v2580_v53 = vpop.permute.xlu1 %2579 }
0x35a9   :  { %v2582_v54 = vadd.f32 %v2580_v53, %v2572_v52 }
0x35ab   :  { %6636 = vtanh.f32 %v2582_v54 }
0x35b5   :  { %v6637_v10 = vpop.eup %6636 }
0x35b6   :  { %2585 = vrot.lane.b32.xlu0 %v6637_v10, %s7122_s4 }
0x3628   :  { %v2586_v55 = vpop.permute.xlu0 %2585 }
0x3629   :  { %v2588_v56 = vmul.f32 %v6635_v47, %v2586_v55 }
0x362b   :  { %2590 = vrot.lane.b32.xlu1 %v2588_v56, %s7123_s13  ;;  %v2906_v56 = vld [vmem:[#allocation2 + $0x5] sm:$0x1] }
0x369d   :  { %v2591_v13 = vpop.permute.xlu1 %2590 }
0x369e   :  { %2593 = vst.msk [vmem:[#allocation3 + $0x1] sm:$0x1] %vm558_vm3, %v2591_v13  ;;  %5975 = vmatmul.mubr.msk.f32.vlgmr.msra.gmra.mrb[26].mxu0 %vm454_vm4, %v2591_v13 }
0x369f   :  { %6366 = vmatpush3.bf16.msra.mxu0 %v7661_v61  ;;  %5996 = vmatprep.mubr.msk.f32.mxu0 %vm7120_vm2, %v7121_v12 }
0x36a0   :  { %6367 = vmatprep.subr.bf16.mxu0 %v7119_v9 }
0x36a3   :  { %6369 = vmatpush3.bf16.msra.mxu0 %v7665_v0 }
0x36a4   :  { %6376 = vmatprep.subr.bf16.mxu0 %v7119_v9 }
0x3771   :  { %v2663_v58 = vpop.f32.mrb[26].mxu0 }
0x3772   :  { %v2667_v59 = vadd.f32 %v2663_v58, %v2594_v57  ;;  %v5976_v60 = vpop.f32.mrb[27].mxu0 }
0x3774   :  { %v5405_v62 = vmul.f32 -1.442695, %v2667_v59 }
0x3776   :  { %6638 = vpow2.f32 %v5405_v62 }
0x3780   :  { %v6639_v63 = vpop.eup %6638 }
0x3781   :  { %v2671_v1 = vadd.f32 1.0, %v6639_v63 }
0x3783   :  { %6640 = vrcp.f32 %v2671_v1 }
0x378d   :  { %v6641_v2 = vpop.eup %6640 }
0x378e   :  { %v2674_v3 = vmul.f32 2.0, %v6641_v2  ;;  %v2676_v11 = vmul.f32 %v6641_v2, %v2582_v54 }
0x3790   :  { %v5406_v6 = vadd.f32 -1.0, %v2674_v3 }
0x3792   :  { %2678 = vrot.lane.b32.xlu0 %v5406_v6, %s7122_s4 }
0x3804   :  { %v2679_v7 = vpop.permute.xlu0 %2678 }
0x3805   :  { %v2681_v8 = vmul.f32 %v6641_v2, %v2679_v7 }
0x3807   :  { %2683 = vrot.lane.b32.xlu1 %v2681_v8, %s7123_s13 }
0x3879   :  { %v2684_v14 = vpop.permute.xlu1 %2683 }
0x387a   :  { %v2686_v15 = vadd.f32 %v2684_v14, %v2676_v11 }
0x387c   :  { %6642 = vtanh.f32 %v2686_v15 }
0x3886   :  { %v6643_v16 = vpop.eup %6642 }
0x3887   :  { %2689 = vrot.lane.b32.xlu0 %v6643_v16, %s7122_s4 }
0x38f9   :  { %v2690_v5 = vpop.permute.xlu0 %2689 }
0x38fa   :  { %v2692_v17 = vmul.f32 %v6641_v2, %v2690_v5 }
0x38fc   :  { %2694 = vrot.lane.b32.xlu1 %v2692_v17, %s7123_s13  ;;  %v3010_v17 = vld [vmem:[#allocation2 + $0x6] sm:$0x1] }
0x396e   :  { %v2695_v18 = vpop.permute.xlu1 %2694 }
0x396f   :  { %2697 = vst.msk [vmem:[#allocation3 + $0x2] sm:$0x1] %vm558_vm3, %v2695_v18  ;;  %5986 = vmatmul.mubr.msk.f32.vlgmr.msra.gmra.mrb[20].mxu1 %vm454_vm4, %v2695_v18 }
0x3970   :  { %6372 = vmatpush3.bf16.msra.mxu1 %v7661_v61  ;;  %6007 = vmatprep.mubr.msk.f32.mxu1 %vm7120_vm2, %v7121_v12 }
0x3971   :  { %6373 = vmatprep.subr.bf16.mxu1 %v7119_v9 }
0x3974   :  { %6375 = vmatpush3.bf16.msra.mxu1 %v7665_v0 }
0x3975   :  { %6382 = vmatprep.subr.bf16.mxu1 %v7119_v9 }
0x3a42   :  { %v2767_v20 = vpop.f32.mrb[20].mxu1 }
0x3a43   :  { %v2771_v21 = vadd.f32 %v2767_v20, %v2698_v19  ;;  %v5987_v22 = vpop.f32.mrb[21].mxu1 }
0x3a45   :  { %v5408_v23 = vmul.f32 -1.442695, %v2771_v21 }
0x3a47   :  { %6644 = vpow2.f32 %v5408_v23 }
0x3a51   :  { %v6645_v24 = vpop.eup %6644 }
0x3a52   :  { %v2775_v25 = vadd.f32 1.0, %v6645_v24 }
0x3a54   :  { %6646 = vrcp.f32 %v2775_v25 }
0x3a5e   :  { %v6647_v26 = vpop.eup %6646 }
0x3a5f   :  { %v2778_v27 = vmul.f32 2.0, %v6647_v26  ;;  %v2780_v31 = vmul.f32 %v6647_v26, %v2686_v15 }
0x3a61   :  { %v5409_v28 = vadd.f32 -1.0, %v2778_v27 }
0x3a63   :  { %2782 = vrot.lane.b32.xlu0 %v5409_v28, %s7122_s4 }
0x3ad5   :  { %v2783_v29 = vpop.permute.xlu0 %2782 }
0x3ad6   :  { %v2785_v30 = vmul.f32 %v6647_v26, %v2783_v29 }
0x3ad8   :  { %2787 = vrot.lane.b32.xlu1 %v2785_v30, %s7123_s13 }
0x3b4a   :  { %v2788_v32 = vpop.permute.xlu1 %2787 }
0x3b4b   :  { %v2790_v33 = vadd.f32 %v2788_v32, %v2780_v31 }
0x3b4d   :  { %6648 = vtanh.f32 %v2790_v33 }
0x3b57   :  { %v6649_v34 = vpop.eup %6648 }
0x3b58   :  { %2793 = vrot.lane.b32.xlu0 %v6649_v34, %s7122_s4 }
0x3bca   :  { %v2794_v35 = vpop.permute.xlu0 %2793 }
0x3bcb   :  { %v2796_v36 = vmul.f32 %v6647_v26, %v2794_v35 }
0x3bcd   :  { %2798 = vrot.lane.b32.xlu1 %v2796_v36, %s7123_s13  ;;  %v3114_v36 = vld [vmem:[#allocation2 + $0x7] sm:$0x1] }
0x3c3f   :  { %v2799_v37 = vpop.permute.xlu1 %2798 }
0x3c40   :  { %2801 = vst.msk [vmem:[#allocation3 + $0x3] sm:$0x1] %vm558_vm3, %v2799_v37  ;;  %5997 = vmatmul.mubr.msk.f32.vlgmr.msra.gmra.mrb[28].mxu0 %vm454_vm4, %v2799_v37 }
0x3c41   :  { %6378 = vmatpush3.bf16.msra.mxu0 %v7661_v61  ;;  %6018 = vmatprep.mubr.msk.f32.mxu0 %vm7120_vm2, %v7121_v12 }
0x3c42   :  { %6379 = vmatprep.subr.bf16.mxu0 %v7119_v9 }
0x3c45   :  { %6381 = vmatpush3.bf16.msra.mxu0 %v7665_v0 }
0x3c46   :  { %6388 = vmatprep.subr.bf16.mxu0 %v7119_v9 }
0x3d13   :  { %v2871_v39 = vpop.f32.mrb[28].mxu0 }
0x3d14   :  { %v2875_v40 = vadd.f32 %v2871_v39, %v2802_v38  ;;  %v5998_v41 = vpop.f32.mrb[29].mxu0 }
0x3d16   :  { %v5411_v42 = vmul.f32 -1.442695, %v2875_v40 }
0x3d18   :  { %6650 = vpow2.f32 %v5411_v42 }
0x3d22   :  { %v6651_v43 = vpop.eup %6650 }
0x3d23   :  { %v2879_v44 = vadd.f32 1.0, %v6651_v43 }
0x3d25   :  { %6652 = vrcp.f32 %v2879_v44 }
0x3d2f   :  { %v6653_v45 = vpop.eup %6652 }
0x3d30   :  { %v2882_v46 = vmul.f32 2.0, %v6653_v45  ;;  %v2884_v50 = vmul.f32 %v6653_v45, %v2790_v33 }
0x3d32   :  { %v5412_v47 = vadd.f32 -1.0, %v2882_v46 }
0x3d34   :  { %2886 = vrot.lane.b32.xlu0 %v5412_v47, %s7122_s4 }
0x3da6   :  { %v2887_v48 = vpop.permute.xlu0 %2886 }
0x3da7   :  { %v2889_v49 = vmul.f32 %v6653_v45, %v2887_v48 }
0x3da9   :  { %2891 = vrot.lane.b32.xlu1 %v2889_v49, %s7123_s13 }
0x3e1b   :  { %v2892_v51 = vpop.permute.xlu1 %2891 }
0x3e1c   :  { %v2894_v52 = vadd.f32 %v2892_v51, %v2884_v50 }
0x3e1e   :  { %6654 = vtanh.f32 %v2894_v52 }
0x3e28   :  { %v6655_v53 = vpop.eup %6654 }
0x3e29   :  { %2897 = vrot.lane.b32.xlu0 %v6655_v53, %s7122_s4 }
0x3e9b   :  { %v2898_v54 = vpop.permute.xlu0 %2897 }
0x3e9c   :  { %v2900_v10 = vmul.f32 %v6653_v45, %v2898_v54 }
0x3e9e   :  { %2902 = vrot.lane.b32.xlu1 %v2900_v10, %s7123_s13  ;;  %v3218_v10 = vld [vmem:[#allocation2 + $0x8] sm:$0x1] }
0x3f10   :  { %v2903_v55 = vpop.permute.xlu1 %2902 }
0x3f11   :  { %2905 = vst.msk [vmem:[#allocation3 + $0x4] sm:$0x1] %vm558_vm3, %v2903_v55  ;;  %6008 = vmatmul.mubr.msk.f32.vlgmr.msra.gmra.mrb[22].mxu1 %vm454_vm4, %v2903_v55 }
0x3f12   :  { %6384 = vmatpush3.bf16.msra.mxu1 %v7661_v61  ;;  %6029 = vmatprep.mubr.msk.f32.mxu1 %vm7120_vm2, %v7121_v12 }
0x3f13   :  { %6385 = vmatprep.subr.bf16.mxu1 %v7119_v9 }
0x3f16   :  { %6387 = vmatpush3.bf16.msra.mxu1 %v7665_v0 }
0x3f17   :  { %6394 = vmatprep.subr.bf16.mxu1 %v7119_v9 }
0x3fe4   :  { %v2975_v13 = vpop.f32.mrb[22].mxu1 }
0x3fe5   :  { %v2979_v57 = vadd.f32 %v2975_v13, %v2906_v56  ;;  %v6009_v58 = vpop.f32.mrb[23].mxu1 }
0x3fe7   :  { %v5414_v59 = vmul.f32 -1.442695, %v2979_v57 }
0x3fe9   :  { %6656 = vpow2.f32 %v5414_v59 }
0x3ff3   :  { %v6657_v60 = vpop.eup %6656 }
0x3ff4   :  { %v2983_v62 = vadd.f32 1.0, %v6657_v60 }
0x3ff6   :  { %6658 = vrcp.f32 %v2983_v62 }
0x4000   :  { %v6659_v63 = vpop.eup %6658 }
0x4001   :  { %v2986_v1 = vmul.f32 2.0, %v6659_v63  ;;  %v2988_v7 = vmul.f32 %v6659_v63, %v2894_v52 }
0x4003   :  { %v5415_v2 = vadd.f32 -1.0, %v2986_v1 }
0x4005   :  { %2990 = vrot.lane.b32.xlu0 %v5415_v2, %s7122_s4 }
0x4077   :  { %v2991_v3 = vpop.permute.xlu0 %2990 }
0x4078   :  { %v2993_v6 = vmul.f32 %v6659_v63, %v2991_v3 }
0x407a   :  { %2995 = vrot.lane.b32.xlu1 %v2993_v6, %s7123_s13 }
0x40ec   :  { %v2996_v8 = vpop.permute.xlu1 %2995 }
0x40ed   :  { %v2998_v11 = vadd.f32 %v2996_v8, %v2988_v7 }
0x40ef   :  { %6660 = vtanh.f32 %v2998_v11 }
0x40f9   :  { %v6661_v14 = vpop.eup %6660 }
0x40fa   :  { %3001 = vrot.lane.b32.xlu0 %v6661_v14, %s7122_s4 }
0x416c   :  { %v3002_v15 = vpop.permute.xlu0 %3001 }
0x416d   :  { %v3004_v16 = vmul.f32 %v6659_v63, %v3002_v15 }
0x416f   :  { %3006 = vrot.lane.b32.xlu1 %v3004_v16, %s7123_s13  ;;  %v3322_v16 = vld [vmem:[#allocation2 + $0x9] sm:$0x1] }
0x41e1   :  { %v3007_v5 = vpop.permute.xlu1 %3006 }
0x41e2   :  { %3009 = vst.msk [vmem:[#allocation3 + $0x5] sm:$0x1] %vm558_vm3, %v3007_v5  ;;  %6019 = vmatmul.mubr.msk.f32.vlgmr.msra.gmra.mrb[30].mxu0 %vm454_vm4, %v3007_v5 }
0x41e3   :  { %6390 = vmatpush3.bf16.msra.mxu0 %v7661_v61  ;;  %6040 = vmatprep.mubr.msk.f32.mxu0 %vm7120_vm2, %v7121_v12 }
0x41e4   :  { %6391 = vmatprep.subr.bf16.mxu0 %v7119_v9 }
0x41e7   :  { %6393 = vmatpush3.bf16.msra.mxu0 %v7665_v0 }
0x41e8   :  { %6400 = vmatprep.subr.bf16.mxu0 %v7119_v9 }
0x42b5   :  { %v3079_v18 = vpop.f32.mrb[30].mxu0 }
0x42b6   :  { %v3083_v19 = vadd.f32 %v3079_v18, %v3010_v17  ;;  %v6020_v20 = vpop.f32.mrb[31].mxu0 }
0x42b8   :  { %v5417_v21 = vmul.f32 -1.442695, %v3083_v19 }
0x42ba   :  { %6662 = vpow2.f32 %v5417_v21 }
0x42c4   :  { %v6663_v22 = vpop.eup %6662 }
0x42c5   :  { %v3087_v23 = vadd.f32 1.0, %v6663_v22 }
0x42c7   :  { %6664 = vrcp.f32 %v3087_v23 }
0x42d1   :  { %v6665_v24 = vpop.eup %6664 }
0x42d2   :  { %v3090_v25 = vmul.f32 2.0, %v6665_v24  ;;  %v3092_v29 = vmul.f32 %v6665_v24, %v2998_v11 }
0x42d4   :  { %v5418_v26 = vadd.f32 -1.0, %v3090_v25 }
0x42d6   :  { %3094 = vrot.lane.b32.xlu0 %v5418_v26, %s7122_s4 }
0x4348   :  { %v3095_v27 = vpop.permute.xlu0 %3094 }
0x4349   :  { %v3097_v28 = vmul.f32 %v6665_v24, %v3095_v27 }
0x434b   :  { %3099 = vrot.lane.b32.xlu1 %v3097_v28, %s7123_s13 }
0x43bd   :  { %v3100_v30 = vpop.permute.xlu1 %3099 }
0x43be   :  { %v3102_v31 = vadd.f32 %v3100_v30, %v3092_v29 }
0x43c0   :  { %6666 = vtanh.f32 %v3102_v31 }
0x43ca   :  { %v6667_v32 = vpop.eup %6666 }
0x43cb   :  { %3105 = vrot.lane.b32.xlu0 %v6667_v32, %s7122_s4 }
0x443d   :  { %v3106_v33 = vpop.permute.xlu0 %3105 }
0x443e   :  { %v3108_v34 = vmul.f32 %v6665_v24, %v3106_v33 }
0x4440   :  { %3110 = vrot.lane.b32.xlu1 %v3108_v34, %s7123_s13  ;;  %v3426_v34 = vld [vmem:[#allocation2 + $0xa] sm:$0x1] }
0x44b2   :  { %v3111_v35 = vpop.permute.xlu1 %3110 }
0x44b3   :  { %3113 = vst.msk [vmem:[#allocation3 + $0x6] sm:$0x1] %vm558_vm3, %v3111_v35  ;;  %6030 = vmatmul.mubr.msk.f32.vlgmr.msra.gmra.mrb[24].mxu1 %vm454_vm4, %v3111_v35 }
0x44b4   :  { %6396 = vmatpush3.bf16.msra.mxu1 %v7661_v61  ;;  %6051 = vmatprep.mubr.msk.f32.mxu1 %vm7120_vm2, %v7121_v12 }
0x44b5   :  { %6397 = vmatprep.subr.bf16.mxu1 %v7119_v9 }
0x44b8   :  { %6399 = vmatpush3.bf16.msra.mxu1 %v7665_v0 }
0x44b9   :  { %6406 = vmatprep.subr.bf16.mxu1 %v7119_v9 }
0x4586   :  { %v3183_v37 = vpop.f32.mrb[24].mxu1 }
0x4587   :  { %v3187_v38 = vadd.f32 %v3183_v37, %v3114_v36  ;;  %v6031_v39 = vpop.f32.mrb[25].mxu1 }
0x4589   :  { %v5420_v40 = vmul.f32 -1.442695, %v3187_v38 }
0x458b   :  { %6668 = vpow2.f32 %v5420_v40 }
0x4595   :  { %v6669_v41 = vpop.eup %6668 }
0x4596   :  { %v3191_v42 = vadd.f32 1.0, %v6669_v41 }
0x4598   :  { %6670 = vrcp.f32 %v3191_v42 }
0x45a2   :  { %v6671_v43 = vpop.eup %6670 }
0x45a3   :  { %v3194_v44 = vmul.f32 2.0, %v6671_v43  ;;  %v3196_v48 = vmul.f32 %v6671_v43, %v3102_v31 }
0x45a5   :  { %v5421_v45 = vadd.f32 -1.0, %v3194_v44 }
0x45a7   :  { %3198 = vrot.lane.b32.xlu0 %v5421_v45, %s7122_s4 }
0x4619   :  { %v3199_v46 = vpop.permute.xlu0 %3198 }
0x461a   :  { %v3201_v47 = vmul.f32 %v6671_v43, %v3199_v46 }
0x461c   :  { %3203 = vrot.lane.b32.xlu1 %v3201_v47, %s7123_s13 }
0x468e   :  { %v3204_v49 = vpop.permute.xlu1 %3203 }
0x468f   :  { %v3206_v50 = vadd.f32 %v3204_v49, %v3196_v48 }
0x4691   :  { %6672 = vtanh.f32 %v3206_v50 }
0x469b   :  { %v6673_v51 = vpop.eup %6672 }
0x469c   :  { %3209 = vrot.lane.b32.xlu0 %v6673_v51, %s7122_s4 }
0x470e   :  { %v3210_v52 = vpop.permute.xlu0 %3209 }
0x470f   :  { %v3212_v53 = vmul.f32 %v6671_v43, %v3210_v52 }
0x4711   :  { %3214 = vrot.lane.b32.xlu1 %v3212_v53, %s7123_s13  ;;  %v3530_v53 = vld [vmem:[#allocation2 + $0xb] sm:$0x1] }
0x4783   :  { %v3215_v54 = vpop.permute.xlu1 %3214 }
0x4784   :  { %3217 = vst.msk [vmem:[#allocation3 + $0x7] sm:$0x1] %vm558_vm3, %v3215_v54  ;;  %6041 = vmatmul.mubr.msk.f32.vlgmr.msra.gmra.mrb[32].mxu0 %vm454_vm4, %v3215_v54 }
0x4785   :  { %6402 = vmatpush3.bf16.msra.mxu0 %v7661_v61  ;;  %6062 = vmatprep.mubr.msk.f32.mxu0 %vm7120_vm2, %v7121_v12 }
0x4786   :  { %6403 = vmatprep.subr.bf16.mxu0 %v7119_v9 }
0x4789   :  { %6405 = vmatpush3.bf16.msra.mxu0 %v7665_v0 }
0x478a   :  { %6412 = vmatprep.subr.bf16.mxu0 %v7119_v9 }
0x4857   :  { %v3287_v55 = vpop.f32.mrb[32].mxu0 }
0x4858   :  { %v3291_v56 = vadd.f32 %v3287_v55, %v3218_v10  ;;  %v6042_v13 = vpop.f32.mrb[33].mxu0 }
0x485a   :  { %v5423_v57 = vmul.f32 -1.442695, %v3291_v56 }
0x485c   :  { %6674 = vpow2.f32 %v5423_v57 }
0x4866   :  { %v6675_v58 = vpop.eup %6674 }
0x4867   :  { %v3295_v59 = vadd.f32 1.0, %v6675_v58 }
0x4869   :  { %6676 = vrcp.f32 %v3295_v59 }
0x4873   :  { %v6677_v60 = vpop.eup %6676 }
0x4874   :  { %v3298_v62 = vmul.f32 2.0, %v6677_v60  ;;  %v3300_v3 = vmul.f32 %v6677_v60, %v3206_v50 }
0x4876   :  { %v5424_v63 = vadd.f32 -1.0, %v3298_v62 }
0x4878   :  { %3302 = vrot.lane.b32.xlu0 %v5424_v63, %s7122_s4 }
0x48ea   :  { %v3303_v1 = vpop.permute.xlu0 %3302 }
0x48eb   :  { %v3305_v2 = vmul.f32 %v6677_v60, %v3303_v1 }
0x48ed   :  { %3307 = vrot.lane.b32.xlu1 %v3305_v2, %s7123_s13 }
0x495f   :  { %v3308_v6 = vpop.permute.xlu1 %3307 }
0x4960   :  { %v3310_v7 = vadd.f32 %v3308_v6, %v3300_v3 }
0x4962   :  { %6678 = vtanh.f32 %v3310_v7 }
0x496c   :  { %v6679_v8 = vpop.eup %6678 }
0x496d   :  { %3313 = vrot.lane.b32.xlu0 %v6679_v8, %s7122_s4 }
0x49df   :  { %v3314_v11 = vpop.permute.xlu0 %3313 }
0x49e0   :  { %v3316_v14 = vmul.f32 %v6677_v60, %v3314_v11 }
0x49e2   :  { %3318 = vrot.lane.b32.xlu1 %v3316_v14, %s7123_s13  ;;  %v3634_v14 = vld [vmem:[#allocation2 + $0xc] sm:$0x1] }
0x4a54   :  { %v3319_v15 = vpop.permute.xlu1 %3318 }
0x4a55   :  { %3321 = vst.msk [vmem:[#allocation3 + $0x8] sm:$0x1] %vm558_vm3, %v3319_v15  ;;  %6052 = vmatmul.mubr.msk.f32.vlgmr.msra.gmra.mrb[26].mxu1 %vm454_vm4, %v3319_v15 }
0x4a56   :  { %6408 = vmatpush3.bf16.msra.mxu1 %v7661_v61  ;;  %6073 = vmatprep.mubr.msk.f32.mxu1 %vm7120_vm2, %v7121_v12 }
0x4a57   :  { %6409 = vmatprep.subr.bf16.mxu1 %v7119_v9 }
0x4a5a   :  { %6411 = vmatpush3.bf16.msra.mxu1 %v7665_v0 }
0x4a5b   :  { %6418 = vmatprep.subr.bf16.mxu1 %v7119_v9 }
0x4b28   :  { %v3391_v5 = vpop.f32.mrb[26].mxu1 }
0x4b29   :  { %v3395_v17 = vadd.f32 %v3391_v5, %v3322_v16  ;;  %v6053_v18 = vpop.f32.mrb[27].mxu1 }
0x4b2b   :  { %v5426_v19 = vmul.f32 -1.442695, %v3395_v17 }
0x4b2d   :  { %6680 = vpow2.f32 %v5426_v19 }
0x4b37   :  { %v6681_v20 = vpop.eup %6680 }
0x4b38   :  { %v3399_v21 = vadd.f32 1.0, %v6681_v20 }
0x4b3a   :  { %6682 = vrcp.f32 %v3399_v21 }
0x4b44   :  { %v6683_v22 = vpop.eup %6682 }
0x4b45   :  { %v3402_v23 = vmul.f32 2.0, %v6683_v22  ;;  %v3404_v27 = vmul.f32 %v6683_v22, %v3310_v7 }
0x4b47   :  { %v5427_v24 = vadd.f32 -1.0, %v3402_v23 }
0x4b49   :  { %3406 = vrot.lane.b32.xlu0 %v5427_v24, %s7122_s4 }
0x4bbb   :  { %v3407_v25 = vpop.permute.xlu0 %3406 }
0x4bbc   :  { %v3409_v26 = vmul.f32 %v6683_v22, %v3407_v25 }
0x4bbe   :  { %3411 = vrot.lane.b32.xlu1 %v3409_v26, %s7123_s13 }
0x4c30   :  { %v3412_v28 = vpop.permute.xlu1 %3411 }
0x4c31   :  { %v3414_v29 = vadd.f32 %v3412_v28, %v3404_v27 }
0x4c33   :  { %6684 = vtanh.f32 %v3414_v29 }
0x4c3d   :  { %v6685_v30 = vpop.eup %6684 }
0x4c3e   :  { %3417 = vrot.lane.b32.xlu0 %v6685_v30, %s7122_s4 }
0x4cb0   :  { %v3418_v31 = vpop.permute.xlu0 %3417 }
0x4cb1   :  { %v3420_v32 = vmul.f32 %v6683_v22, %v3418_v31 }
0x4cb3   :  { %3422 = vrot.lane.b32.xlu1 %v3420_v32, %s7123_s13  ;;  %v3738_v32 = vld [vmem:[#allocation2 + $0xd] sm:$0x1] }
0x4d25   :  { %v3423_v33 = vpop.permute.xlu1 %3422 }
0x4d26   :  { %3425 = vst.msk [vmem:[#allocation3 + $0x9] sm:$0x1] %vm558_vm3, %v3423_v33  ;;  %6063 = vmatmul.mubr.msk.f32.vlgmr.msra.gmra.mrb[34].mxu0 %vm454_vm4, %v3423_v33 }
0x4d27   :  { %6414 = vmatpush3.bf16.msra.mxu0 %v7661_v61  ;;  %6084 = vmatprep.mubr.msk.f32.mxu0 %vm7120_vm2, %v7121_v12 }
0x4d28   :  { %6415 = vmatprep.subr.bf16.mxu0 %v7119_v9 }
0x4d2b   :  { %6417 = vmatpush3.bf16.msra.mxu0 %v7665_v0 }
0x4d2c   :  { %6424 = vmatprep.subr.bf16.mxu0 %v7119_v9 }
0x4df9   :  { %v3495_v35 = vpop.f32.mrb[34].mxu0 }
0x4dfa   :  { %v3499_v36 = vadd.f32 %v3495_v35, %v3426_v34  ;;  %v6064_v37 = vpop.f32.mrb[35].mxu0 }
0x4dfc   :  { %v5429_v38 = vmul.f32 -1.442695, %v3499_v36 }
0x4dfe   :  { %6686 = vpow2.f32 %v5429_v38 }
0x4e08   :  { %v6687_v39 = vpop.eup %6686 }
0x4e09   :  { %v3503_v40 = vadd.f32 1.0, %v6687_v39 }
0x4e0b   :  { %6688 = vrcp.f32 %v3503_v40 }
0x4e15   :  { %v6689_v41 = vpop.eup %6688 }
0x4e16   :  { %v3506_v42 = vmul.f32 2.0, %v6689_v41  ;;  %v3508_v46 = vmul.f32 %v6689_v41, %v3414_v29 }
0x4e18   :  { %v5430_v43 = vadd.f32 -1.0, %v3506_v42 }
0x4e1a   :  { %3510 = vrot.lane.b32.xlu0 %v5430_v43, %s7122_s4 }
0x4e8c   :  { %v3511_v44 = vpop.permute.xlu0 %3510 }
0x4e8d   :  { %v3513_v45 = vmul.f32 %v6689_v41, %v3511_v44 }
0x4e8f   :  { %3515 = vrot.lane.b32.xlu1 %v3513_v45, %s7123_s13 }
0x4f01   :  { %v3516_v47 = vpop.permute.xlu1 %3515 }
0x4f02   :  { %v3518_v48 = vadd.f32 %v3516_v47, %v3508_v46 }
0x4f04   :  { %6690 = vtanh.f32 %v3518_v48 }
0x4f0e   :  { %v6691_v49 = vpop.eup %6690 }
0x4f0f   :  { %3521 = vrot.lane.b32.xlu0 %v6691_v49, %s7122_s4  ;;  %v6729_v49 = vld [vmem:[#allocation5] sm:$0xff] }
0x4f81   :  { %v3522_v50 = vpop.permute.xlu0 %3521 }
0x4f82   :  { %v3524_v51 = vmul.f32 %v6689_v41, %v3522_v50  ;;  %v3842_v50 = vld [vmem:[#allocation2 + $0xe] sm:$0x1] }
0x4f84   :  { %3526 = vrot.lane.b32.xlu1 %v3524_v51, %s7123_s13 }
0x4ff6   :  { %v3527_v52 = vpop.permute.xlu1 %3526 }
0x4ff7   :  { %3529 = vst.msk [vmem:[#allocation3 + $0xa] sm:$0x1] %vm558_vm3, %v3527_v52  ;;  %6074 = vmatmul.mubr.msk.f32.vlgmr.msra.gmra.mrb[28].mxu1 %vm454_vm4, %v3527_v52 }
0x4ff8   :  { %6420 = vmatpush3.bf16.msra.mxu1 %v7661_v61  ;;  %6095 = vmatprep.mubr.msk.f32.mxu1 %vm7120_vm2, %v7121_v12 }
0x4ff9   :  { %6421 = vmatprep.subr.bf16.mxu1 %v7119_v9 }
0x4ffc   :  { %6423 = vmatpush3.bf16.msra.mxu1 %v7665_v0 }
0x4ffd   :  { %6430 = vmatprep.subr.bf16.mxu1 %v7119_v9 }
0x50ca   :  { %v3599_v54 = vpop.f32.mrb[28].mxu1 }
0x50cb   :  { %v3603_v10 = vadd.f32 %v3599_v54, %v3530_v53  ;;  %v6075_v55 = vpop.f32.mrb[29].mxu1 }
0x50cd   :  { %v5432_v56 = vmul.f32 -1.442695, %v3603_v10 }
0x50cf   :  { %6692 = vpow2.f32 %v5432_v56 }
0x50d9   :  { %v6693_v13 = vpop.eup %6692 }
0x50da   :  { %v3607_v57 = vadd.f32 1.0, %v6693_v13 }
0x50dc   :  { %6694 = vrcp.f32 %v3607_v57 }
0x50e6   :  { %v6695_v58 = vpop.eup %6694 }
0x50e7   :  { %v3610_v59 = vmul.f32 2.0, %v6695_v58  ;;  %v3612_v1 = vmul.f32 %v6695_v58, %v3518_v48 }
0x50e9   :  { %v5433_v60 = vadd.f32 -1.0, %v3610_v59 }
0x50eb   :  { %3614 = vrot.lane.b32.xlu0 %v5433_v60, %s7122_s4 }
0x515d   :  { %v3615_v62 = vpop.permute.xlu0 %3614 }
0x515e   :  { %v3617_v63 = vmul.f32 %v6695_v58, %v3615_v62 }
0x5160   :  { %3619 = vrot.lane.b32.xlu1 %v3617_v63, %s7123_s13 }
0x51d2   :  { %v3620_v2 = vpop.permute.xlu1 %3619 }
0x51d3   :  { %v3622_v3 = vadd.f32 %v3620_v2, %v3612_v1 }
0x51d5   :  { %6696 = vtanh.f32 %v3622_v3 }
0x51df   :  { %v6697_v6 = vpop.eup %6696 }
0x51e0   :  { %3625 = vrot.lane.b32.xlu0 %v6697_v6, %s7122_s4 }
0x5252   :  { %v3626_v7 = vpop.permute.xlu0 %3625 }
0x5253   :  { %v3628_v8 = vmul.f32 %v6695_v58, %v3626_v7  ;;  %v3946_v7 = vld [vmem:[#allocation2 + $0xf] sm:$0x1] }
0x5255   :  { %3630 = vrot.lane.b32.xlu1 %v3628_v8, %s7123_s13 }
0x52c7   :  { %v3631_v11 = vpop.permute.xlu1 %3630 }
0x52c8   :  { %3633 = vst.msk [vmem:[#allocation3 + $0xb] sm:$0x1] %vm558_vm3, %v3631_v11  ;;  %6085 = vmatmul.mubr.msk.f32.vlgmr.msra.gmra.mrb[36].mxu0 %vm454_vm4, %v3631_v11 }
0x52c9   :  { %6426 = vmatpush3.bf16.msra.mxu0 %v7661_v61  ;;  %6106 = vmatprep.mubr.msk.f32.mxu0 %vm7120_vm2, %v7121_v12 }
0x52ca   :  { %6427 = vmatprep.subr.bf16.mxu0 %v7119_v9 }
0x52cd   :  { %6429 = vmatpush3.bf16.msra.mxu0 %v7665_v0 }
0x539b   :  { %v3703_v15 = vpop.f32.mrb[36].mxu0 }
0x539c   :  { %v3707_v16 = vadd.f32 %v3703_v15, %v3634_v14  ;;  %v6086_v5 = vpop.f32.mrb[37].mxu0 }
0x539e   :  { %v5435_v17 = vmul.f32 -1.442695, %v3707_v16 }
0x53a0   :  { %6698 = vpow2.f32 %v5435_v17 }
0x53aa   :  { %v6699_v18 = vpop.eup %6698 }
0x53ab   :  { %v3711_v19 = vadd.f32 1.0, %v6699_v18 }
0x53ad   :  { %6700 = vrcp.f32 %v3711_v19 }
0x53b7   :  { %v6701_v20 = vpop.eup %6700 }
0x53b8   :  { %v3714_v21 = vmul.f32 2.0, %v6701_v20  ;;  %v3716_v25 = vmul.f32 %v6701_v20, %v3622_v3 }
0x53ba   :  { %v5436_v22 = vadd.f32 -1.0, %v3714_v21 }
0x53bc   :  { %3718 = vrot.lane.b32.xlu0 %v5436_v22, %s7122_s4 }
0x542e   :  { %v3719_v23 = vpop.permute.xlu0 %3718 }
0x542f   :  { %v3721_v24 = vmul.f32 %v6701_v20, %v3719_v23 }
0x5431   :  { %3723 = vrot.lane.b32.xlu1 %v3721_v24, %s7123_s13 }
0x54a3   :  { %v3724_v26 = vpop.permute.xlu1 %3723 }
0x54a4   :  { %v3726_v27 = vadd.f32 %v3724_v26, %v3716_v25 }
0x54a6   :  { %6702 = vtanh.f32 %v3726_v27 }
0x54b0   :  { %v6703_v28 = vpop.eup %6702 }
0x54b1   :  { %3729 = vrot.lane.b32.xlu0 %v6703_v28, %s7122_s4  ;;  %v4133_v28 = vld [vmem:[#allocation19] sm:$0xff] }
0x5523   :  { %v3730_v29 = vpop.permute.xlu0 %3729 }
0x5524   :  { %v3732_v30 = vmul.f32 %v6701_v20, %v3730_v29  ;;  %v4134_v29 = vld [vmem:[#allocation19 + $0x8] sm:$0x3f] }
0x5526   :  { %3734 = vrot.lane.b32.xlu1 %v3732_v30, %s7123_s13 }
0x5598   :  { %v3735_v31 = vpop.permute.xlu1 %3734 }
0x5599   :  { %3737 = vst.msk [vmem:[#allocation3 + $0xc] sm:$0x1] %vm558_vm3, %v3735_v31  ;;  %6096 = vmatmul.mubr.msk.f32.vlgmr.msra.gmra.mrb[30].mxu1 %vm454_vm4, %v3735_v31  ;;  %v4050_v31 = vld [vmem:[#allocation3] sm:$0xff] }
0x559a   :  { %6432 = vmatpush3.bf16.msra.mxu1 %v7661_v61  ;;  %6117 = vmatprep.mubr.msk.f32.mxu1 %vm7120_vm2, %v7121_v12 }
0x559b   :  { %6433 = vmatprep.subr.bf16.mxu1 %v7119_v9 }
0x559e   :  { %6435 = vmatpush3.bf16.msra.mxu1 %v7665_v0 }
0x559f   :  { %6441 = vmatprep.subr.bf16.mxu1 %v7445_v4 }
0x566c   :  { %v3807_v33 = vpop.f32.mrb[30].mxu1 }
0x566d   :  { %v3811_v34 = vadd.f32 %v3807_v33, %v3738_v32  ;;  %v6097_v35 = vpop.f32.mrb[31].mxu1 }
0x566e   :  { %v6730_v35 = vld [vmem:[#allocation5 + $0x8] sm:$0xff] }
0x566f   :  { %v5438_v36 = vmul.f32 -1.442695, %v3811_v34  ;;  %v4218_v34 = vld [vmem:[#allocation19 + $0x10] sm:$0xff] }
0x5671   :  { %6704 = vpow2.f32 %v5438_v36  ;;  %v4219_v36 = vld [vmem:[#allocation19 + $0x18] sm:$0x3f] }
0x567b   :  { %v6705_v37 = vpop.eup %6704 }
0x567c   :  { %v3815_v38 = vadd.f32 1.0, %v6705_v37  ;;  %v4466_v37 = vld [vmem:[#allocation19 + $0x20] sm:$0xff] }
0x567e   :  { %6706 = vrcp.f32 %v3815_v38  ;;  %v4467_v38 = vld [vmem:[#allocation19 + $0x28] sm:$0x3f] }
0x5688   :  { %v6707_v39 = vpop.eup %6706 }
0x5689   :  { %v3818_v61 = vmul.f32 2.0, %v6707_v39  ;;  %v3820_v0 = vmul.f32 %v6707_v39, %v3726_v27 }
0x568b   :  { %v5439_v40 = vadd.f32 -1.0, %v3818_v61  ;;  %v4216_v61 = vld [vmem:[#allocation20] sm:$0xff] }
0x568d   :  { %3822 = vrot.lane.b32.xlu0 %v5439_v40, %s7122_s4 }
0x56ff   :  { %v3823_v41 = vpop.permute.xlu0 %3822 }
0x5700   :  { %v3825_v42 = vmul.f32 %v6707_v39, %v3823_v41 }
0x5702   :  { %3827 = vrot.lane.b32.xlu1 %v3825_v42, %s7123_s13 }
0x5774   :  { %v3828_v43 = vpop.permute.xlu1 %3827 }
0x5775   :  { %v3830_v44 = vadd.f32 %v3828_v43, %v3820_v0 }
0x5777   :  { %6708 = vtanh.f32 %v3830_v44 }
0x5781   :  { %v6709_v45 = vpop.eup %6708 }
0x5782   :  { %3833 = vrot.lane.b32.xlu0 %v6709_v45, %s7122_s4  ;;  %v6731_v45 = vld [vmem:[#allocation8] ss:$0 sm:$0xff] }
0x57f4   :  { %v3834_v46 = vpop.permute.xlu0 %3833 }
0x57f5   :  { %v3836_v47 = vmul.f32 %v6707_v39, %v3834_v46  ;;  %v4302_v39 = vld [vmem:[#allocation20 + $0x8] sm:$0xff] }
0x57f7   :  { %3838 = vrot.lane.b32.xlu1 %v3836_v47, %s7123_s13 }
0x5869   :  { %v3839_v48 = vpop.permute.xlu1 %3838 }
0x586a   :  { %3841 = vst.msk [vmem:[#allocation3 + $0xd] sm:$0x1] %vm558_vm3, %v3839_v48  ;;  %6107 = vmatmul.mubr.msk.f32.vlgmr.msra.gmra.mrb[38].mxu0 %vm454_vm4, %v3839_v48  ;;  %v5275_v48 = vld [vmem:[#allocation26 + $0x8] sm:$0xff] }
0x586b   :  { %6124 = vmatprep.mubr.msk.f32.mxu0 %vm353_vm1, %v6729_v49 }
0x593d   :  { %v3911_v51 = vpop.f32.mrb[38].mxu0 }
0x593e   :  { %v3915_v52 = vadd.f32 %v3911_v51, %v3842_v50  ;;  %v6108_v53 = vpop.f32.mrb[39].mxu0  ;;  %v5274_v51 = vld [vmem:[#allocation26] sm:$0xff] }
0x593f   :  { %v4550_v53 = vld [vmem:[#allocation20 + $0x10] sm:$0xff] }
0x5940   :  { %v5441_v54 = vmul.f32 -1.442695, %v3915_v52 }
0x5942   :  { %6710 = vpow2.f32 %v5441_v54 }
0x594c   :  { %v6711_v10 = vpop.eup %6710 }
0x594d   :  { %v3919_v55 = vadd.f32 1.0, %v6711_v10 }
0x594f   :  { %6712 = vrcp.f32 %v3919_v55 }
0x5959   :  { %v6713_v56 = vpop.eup %6712 }
0x595a   :  { %v3922_v13 = vmul.f32 2.0, %v6713_v56  ;;  %v3924_v60 = vmul.f32 %v6713_v56, %v3830_v44 }
0x595c   :  { %v5442_v57 = vadd.f32 -1.0, %v3922_v13 }
0x595e   :  { %3926 = vrot.lane.b32.xlu0 %v5442_v57, %s7122_s4 }
0x59d0   :  { %v3927_v58 = vpop.permute.xlu0 %3926 }
0x59d1   :  { %v3929_v59 = vmul.f32 %v6713_v56, %v3927_v58  ;;  %v4657_v58 = vld [vmem:[#allocation23] sm:$0xff] }
0x59d3   :  { %3931 = vrot.lane.b32.xlu1 %v3929_v59, %s7123_s13  ;;  %v5469_v59 = vld [vmem:[%s7962_s14 + $0x20] sm:$0xff] }
0x5a45   :  { %v3932_v62 = vpop.permute.xlu1 %3931 }
0x5a46   :  { %v3934_v63 = vadd.f32 %v3932_v62, %v3924_v60  ;;  %v5470_v60 = vld [vmem:[%s7962_s14 + $0x28] sm:$0xff] }
0x5a47   :  { %v6464_v62 = vpack.c.bf16 %v5470_v60, %v5469_v59 }
0x5a48   :  { %6714 = vtanh.f32 %v3934_v63 }
0x5a52   :  { %v6715_v1 = vpop.eup %6714 }
0x5a53   :  { %3937 = vrot.lane.b32.xlu0 %v6715_v1, %s7122_s4 }
0x5ac5   :  { %v3938_v2 = vpop.permute.xlu0 %3937 }
0x5ac6   :  { %v3940_v3 = vmul.f32 %v6713_v56, %v3938_v2 }
0x5ac8   :  { %3942 = vrot.lane.b32.xlu1 %v3940_v3, %s7123_s13 }
0x5b3a   :  { %v3943_v6 = vpop.permute.xlu1 %3942 }
0x5b3b   :  { %3945 = vst.msk [vmem:[#allocation3 + $0xe] sm:$0x1] %vm558_vm3, %v3943_v6  ;;  %6118 = vmatmul.mubr.msk.f32.vlgmr.msra.gmra.mrb[32].mxu1 %vm454_vm4, %v3943_v6  ;;  %v5461_v6 = vld [vmem:[#allocation22 + $0x1] ss:$0 sm:$0xff] }
0x5b3c   :  { %6443 = vmatpush3.bf16.msra.mxu1 %v7445_v4  ;;  %6131 = vmatprep.mubr.msk.f32.mxu1 %vm353_vm1, %v4133_v28 }
0x5b3d   :  { %6141 = vmatprep.subr.mxu1 %v4302_v39 }
0x5b3f   :  { %6132 = vmatmul.mubr.msk.f32.vlgmr.msra.gmra.mrb[34].mxu1 %vm353_vm1, %v4134_v29 }
0x5b40   :  { %6142 = vmatpush3.msra.mxu1 %v4302_v39 }
0x5b41   :  { %6146 = vmatprep.subr.mxu1 %v4216_v61 }
0x5c0e   :  { %v4015_v8 = vpop.f32.mrb[32].mxu1 }
0x5c0f   :  { %v4019_v11 = vadd.f32 %v4015_v8, %v3946_v7  ;;  %v6119_v14 = vpop.f32.mrb[33].mxu1 }
0x5c11   :  { %v5444_v15 = vmul.f32 -1.442695, %v4019_v11  ;;  %v5462_v11 = vld [vmem:[#allocation22 + $0x2] ss:$0 sm:$0xff] }
0x5c12   :  { %v6133_v40 = vpop.f32.mrb[34].mxu1 }
0x5c13   :  { %6716 = vpow2.f32 %v5444_v15  ;;  %v4207_v41 = vpop.f32.mrb[35].mxu1 }
0x5c1d   :  { %v6717_v16 = vpop.eup %6716 }
0x5c1e   :  { %v4023_v5 = vadd.f32 1.0, %v6717_v16 }
0x5c20   :  { %6718 = vrcp.f32 %v4023_v5 }
0x5c2a   :  { %v6719_v17 = vpop.eup %6718 }
0x5c2b   :  { %v4026_v18 = vmul.f32 2.0, %v6719_v17  ;;  %v4028_v22 = vmul.f32 %v6719_v17, %v3934_v63  ;;  %v5460_v63 = vld [vmem:[#allocation22] ss:$0 sm:$0xff] }
0x5c2d   :  { %v5445_v19 = vadd.f32 -1.0, %v4026_v18 }
0x5c2f   :  { %4030 = vrot.lane.b32.xlu0 %v5445_v19, %s7122_s4  ;;  %v4658_v19 = vld [vmem:[#allocation23 + $0x8] sm:$0xf] }
0x5ca1   :  { %v4031_v20 = vpop.permute.xlu0 %4030 }
0x5ca2   :  { %v4033_v21 = vmul.f32 %v6719_v17, %v4031_v20  ;;  %v4750_v20 = vld [vmem:[#allocation23 + $0x10] sm:$0xff] }
0x5ca4   :  { %4035 = vrot.lane.b32.xlu1 %v4033_v21, %s7123_s13  ;;  %v4751_v21 = vld [vmem:[#allocation23 + $0x18] sm:$0xf] }
0x5d16   :  { %v4036_v23 = vpop.permute.xlu1 %4035 }
0x5d17   :  { %v4038_v24 = vadd.f32 %v4036_v23, %v4028_v22  ;;  %v5001_v22 = vld [vmem:[#allocation23 + $0x20] sm:$0xff]  ;;  %v5002_v23 = vld [vmem:[#allocation23 + $0x28] sm:$0xf] }
0x5d19   :  { %6720 = vtanh.f32 %v4038_v24  ;;  %v5471_v24 = vld [vmem:[%s7962_s14 + $0x30] sm:$0xff] }
0x5d23   :  { %v6721_v25 = vpop.eup %6720 }
0x5d24   :  { %4041 = vrot.lane.b32.xlu0 %v6721_v25, %s7122_s4  ;;  %v5472_v25 = vld [vmem:[%s7962_s14 + $0x38] sm:$0xff] }
0x5d96   :  { %v4042_v26 = vpop.permute.xlu0 %4041 }
0x5d97   :  { %v4044_v27 = vmul.f32 %v6719_v17, %v4042_v26  ;;  %v6468_v26 = vpack.c.bf16 %v5472_v25, %v5471_v24 }
0x5d99   :  { %4046 = vrot.lane.b32.xlu1 %v4044_v27, %s7123_s13  ;;  %v4746_v27 = vld [vmem:[%s7962_s14 + $0x8] sm:$0xff] }
0x5e0b   :  { %v4047_v30 = vpop.permute.xlu1 %4046 }
0x5e0c   :  { %4049 = vst.msk [vmem:[#allocation3 + $0xf] sm:$0x1] %vm558_vm3, %v4047_v30  ;;  %v4747_v30 = vld [vmem:[%s7962_s14 + $0x10] sm:$0xff] }
0x5e13   :  { %v4051_v32 = vld [vmem:[#allocation3 + $0x8] sm:$0xff] }
0x5e14   :  { %v6436_v33 = vpack.c.bf16 %v4051_v32, %v4050_v31 }
0x5e16   :  { %6437 = vmatprep.subr.bf16.mxu0 %v6436_v33 }
0x5e17   :  { %6439 = vmatpush3.bf16.msra.mxu0 %v6436_v33 }
0x5e18   :  { %6445 = vmatprep.subr.bf16.mxu0 %v7445_v4 }
0x5e1a   :  { %6125 = vmatmul.mubr.msk.f32.vlgmr.msra.gmra.mrb[40].mxu0 %vm353_vm1, %v6730_v35  ;;  %v5480_v35 = vld [vmem:[%s7962_s14 + $0x40] sm:$0xff] }
0x5e1b   :  { %6447 = vmatpush3.bf16.msra.mxu0 %v7445_v4  ;;  %6138 = vmatprep.mubr.msk.f32.mxu0 %vm353_vm1, %v4218_v34 }
0x5e1c   :  { %6449 = vmatprep.subr.bf16.mxu0 %v7445_v4 }
0x5e1e   :  { %6139 = vmatmul.mubr.msk.f32.vlgmr.msra.gmra.mrb[42].mxu0 %vm353_vm1, %v4219_v36  ;;  %v5481_v36 = vld [vmem:[%s7962_s14 + $0x48] sm:$0xff] }
0x5e1f   :  { %6451 = vmatpush3.bf16.msra.mxu0 %v7445_v4  ;;  %6155 = vmatprep.mubr.msk.f32.mxu0 %vm353_vm1, %v4466_v37 }
0x5e22   :  { %6156 = vmatmul.mubr.msk.f32.vlgmr.msra.gmra.mrb[44].mxu0 %vm353_vm1, %v4467_v38  ;;  %v6486_v38 = vpack.c.bf16 %v5481_v36, %v5480_v35 }
0x5e23   :  { %6167 = vmatprep.mubr.msk.f32.mxu0 %vm4659_vm5, %v4657_v58 }
0x5eed   :  { %v6126_v42 = vpop.f32.mrb[40].mxu0 }
0x5eee   :  { %v4128_v0 = vsub.f32 %v6126_v42, %v4051_v32  ;;  %v4118_v43 = vpop.f32.mrb[41].mxu0  ;;  %v5486_v42 = vld [vmem:[#allocation25] ss:$0 sm:$0xff] }
0x5eef   :  { %v4127_v44 = vsub.f32 %v4118_v43, %v4050_v31 }
0x5ef0   :  { %v4130_v46 = vmul.f32 %v6731_v45, %v4128_v0 }
0x5ef1   :  { %v4129_v47 = vmul.f32 %v6731_v45, %v4127_v44  ;;  %v6140_v4 = vpop.f32.mrb[42].mxu0  ;;  %v5487_v45 = vld [vmem:[#allocation25 + $0x1] ss:$0 sm:$0xff] }
0x5ef2   :  { %v4132_v49 = vadd.f32 %v4130_v46, %v4051_v32  ;;  %v4292_v50 = vpop.f32.mrb[43].mxu0 }
0x5ef3   :  { %v4131_v52 = vadd.f32 %v4129_v47, %v4050_v31  ;;  %6143 = vmatprep.mubr.msk.f32.mxu1 %vm271_vm0, %v4292_v50  ;;  %v4748_v31 = vld [vmem:[%s7962_s14 + $0x18] sm:$0xff] }
0x5ef4   :  { %6144 = vmatmul.mubr.msk.f32.vlgmr.msra.gmra.mrb[36].mxu1 %vm271_vm0, %v6140_v4  ;;  %v5277_v54 = vmul.f32 %v5275_v48, %v4132_v49  ;;  %v6476_v34 = vpack.c.bf16 %v4748_v31, %v4747_v30  ;;  %v5488_v4 = vld [vmem:[#allocation25 + $0x2] ss:$0 sm:$0xff] }
0x5ef5   :  { %6147 = vmatpush3.msra.mxu1 %v4216_v61  ;;  %v5276_v10 = vmul.f32 %v5274_v51, %v4131_v52  ;;  %6148 = vmatprep.mubr.msk.f32.mxu1 %vm271_vm0, %v4207_v41  ;;  %v6157_v55 = vpop.f32.mrb[44].mxu0  ;;  %v5482_v61 = vld [vmem:[%s7962_s14 + $0x50] sm:$0xff] }
0x5ef6   :  { %v5281_v56 = vsel %vm454_vm4, %v5277_v54, 0.0  ;;  %6158 = vmatprep.subr.mxu1 %v4550_v53  ;;  %v4540_v13 = vpop.f32.mrb[45].mxu0  ;;  %v5195_v54 = vld [vmem:[%s7964_s16] sm:$0x3]  ;;  %s7125_s16 = smov [#allocation29]  }
0x5ef7   :  { %5282 = vadd.xlane.f32.xlu1 %v5281_v56  ;;  %v5278_v57 = vsel %vm454_vm4, %v5276_v10, 0.0  ;;  %v5291_v10 = vld [vmem:[#allocation28] sm:$0x3]  ;;  %s5322_s13 = sshll.u32 %s7125_s16, 4  ;;  %s5323_s13 = int_to_ptr.vmem [resolvable:$true] %s5322_s13 }
0x5ef8   :  { %5279 = vadd.xlane.f32.xlu0 %v5278_v57  ;;  %s7062_s1 = scalar_lea.vmem %s5323_s13, 16  ;;  %s7066_s5 = scalar_lea.vmem %s5323_s13, 32 }
0x5ef9   :  { %p7063_p8 = scmp.ne.s32.totalorder %s5323_s13, %s7062_s1  ;;  %p7067_p9 = scmp.lt.s32.totalorder %s5323_s13, %s5323_s13 }
0x5efa   :  { %p7068_p10 = scmp.lt.s32.totalorder %s7066_s5, %s7062_s1 }
0x5efc   :  { %6149 = vmatmul.mubr.msk.f32.vlgmr.msra.gmra.mrb[36].mxu1 %vm271_vm0, %v6133_v40  ;;  %v5483_v40 = vld [vmem:[%s7962_s14 + $0x58] sm:$0xff]  ;;  %p7069_p11 = por %p7068_p10, %p7067_p9 }
0x5efd   :  { %6159 = vmatpush3.msra.mxu1 %v4550_v53  ;;  %6160 = vmatprep.mubr.msk.f32.mxu1 %vm271_vm0, %v4540_v13  ;;  %v6490_v41 = vpack.c.bf16 %v5483_v40, %v5482_v61 }
0x5efe   :  { %6465 = vmatprep.subr.bf16.mxu1 %v6464_v62  ;;  %p7070_p12 = pnand %p7069_p11, %p7063_p8 }
0x5f04   :  { %6161 = vmatmul.mubr.msk.f32.vlgmr.msra.gmra.mrb[36].mxu1 %vm271_vm0, %v6157_v55 }
0x5f05   :  { %6467 = vmatpush3.bf16.msra.mxu1 %v6464_v62 }
0x5f06   :  { %6469 = vmatprep.subr.bf16.mxu1 %v6468_v26 }
0x5f09   :  { %6471 = vmatpush3.bf16.msra.mxu1 %v6468_v26 }
0x5f84   :  { %v5283_v58 = vpop.xlane.xlu1 %5282 }
0x5f85   :  { %v5280_v59 = vpop.xlane.xlu0 %5279 }
0x5f86   :  { %v5284_v60 = vadd.f32 %v5283_v58, %v5280_v59 }
0x5f88   :  { %v5285_v62 = vrot.slane %v5284_v60, 4 }
0x5fd7   :  { %v6162_v1 = vpop.f32.mrb[36].mxu1 }
0x5fd8   :  { %v4640_v2 = vadd.f32 %v6162_v1, %v5460_v63  ;;  %v4623_v3 = vpop.f32.mrb[37].mxu1 }
0x5fd9   :  { %v4639_v7 = vadd.f32 %v5460_v63, %v4623_v3  ;;  %v5286_v63 = vadd.f32 %v5285_v62, %v5284_v60 }
0x5fda   :  { %v4642_v8 = vmax.f32 %v4640_v2, 0.0 }
0x5fdb   :  { %v4641_v14 = vmax.f32 %v4639_v7, 0.0  ;;  %v5287_v1 = vrot.slane %v5286_v63, 2 }
0x5fdc   :  { %v4649_v15 = vmul.f32 %v5461_v6, %v4642_v8 }
0x5fdd   :  { %v4648_v16 = vmul.f32 %v5461_v6, %v4641_v14  ;;  %v5288_v7 = vadd.f32 %v5287_v1, %v5286_v63 }
0x5fde   :  { %v4656_v5 = vadd.f32 %v5462_v11, %v4649_v15 }
0x5fdf   :  { %v4655_v17 = vadd.f32 %v5462_v11, %v4648_v16  ;;  %v5289_v14 = vrot.slane %v5288_v7, 1 }
0x5fe1   :  { %v6452_v18 = vpack.c.bf16 %v4656_v5, %v4655_v17  ;;  %v5290_v5 = vadd.f32 %v5289_v14, %v5288_v7 }
0x5fe3   :  { %6454 = vmatprep.subr.msk.bf16.mxu0 %vm6453_vm8, %v6452_v18 }
0x5fe4   :  { %6457 = vmatpush3.bf16.msk.msra.mxu0 %vm6453_vm8, %v6452_v18 }
0x5fe5   :  { %6460 = vmatprep.subr.msk.bf16.mxu0 %vm6453_vm8, %v6452_v18 }
0x5fe7   :  { %6168 = vmatmul.mubr.msk.f32.vlgmr.msra.gmra.mrb[46].mxu0 %vm4659_vm5, %v4658_v19 }
0x5fe8   :  { %6463 = vmatpush3.bf16.msk.msra.mxu0 %vm6453_vm8, %v6452_v18  ;;  %6174 = vmatprep.mubr.msk.f32.mxu0 %vm4659_vm5, %v4750_v20 }
0x5fe9   :  { %6482 = vmatprep.subr.msk.bf16.mxu0 %vm6453_vm8, %v6452_v18 }
0x5feb   :  { %6175 = vmatmul.mubr.msk.f32.vlgmr.msra.gmra.mrb[48].mxu0 %vm4659_vm5, %v4751_v21 }
0x5fec   :  { %6485 = vmatpush3.bf16.msk.msra.mxu0 %vm6453_vm8, %v6452_v18  ;;  %6203 = vmatprep.mubr.msk.f32.mxu0 %vm4659_vm5, %v5001_v22  ;;  %v5306_v18 = vld [vmem:[#allocation4] sm:$0x1] }
0x5fed   :  { %6494 = vmatprep.subr.bf16.mxu0 %v7119_v9  ;;  %v4745_v9 = vld [vmem:[%s7962_s14] sm:$0xff] }
0x5fef   :  { %6204 = vmatmul.mubr.msk.f32.vlgmr.msra.gmra.mrb[50].mxu0 %vm4659_vm5, %v5002_v23 }
0x5ff0   :  { %6221 = vmatprep.mubr.msk.f32.mxu0 %vm7120_vm2, %v7121_v12  ;;  %v6472_v12 = vpack.c.bf16 %v4746_v27, %v4745_v9 }
0x5ff2   :  { %6473 = vmatprep.subr.bf16.mxu1 %v6472_v12 }
0x60ba   :  { %v6169_v28 = vpop.f32.mrb[46].mxu0 }
0x60bb   :  { %v4736_v29 = vpop.f32.mrb[47].mxu0 }
0x60be   :  { %v6176_v32 = vpop.f32.mrb[48].mxu0 }
0x60bf   :  { %v4824_v33 = vpop.f32.mrb[49].mxu0 }
0x60c0   :  { %6185 = vmatprep.mubr.msk.f32.mxu1 %vm454_vm4, %v4824_v33 }
0x60c1   :  { %6186 = vmatmul.mubr.msk.f32.vlgmr.msra.gmra.mrb[38].mxu1 %vm454_vm4, %v6176_v32 }
0x60c2   :  { %6475 = vmatpush3.bf16.msra.mxu1 %v6472_v12  ;;  %6196 = vmatprep.mubr.msk.f32.mxu1 %vm454_vm4, %v4736_v29  ;;  %v6205_v37 = vpop.f32.mrb[50].mxu0 }
0x60c3   :  { %6477 = vmatprep.subr.bf16.mxu1 %v6476_v34  ;;  %v5075_v39 = vpop.f32.mrb[51].mxu0 }
0x60c6   :  { %6479 = vmatpush3.bf16.msra.mxu1 %v6476_v34 }
0x60c7   :  { %6487 = vmatprep.subr.bf16.mxu1 %v6486_v38 }
0x60c9   :  { %6197 = vmatmul.mubr.msk.f32.vlgmr.msra.gmra.mrb[38].mxu1 %vm454_vm4, %v6169_v28 }
0x60ca   :  { %6489 = vmatpush3.bf16.msra.mxu1 %v6486_v38  ;;  %6214 = vmatprep.mubr.msk.f32.mxu1 %vm454_vm4, %v5075_v39 }
0x60cb   :  { %6491 = vmatprep.subr.bf16.mxu1 %v6490_v41 }
0x60ce   :  { %6493 = vmatpush3.bf16.msra.mxu1 %v6490_v41 }
0x60d1   :  { %6215 = vmatmul.mubr.msk.f32.vlgmr.msra.gmra.mrb[38].mxu1 %vm454_vm4, %v6205_v37 }
0x61a4   :  { %v6216_v0 = vpop.f32.mrb[38].mxu1 }
0x61a5   :  { %v5178_v43 = vadd.f32 %v6216_v0, %v5486_v42  ;;  %v5161_v44 = vpop.f32.mrb[39].mxu1 }
0x61a6   :  { %v5177_v46 = vadd.f32 %v5486_v42, %v5161_v44 }
0x61a7   :  { %v5180_v47 = vmax.f32 %v5178_v43, 0.0 }
0x61a8   :  { %v5179_v48 = vmax.f32 %v5177_v46, 0.0 }
0x61a9   :  { %v5187_v49 = vmul.f32 %v5487_v45, %v5180_v47 }
0x61aa   :  { %v5186_v50 = vmul.f32 %v5487_v45, %v5179_v48 }
0x61ab   :  { %v5194_v51 = vadd.f32 %v5488_v4, %v5187_v49 }
0x61ac   :  { %v5193_v52 = vadd.f32 %v5488_v4, %v5186_v50 }
0x61ae   :  { %v6495_v53 = vpack.c.bf16 %v5194_v51, %v5193_v52 }
0x61b0   :  { %6497 = vmatpush3.bf16.msk.msra.mxu0 %vm6496_vm10, %v6495_v53 }
0x61b3   :  { %6222 = vmatmul.mubr.msk.f32.vlgmr.msra.gmra.mrb[52].mxu0 %vm5196_vm11, %v5195_v54 }
0x6286   :  { %v5270_v55 = vpop.f32.mrb[52].mxu0 }
0x6287   :  { %v5292_v56 = vmul.f32 %v5291_v10, %v5270_v55  ;;  %v6223_v13 = vpop.f32.mrb[53].mxu0 }
0x6289   :  { %v5294_v57 = vsel %vm5293_vm12, %v5292_v56, 0.0 }
0x628a   :  { %5295 = vadd.xlane.f32.xlu0 %v5294_v57 }
0x6317   :  { %v5296_v2 = vpop.xlane.xlu0 %5295 }
0x6318   :  { %v5298_v3 = vsel %vm5297_vm13, %v5296_v2, 0.0 }
0x6319   :  { %v5299_v6 = vrot.slane %v5298_v3, 4 }
0x631b   :  { %v5300_v8 = vadd.f32 %v5299_v6, %v5298_v3 }
0x631d   :  { %v5301_v11 = vrot.slane %v5300_v8, 2 }
0x631f   :  { %v5302_v15 = vadd.f32 %v5301_v11, %v5300_v8 }
0x6321   :  { %v5303_v16 = vrot.slane %v5302_v15, 1 }
0x6323   :  { %v5304_v17 = vadd.f32 %v5303_v16, %v5302_v15 }
0x6325   :  { %v5305_v19 = vadd.f32 %v5304_v17, %v5290_v5 }
0x6327   :  { %v5307_v20 = vadd.f32 %v5306_v18, %v5305_v19 }
0x6329   :  { %v5491_v21 = vmul.f32 -1.442695, %v5307_v20 }
0x632b   :  { %6722 = vpow2.f32 %v5491_v21 }
0x6335   :  { %v6723_v22 = vpop.eup %6722 }
0x6336   :  { %v5311_v23 = vadd.f32 1.0, %v6723_v22 }
0x6338   :  { %6724 = vrcp.f32 %v5311_v23 }
0x6342   :  { %v6725_v24 = vpop.eup %6724 }
0x6343   :  { %5315 = vst.msk [vmem:[#allocation29] sm:$0x1] %vm5314_vm14, %v6725_v24 }
0x6344   :  { %7073 = shalt.err (!%p7070_p12)
}
0x6345   :  { %s7074_s0 = scalar_lea.hbm %s7968_s20, 16 }
0x6346   :  { %p7075_p13 = scmp.ne.s32.totalorder %s7968_s20, %s7074_s0  ;;  %p7078_p0 = scmp.lt.u32.totalorder %s7074_s0, %s7968_s20 }
0x6348   :  { %p7080_p1 = pnand %p7078_p0, %p7075_p13 }
0x634a   :  { %7083 = shalt.err (!%p7080_p1)
}
0x634b   :  { %5325 = dma.vmem_to_hbm [thread:$0]  %s5323_s13, 16, %s7968_s20, [#allocation7]  }
0x634c   :  { %7100 = dma.done.wait [#allocation7], 16  }
0x634d   :  { %7101 = vsyncadd [#allocation7], 4294967280 }
0x634e   :  { %5329 = vsyncpa [#allocation6], 1 }
0x634f   :  { %5330 = vsyncpa [#allocation9], 1 }
0x6350   :  { %5331 = vsyncpa [#allocation12], 1 }
0x6351   :  { %5332 = vsyncpa [#allocation15], 1 }
0x6352   :  { %5333 = vsyncpa [#allocation18], 1 }
0x6353   :  { %5334 = vsyncpa [#allocation21], 1 }
0x6354   :  { %5335 = vsyncpa [#allocation24], 1 }
0x6355   :  { %5336 = vsyncpa [#allocation27], 1 }
0x6356   :  { %5337 = vsyncpa [#allocation7], 1 }

</bundles_post_ra>
